<compile_context>
chip_gen: v7x
topology: tpu7x:2x2x1
jax: 0.10.0
libtpu: 0.0.40
codegen_flags: <defaults>
</compile_context>

<pallas_src>
import functools

import jax
import jax.numpy as jnp
from jax.experimental import pallas as pl
from jax.experimental.pallas import tpu as pltpu

# MXU operand dtype; accumulation stays f32 (preferred_element_type).
_MXU_DTYPE = jnp.bfloat16


def _fold_bn(bn, eps=1e-5):
    """Fold eval-mode BatchNorm into per-channel (scale, shift)."""
    scale = bn["gamma"] / jnp.sqrt(bn["var"] + eps)
    shift = bn["beta"] - bn["mean"] * scale
    return scale, shift


# ----------------------------------------------------------------------------
# MaxPool2d(2) kernel (many output rows per grid step)
# ----------------------------------------------------------------------------
def _maxpool2x2_kernel(x_ref, o_ref):
    x = x_ref[...]                                    # (R, 2, Wo, 2, C)
    m = jnp.maximum(x[:, 0], x[:, 1])                 # vertical pairs
    o_ref[...] = jnp.maximum(m[:, :, 0], m[:, :, 1])  # horizontal pairs


def _maxpool2x2_pallas(x):
    b, h, wdt, c = x.shape
    assert h % 2 == 0 and wdt % 2 == 0, "MaxPool2d(2) needs even H and W"
    ho, wo = h // 2, wdt // 2
    n = b * ho
    xr = x.reshape(n, 2, wo, 2, c)                    # row-major reinterpretation
    # Largest divisor of n under a ~2 MiB input-block budget (amortizes the
    # ~0.35us per-grid-step overhead).
    cap = max(1, (2 << 20) // max(1, 4 * wo * c * x.dtype.itemsize))
    rows = 1
    for d in range(1, n + 1):
        if n % d == 0 and d <= cap:
            rows = d
    out = pl.pallas_call(
        _maxpool2x2_kernel,
        out_shape=jax.ShapeDtypeStruct((n, wo, c), x.dtype),
        grid_spec=pltpu.PrefetchScalarGridSpec(
            num_scalar_prefetch=0,
            grid=(n // rows,),
            in_specs=[pl.BlockSpec((rows, 2, wo, 2, c),
                                   lambda i: (i, 0, 0, 0, 0))],
            out_specs=pl.BlockSpec((rows, wo, c), lambda i: (i, 0, 0)),
        ),
        compiler_params=pltpu.CompilerParams(dimension_semantics=("parallel",)),
    )(xr)
    return out.reshape(b, ho, wo, c)


# ----------------------------------------------------------------------------
# Fused BasicBlock kernel (conv1+BN1+ReLU+conv2+BN2+ReLU+shortcut+add)
# ----------------------------------------------------------------------------
def _basic_block_kernel(*refs, row_tile, width, identity):
    if identity:
        (x_ref, w1_ref, b1_ref, w2_ref, b2_ref, ml_ref, mr_ref,
         o_ref, y1_ref) = refs
        ss_ref = bs_ref = ws_ref = None
    else:
        (x_ref, w1_ref, b1_ref, w2_ref, b2_ref, ml_ref, mr_ref,
         ss_ref, bs_ref, ws_ref, o_ref, y1_ref) = refs

    r = pl.program_id(1)
    nr = pl.num_programs(1)
    t, w = row_tile, width
    n_in = (t + 4) * w          # padded-input rows loaded (flat)
    n1 = (t + 2) * w            # conv1 rows computed (1-row halo each side)
    cout = y1_ref.shape[-1]

    # ---- load this tile's padded-input window (shared by all vertical taps) --
    start = r * (t * w)
    if (t * w) % 8 == 0:
        start = pl.multiple_of(start, 8)
    xs = x_ref[0, pl.ds(start, n_in), :]               # (n_in, Cin) f32

    # ---- horizontal taps: ONE left/right roll + boundary mask per conv -------
    ml = ml_ref[...]                                    # (n_in, 1) f32
    mr = mr_ref[...]
    x_l = pltpu.roll(xs, shift=1, axis=0) * ml          # column x-1 (kw=0)
    x_r = pltpu.roll(xs, shift=n_in - 1, axis=0) * mr   # column x+1 (kw=2)
    x_c, x_l, x_r = (a.astype(_MXU_DTYPE) for a in (xs, x_l, x_r))

    # ---- conv1 (BN1 scale folded into w1): one im2col matmul, K = 9*Cin ------
    parts = []
    for kh in range(3):
        lo, hi = kh * w, (kh + t + 2) * w
        parts += [x_l[lo:hi], x_c[lo:hi], x_r[lo:hi]]   # kw = 0, 1, 2
    x_cat = jnp.concatenate(parts, axis=-1)             # (n1, 9*Cin) bf16
    acc1 = jnp.dot(x_cat, w1_ref[...], preferred_element_type=jnp.float32)
    y1_ref[...] = jnp.maximum(acc1 + b1_ref[...], 0.0)  # BN1 shift + ReLU (f32)

    # Halo rows outside the image must be zero for conv2's zero padding; only
    # the first / last row tile pays for it (single-row store).
    @pl.when(r == 0)
    def _():
        y1_ref[pl.ds(0, w), :] = jnp.zeros((w, cout), jnp.float32)

    @pl.when(r == nr - 1)
    def _():
        y1_ref[pl.ds((t + 1) * w, w), :] = jnp.zeros((w, cout), jnp.float32)

    # ---- conv2 (BN2 scale folded into w2): same structure on y1 --------------
    y1 = y1_ref[...]                                     # (n1, Cout) f32
    y1_l = pltpu.roll(y1, shift=1, axis=0) * ml[:n1, :]
    y1_r = pltpu.roll(y1, shift=n1 - 1, axis=0) * mr[:n1, :]
    y1_c, y1_l, y1_r = (a.astype(_MXU_DTYPE) for a in (y1, y1_l, y1_r))
    parts2 = []
    for kh in range(3):
        lo, hi = kh * w, (kh + t) * w
        parts2 += [y1_l[lo:hi], y1_c[lo:hi], y1_r[lo:hi]]
    y_cat = jnp.concatenate(parts2, axis=-1)             # (t*w, 9*Cout) bf16
    acc2 = jnp.dot(y_cat, w2_ref[...], preferred_element_type=jnp.float32)
    h2 = jnp.maximum(acc2 + b2_ref[...], 0.0)            # BN2 shift + ReLU (f32)

    # ---- shortcut (f32 epilogue) ----------------------------------------------
    x_sc = xs[2 * w:(2 + t) * w, :]                      # rows of this tile, f32
    if identity:
        sc = x_sc
    else:  # BN -> ReLU -> 1x1 conv
        pre = jnp.maximum(x_sc * ss_ref[...] + bs_ref[...], 0.0)
        sc = jnp.dot(pre.astype(_MXU_DTYPE), ws_ref[...],
                     preferred_element_type=jnp.float32)

    o_ref[0] = (h2 + sc).astype(o_ref.dtype)


def _pick_row_tile(h, wdt, c, requested=None):
    if requested is not None:
        cap = max(1, min(int(requested), h))
    else:
        # ~4 MiB of output rows per tile: amortizes the halo recompute and the
        # per-grid-step overhead (v5e/v6e have 128 MiB VMEM, v7x 64 MiB).
        cap = max(1, (4 << 20) // max(1, wdt * c * 4))
    tile = 1
    for d in range(1, h + 1):
        if h % d == 0 and d <= cap:
            tile = d
    if (tile * wdt) % 8 != 0 and tile != h:
        tile = h   # single tile: start offset 0 is always sublane-aligned
    return tile


def _basic_block_pallas(x, p, *, row_tile=None):
    """x: (B, H, W, Cin) NHWC float32 -> (B, H, W, Cout) float32."""
    b, h, wdt, cin = x.shape
    cout = p["conv1_w"].shape[0]
    identity = "shortcut_w" not in p

    s1, b1 = _fold_bn(p["bn1"])
    s2, b2 = _fold_bn(p["bn2"])
    # Fold per-output-channel BN scale into the conv weights (host-side, free).
    w1f = p["conv1_w"] * s1[:, None, None, None]          # (Cout, Cin, 3, 3)
    w2f = p["conv2_w"] * s2[:, None, None, None]          # (Cout, Cout, 3, 3)
    # (O,I,KH,KW) -> (KH,KW,I,O) -> (9*I, O); matches the in-kernel concat order
    # [kw=0, kw=1, kw=2] per kh.
    w1_t = jnp.transpose(w1f, (2, 3, 1, 0)).reshape(9 * cin, cout).astype(_MXU_DTYPE)
    w2_t = jnp.transpose(w2f, (2, 3, 1, 0)).reshape(9 * cout, cout).astype(_MXU_DTYPE)
    b1r = b1.reshape(1, cout).astype(jnp.float32)
    b2r = b2.reshape(1, cout).astype(jnp.float32)

    th = _pick_row_tile(h, wdt, max(cin, cout), row_tile)
    nr = h // th

    # Zero-pad 2 rows top & bottom (covers both convs' vertical halo), flatten
    # (H, W) -> rows so every in-kernel tensor is lane-friendly 2-D.
    # TODO(synk): switch to overlapping (row_tile+4)-row input windows for very
    # large feature maps on v7x (64 MiB VMEM).
    xp = jnp.pad(x, ((0, 0), (2, 2), (0, 0), (0, 0))).reshape(b, (h + 4) * wdt, cin)

    # Horizontal-boundary masks for the rolled taps (period-W pattern; conv2
    # reuses the first (th+2)*W rows).
    col = jnp.arange((th + 4) * wdt, dtype=jnp.int32) % wdt
    mask_l = (col != 0).astype(jnp.float32)[:, None]
    mask_r = (col != wdt - 1).astype(jnp.float32)[:, None]

    const = lambda i, j: (0, 0)
    in_specs = [
        pl.BlockSpec((1, (h + 4) * wdt, cin), lambda i, j: (i, 0, 0)),
        pl.BlockSpec((9 * cin, cout), const),
        pl.BlockSpec((1, cout), const),
        pl.BlockSpec((9 * cout, cout), const),
        pl.BlockSpec((1, cout), const),
        pl.BlockSpec(((th + 4) * wdt, 1), const),
        pl.BlockSpec(((th + 4) * wdt, 1), const),
    ]
    args = [xp, w1_t, b1r, w2_t, b2r, mask_l, mask_r]
    if identity:
        assert cin == cout, "identity shortcut requires Cin == Cout"
    else:
        ss, bs = _fold_bn(p["bn_s"])
        ws = jnp.transpose(p["shortcut_w"][:, :, 0, 0], (1, 0)).astype(_MXU_DTYPE)
        in_specs += [pl.BlockSpec((1, cin), const),
                     pl.BlockSpec((1, cin), const),
                     pl.BlockSpec((cin, cout), const)]
        args += [ss.reshape(1, cin).astype(jnp.float32),
                 bs.reshape(1, cin).astype(jnp.float32), ws]

    kernel = functools.partial(_basic_block_kernel, row_tile=th, width=wdt,
                               identity=identity)
    out = pl.pallas_call(
        kernel,
        out_shape=jax.ShapeDtypeStruct((b, h * wdt, cout), jnp.float32),
        grid_spec=pltpu.PrefetchScalarGridSpec(
            num_scalar_prefetch=0,
            grid=(b, nr),
            in_specs=in_specs,
            out_specs=pl.BlockSpec((1, th * wdt, cout), lambda i, j: (i, j, 0)),
            scratch_shapes=[pltpu.VMEM(((th + 2) * wdt, cout), jnp.float32)],
        ),
        compiler_params=pltpu.CompilerParams(
            dimension_semantics=("parallel", "parallel"),
            vmem_limit_bytes=64 * 1024 * 1024),
    )(*args)
    return out.reshape(b, h, wdt, cout)


def conv_block_pallas(x_nchw, params, *, downsample=False, row_tile=None):
    """ConvBlock forward. x_nchw: (B, Cin, H, W) f32 -> (B, Cout, H', W')."""
    x = jnp.transpose(x_nchw, (0, 2, 3, 1)).astype(jnp.float32)   # NCHW->NHWC once
    if downsample:
        x = _maxpool2x2_pallas(x)
    for p in params:
        x = _basic_block_pallas(x, p, row_tile=row_tile)
    return jnp.transpose(x, (0, 3, 1, 2))                         # NHWC->NCHW once


# ----------------------------------------------------------------------------
# Pure-JAX reference (independent conv formulation) and test parameters
# ----------------------------------------------------------------------------
def _conv3x3_ref(x, w):
    return jax.lax.conv_general_dilated(
        x, jnp.transpose(w, (2, 3, 1, 0)), (1, 1), "SAME",
        dimension_numbers=("NHWC", "HWIO", "NHWC"),
        precision=jax.lax.Precision.HIGHEST)


def _basic_block_ref(x, p):
    s1, b1 = _fold_bn(p["bn1"])
    s2, b2 = _fold_bn(p["bn2"])
    h = jnp.maximum(_conv3x3_ref(x, p["conv1_w"]) * s1 + b1, 0.0)
    h = jnp.maximum(_conv3x3_ref(h, p["conv2_w"]) * s2 + b2, 0.0)
    if "shortcut_w" in p:
        ss, bs = _fold_bn(p["bn_s"])
        sc = jnp.maximum(x * ss + bs, 0.0)
        sc = jnp.einsum("bhwc,oc->bhwo", sc, p["shortcut_w"][:, :, 0, 0],
                        precision=jax.lax.Precision.HIGHEST)
    else:
        sc = x
    return h + sc


def _conv_block_ref(x_nchw, params, downsample):
    x = jnp.transpose(x_nchw, (0, 2, 3, 1)).astype(jnp.float32)
    if downsample:
        bb, hh, ww, cc = x.shape
        x = x.reshape(bb, hh // 2, 2, ww // 2, 2, cc).max(axis=(2, 4))
    for p in params:
        x = _basic_block_ref(x, p)
    return jnp.transpose(x, (0, 3, 1, 2))


def _bn_params(key, c):
    k1, k2, k3, k4 = jax.random.split(key, 4)
    return dict(gamma=1.0 + 0.1 * jax.random.normal(k1, (c,), jnp.float32),
                beta=0.1 * jax.random.normal(k2, (c,), jnp.float32),
                mean=0.1 * jax.random.normal(k3, (c,), jnp.float32),
                var=0.5 + jax.random.uniform(k4, (c,), jnp.float32))


def _basic_block_params(key, cin, cout):
    k1, k2, k3, k4, k5, k6 = jax.random.split(key, 6)
    p = dict(conv1_w=0.3 * jax.random.normal(k1, (cout, cin, 3, 3), jnp.float32),
             bn1=_bn_params(k2, cout),
             conv2_w=0.3 * jax.random.normal(k3, (cout, cout, 3, 3), jnp.float32),
             bn2=_bn_params(k4, cout))
    if cin != cout:
        p["bn_s"] = _bn_params(k5, cin)
        p["shortcut_w"] = 0.3 * jax.random.normal(k6, (cout, cin, 1, 1), jnp.float32)
    return p


def _conv_block_params(key, cin, cout, depth):
    keys = jax.random.split(key, depth)
    return [_basic_block_params(k, cin if i == 0 else cout, cout)
            for i, k in enumerate(keys)]


if __name__ == "__main__":
    key = jax.random.PRNGKey(0)
    kx, ka, kb = jax.random.split(key, 3)
    x = jax.random.normal(kx, (2, 4, 16, 16), dtype=jnp.float32)

    fwd = jax.jit(conv_block_pallas, static_argnames=("downsample", "row_tile"))

    def _rel_err(out, ref):
        return float(jnp.max(jnp.abs(out - ref)) / (jnp.max(jnp.abs(ref)) + 1e-6))

    # ConvBlock(in=4, out=8, depth=2, downsample=False): block 0 uses the
    # projection shortcut; row_tile=8 gives two row tiles per image and
    # exercises the halo-recompute / edge-zeroing path.
    params_a = _conv_block_params(ka, 4, 8, 2)
    out_a = jax.block_until_ready(fwd(x, params_a, downsample=False, row_tile=8))
    ref_a = _conv_block_ref(x, params_a, downsample=False)
    assert out_a.shape == (2, 8, 16, 16)
    err_a = _rel_err(out_a, ref_a)
    assert err_a < 5e-2, f"config A mismatch: rel err {err_a}"   # bf16 MXU operands

    # ConvBlock(in=4, out=4, depth=1, downsample=True): MaxPool2d(2) kernel and
    # the identity shortcut (no dummy shortcut inputs are passed).
    params_b = _conv_block_params(kb, 4, 4, 1)
    out_b = jax.block_until_ready(fwd(x, params_b, downsample=True))
    ref_b = _conv_block_ref(x, params_b, downsample=True)
    assert out_b.shape == (2, 4, 8, 8)
    err_b = _rel_err(out_b, ref_b)
    assert err_b < 5e-2, f"config B mismatch: rel err {err_b}"

    print("KERNEL_OK")
</pallas_src>

<mosaic_0001>
module attributes {stable_mosaic.version = 11 : i64} {
  func.func @_basic_block_kernel(%arg0: i32, %arg1: i32, %arg2: memref<1x320x8xf32, #tpu.memory_space<vmem>>, %arg3: memref<72x8xbf16, #tpu.memory_space<vmem>>, %arg4: memref<1x8xf32, #tpu.memory_space<vmem>>, %arg5: memref<72x8xbf16, #tpu.memory_space<vmem>>, %arg6: memref<1x8xf32, #tpu.memory_space<vmem>>, %arg7: memref<192x1xf32, #tpu.memory_space<vmem>>, %arg8: memref<192x1xf32, #tpu.memory_space<vmem>>, %arg9: memref<1x128x8xf32, #tpu.memory_space<vmem>>, %arg10: memref<160x8xf32, #tpu.memory_space<vmem>>) attributes {dimension_semantics = [#tpu.dimension_semantics<parallel>, #tpu.dimension_semantics<parallel>], iteration_bounds = array<i64: 2, 2>, scalar_prefetch = 0 : i64, scratch_operands = 1 : i64, tpu.core_type = #tpu.core_type<tc>, window_params = [{transform_indices = @transform_0, window_bounds = array<i64: 1, 320, 8>}, {pipeline_mode = #tpu.pipeline_mode<synchronous>, transform_indices = @transform_1, window_bounds = array<i64: 72, 8>}, {pipeline_mode = #tpu.pipeline_mode<synchronous>, transform_indices = @transform_2, window_bounds = array<i64: 1, 8>}, {pipeline_mode = #tpu.pipeline_mode<synchronous>, transform_indices = @transform_3, window_bounds = array<i64: 72, 8>}, {pipeline_mode = #tpu.pipeline_mode<synchronous>, transform_indices = @transform_4, window_bounds = array<i64: 1, 8>}, {pipeline_mode = #tpu.pipeline_mode<synchronous>, transform_indices = @transform_5, window_bounds = array<i64: 192, 1>}, {pipeline_mode = #tpu.pipeline_mode<synchronous>, transform_indices = @transform_6, window_bounds = array<i64: 192, 1>}, {transform_indices = @transform_7, window_bounds = array<i64: 1, 128, 8>}]} {
    %c128_i32 = arith.constant 128 : i32
    %0 = arith.muli %arg1, %c128_i32 : i32
    %1 = tpu.assume_multiple %0, 8 : i32
    %c0 = arith.constant 0 : index
    %2 = arith.index_cast %1 : i32 to index
    %c0_0 = arith.constant 0 : index
    %3 = vector.load %arg2[%c0, %2, %c0_0] : memref<1x320x8xf32, #tpu.memory_space<vmem>>, vector<1x192x8xf32>
    %4 = vector.shape_cast %3 : vector<1x192x8xf32> to vector<192x8xf32>
    %c0_1 = arith.constant 0 : index
    %c0_2 = arith.constant 0 : index
    %5 = vector.load %arg7[%c0_1, %c0_2] : memref<192x1xf32, #tpu.memory_space<vmem>>, vector<192x1xf32>
    %c0_3 = arith.constant 0 : index
    %c0_4 = arith.constant 0 : index
    %6 = vector.load %arg8[%c0_3, %c0_4] : memref<192x1xf32, #tpu.memory_space<vmem>>, vector<192x1xf32>
    %c1_i32 = arith.constant 1 : i32
    %7 = tpu.dynamic_rotate %4 by %c1_i32 dim 0 : vector<192x8xf32>, i32 -> vector<192x8xf32>
    %8 = vector.broadcast %5 : vector<192x1xf32> to vector<192x8xf32>
    %9 = arith.mulf %7, %8 : vector<192x8xf32>
    %c191_i32 = arith.constant 191 : i32
    %10 = tpu.dynamic_rotate %4 by %c191_i32 dim 0 : vector<192x8xf32>, i32 -> vector<192x8xf32>
    %11 = vector.broadcast %6 : vector<192x1xf32> to vector<192x8xf32>
    %12 = arith.mulf %10, %11 : vector<192x8xf32>
    %13 = arith.truncf %4 : vector<192x8xf32> to vector<192x8xbf16>
    %14 = arith.truncf %9 : vector<192x8xf32> to vector<192x8xbf16>
    %15 = arith.truncf %12 : vector<192x8xf32> to vector<192x8xbf16>
    %16 = vector.extract_strided_slice %14 {offsets = [0, 0], sizes = [160, 8], strides = [1, 1]} : vector<192x8xbf16> to vector<160x8xbf16>
    %17 = vector.extract_strided_slice %13 {offsets = [0, 0], sizes = [160, 8], strides = [1, 1]} : vector<192x8xbf16> to vector<160x8xbf16>
    %18 = vector.extract_strided_slice %15 {offsets = [0, 0], sizes = [160, 8], strides = [1, 1]} : vector<192x8xbf16> to vector<160x8xbf16>
    %19 = vector.extract_strided_slice %14 {offsets = [16, 0], sizes = [160, 8], strides = [1, 1]} : vector<192x8xbf16> to vector<160x8xbf16>
    %20 = vector.extract_strided_slice %13 {offsets = [16, 0], sizes = [160, 8], strides = [1, 1]} : vector<192x8xbf16> to vector<160x8xbf16>
    %21 = vector.extract_strided_slice %15 {offsets = [16, 0], sizes = [160, 8], strides = [1, 1]} : vector<192x8xbf16> to vector<160x8xbf16>
    %22 = vector.extract_strided_slice %14 {offsets = [32, 0], sizes = [160, 8], strides = [1, 1]} : vector<192x8xbf16> to vector<160x8xbf16>
    %23 = vector.extract_strided_slice %13 {offsets = [32, 0], sizes = [160, 8], strides = [1, 1]} : vector<192x8xbf16> to vector<160x8xbf16>
    %24 = vector.extract_strided_slice %15 {offsets = [32, 0], sizes = [160, 8], strides = [1, 1]} : vector<192x8xbf16> to vector<160x8xbf16>
    %25 = tpu.concatenate %16, %17, %18, %19, %20, %21, %22, %23, %24 in 1 : vector<160x8xbf16>, vector<160x8xbf16>, vector<160x8xbf16>, vector<160x8xbf16>, vector<160x8xbf16>, vector<160x8xbf16>, vector<160x8xbf16>, vector<160x8xbf16>, vector<160x8xbf16> -> vector<160x72xbf16>
    %c0_5 = arith.constant 0 : index
    %c0_6 = arith.constant 0 : index
    %26 = vector.load %arg3[%c0_5, %c0_6] : memref<72x8xbf16, #tpu.memory_space<vmem>>, vector<72x8xbf16>
    %cst = arith.constant dense<0.000000e+00> : vector<160x8xf32>
    %27 = tpu.matmul %25, %26, %cst {dimension_numbers = #tpu.dot_dimension_numbers<[1], [0], [0], [1], [0, 0, 1, 1], [], []>} : vector<160x72xbf16>, vector<72x8xbf16>, vector<160x8xf32> -> vector<160x8xf32>
    %c0_7 = arith.constant 0 : index
    %c0_8 = arith.constant 0 : index
    %28 = vector.load %arg4[%c0_7, %c0_8] : memref<1x8xf32, #tpu.memory_space<vmem>>, vector<1x8xf32>
    %29 = vector.broadcast %28 : vector<1x8xf32> to vector<160x8xf32>
    %30 = arith.addf %27, %29 : vector<160x8xf32>
    %cst_9 = arith.constant 0.000000e+00 : f32
    %31 = vector.broadcast %cst_9 : f32 to vector<160x8xf32>
    %32 = arith.maximumf %30, %31 : vector<160x8xf32>
    %c0_10 = arith.constant 0 : index
    %c0_11 = arith.constant 0 : index
    %33 = vector.load %arg10[%c0_10, %c0_11] : memref<160x8xf32, #tpu.memory_space<vmem>>, vector<160x8xf32>
    tpu.vector_store %arg10[%c0_10, %c0_11], %32 {strides = array<i32>} : memref<160x8xf32, #tpu.memory_space<vmem>>, vector<160x8xf32>,
    %c0_i32 = arith.constant 0 : i32
    %34 = arith.cmpi eq, %arg1, %c0_i32 : i32
    %35 = arith.extui %34 : i1 to i32
    %c0_i32_12 = arith.constant 0 : i32
    %36 = arith.cmpi ne, %35, %c0_i32_12 : i32
    scf.if %36 {
      %cst_27 = arith.constant 0.000000e+00 : f32
      %74 = vector.broadcast %cst_27 : f32 to vector<16x8xf32>
      %c0_28 = arith.constant 0 : index
      %c0_29 = arith.constant 0 : index
      %75 = vector.load %arg10[%c0_28, %c0_29] : memref<160x8xf32, #tpu.memory_space<vmem>>, vector<16x8xf32>
      tpu.vector_store %arg10[%c0_28, %c0_29], %74 {strides = array<i32>} : memref<160x8xf32, #tpu.memory_space<vmem>>, vector<16x8xf32>,
    } else {
    }
    %c1_i32_13 = arith.constant 1 : i32
    %37 = arith.cmpi eq, %arg1, %c1_i32_13 : i32
    %38 = arith.extui %37 : i1 to i32
    %c0_i32_14 = arith.constant 0 : i32
    %39 = arith.cmpi ne, %38, %c0_i32_14 : i32
    scf.if %39 {
      %cst_27 = arith.constant 0.000000e+00 : f32
      %74 = vector.broadcast %cst_27 : f32 to vector<16x8xf32>
      %c144 = arith.constant 144 : index
      %c0_28 = arith.constant 0 : index
      %75 = vector.load %arg10[%c144, %c0_28] : memref<160x8xf32, #tpu.memory_space<vmem>>, vector<16x8xf32>
      tpu.vector_store %arg10[%c144, %c0_28], %74 {strides = array<i32>} : memref<160x8xf32, #tpu.memory_space<vmem>>, vector<16x8xf32>,
    } else {
    }
    %c0_15 = arith.constant 0 : index
    %c0_16 = arith.constant 0 : index
    %40 = vector.load %arg10[%c0_15, %c0_16] : memref<160x8xf32, #tpu.memory_space<vmem>>, vector<160x8xf32>
    %c1_i32_17 = arith.constant 1 : i32
    %41 = tpu.dynamic_rotate %40 by %c1_i32_17 dim 0 : vector<160x8xf32>, i32 -> vector<160x8xf32>
    %42 = vector.extract_strided_slice %5 {offsets = [0, 0], sizes = [160, 1], strides = [1, 1]} : vector<192x1xf32> to vector<160x1xf32>
    %43 = vector.broadcast %42 : vector<160x1xf32> to vector<160x8xf32>
    %44 = arith.mulf %41, %43 : vector<160x8xf32>
    %c159_i32 = arith.constant 159 : i32
    %45 = tpu.dynamic_rotate %40 by %c159_i32 dim 0 : vector<160x8xf32>, i32 -> vector<160x8xf32>
    %46 = vector.extract_strided_slice %6 {offsets = [0, 0], sizes = [160, 1], strides = [1, 1]} : vector<192x1xf32> to vector<160x1xf32>
    %47 = vector.broadcast %46 : vector<160x1xf32> to vector<160x8xf32>
    %48 = arith.mulf %45, %47 : vector<160x8xf32>
    %49 = arith.truncf %40 : vector<160x8xf32> to vector<160x8xbf16>
    %50 = arith.truncf %44 : vector<160x8xf32> to vector<160x8xbf16>
    %51 = arith.truncf %48 : vector<160x8xf32> to vector<160x8xbf16>
    %52 = vector.extract_strided_slice %50 {offsets = [0, 0], sizes = [128, 8], strides = [1, 1]} : vector<160x8xbf16> to vector<128x8xbf16>
    %53 = vector.extract_strided_slice %49 {offsets = [0, 0], sizes = [128, 8], strides = [1, 1]} : vector<160x8xbf16> to vector<128x8xbf16>
    %54 = vector.extract_strided_slice %51 {offsets = [0, 0], sizes = [128, 8], strides = [1, 1]} : vector<160x8xbf16> to vector<128x8xbf16>
    %55 = vector.extract_strided_slice %50 {offsets = [16, 0], sizes = [128, 8], strides = [1, 1]} : vector<160x8xbf16> to vector<128x8xbf16>
    %56 = vector.extract_strided_slice %49 {offsets = [16, 0], sizes = [128, 8], strides = [1, 1]} : vector<160x8xbf16> to vector<128x8xbf16>
    %57 = vector.extract_strided_slice %51 {offsets = [16, 0], sizes = [128, 8], strides = [1, 1]} : vector<160x8xbf16> to vector<128x8xbf16>
    %58 = vector.extract_strided_slice %50 {offsets = [32, 0], sizes = [128, 8], strides = [1, 1]} : vector<160x8xbf16> to vector<128x8xbf16>
    %59 = vector.extract_strided_slice %49 {offsets = [32, 0], sizes = [128, 8], strides = [1, 1]} : vector<160x8xbf16> to vector<128x8xbf16>
    %60 = vector.extract_strided_slice %51 {offsets = [32, 0], sizes = [128, 8], strides = [1, 1]} : vector<160x8xbf16> to vector<128x8xbf16>
    %61 = tpu.concatenate %52, %53, %54, %55, %56, %57, %58, %59, %60 in 1 : vector<128x8xbf16>, vector<128x8xbf16>, vector<128x8xbf16>, vector<128x8xbf16>, vector<128x8xbf16>, vector<128x8xbf16>, vector<128x8xbf16>, vector<128x8xbf16>, vector<128x8xbf16> -> vector<128x72xbf16>
    %c0_18 = arith.constant 0 : index
    %c0_19 = arith.constant 0 : index
    %62 = vector.load %arg5[%c0_18, %c0_19] : memref<72x8xbf16, #tpu.memory_space<vmem>>, vector<72x8xbf16>
    %cst_20 = arith.constant dense<0.000000e+00> : vector<128x8xf32>
    %63 = tpu.matmul %61, %62, %cst_20 {dimension_numbers = #tpu.dot_dimension_numbers<[1], [0], [0], [1], [0, 0, 1, 1], [], []>} : vector<128x72xbf16>, vector<72x8xbf16>, vector<128x8xf32> -> vector<128x8xf32>
    %c0_21 = arith.constant 0 : index
    %c0_22 = arith.constant 0 : index
    %64 = vector.load %arg6[%c0_21, %c0_22] : memref<1x8xf32, #tpu.memory_space<vmem>>, vector<1x8xf32>
    %65 = vector.broadcast %64 : vector<1x8xf32> to vector<128x8xf32>
    %66 = arith.addf %63, %65 : vector<128x8xf32>
    %cst_23 = arith.constant 0.000000e+00 : f32
    %67 = vector.broadcast %cst_23 : f32 to vector<128x8xf32>
    %68 = arith.maximumf %66, %67 : vector<128x8xf32>
    %69 = vector.extract_strided_slice %4 {offsets = [32, 0], sizes = [128, 8], strides = [1, 1]} : vector<192x8xf32> to vector<128x8xf32>
    %70 = arith.addf %68, %69 : vector<128x8xf32>
    %c0_24 = arith.constant 0 : index
    %c0_25 = arith.constant 0 : index
    %c0_26 = arith.constant 0 : index
    %71 = vector.load %arg9[%c0_24, %c0_25, %c0_26] : memref<1x128x8xf32, #tpu.memory_space<vmem>>, vector<1x128x8xf32>
    %72 = vector.shape_cast %71 : vector<1x128x8xf32> to vector<128x8xf32>
    %73 = vector.shape_cast %70 : vector<128x8xf32> to vector<1x128x8xf32>
    tpu.vector_store %arg9[%c0_24, %c0_25, %c0_26], %73 {strides = array<i32>} : memref<1x128x8xf32, #tpu.memory_space<vmem>>, vector<1x128x8xf32>,
    return
  }
  func.func @transform_0(%arg0: i32, %arg1: i32) -> (i32, i32, i32) {
    %c0_i32 = arith.constant 0 : i32
    %c0_i32_0 = arith.constant 0 : i32
    %c0_i32_1 = arith.constant 0 : i32
    return %arg0, %c0_i32, %c0_i32_0 : i32, i32, i32
  }
  func.func @transform_1(%arg0: i32, %arg1: i32) -> (i32, i32) {
    %c0_i32 = arith.constant 0 : i32
    %c0_i32_0 = arith.constant 0 : i32
    %c0_i32_1 = arith.constant 0 : i32
    return %c0_i32, %c0_i32_0 : i32, i32
  }
  func.func @transform_2(%arg0: i32, %arg1: i32) -> (i32, i32) {
    %c0_i32 = arith.constant 0 : i32
    %c0_i32_0 = arith.constant 0 : i32
    %c0_i32_1 = arith.constant 0 : i32
    return %c0_i32, %c0_i32_0 : i32, i32
  }
  func.func @transform_3(%arg0: i32, %arg1: i32) -> (i32, i32) {
    %c0_i32 = arith.constant 0 : i32
    %c0_i32_0 = arith.constant 0 : i32
    %c0_i32_1 = arith.constant 0 : i32
    return %c0_i32, %c0_i32_0 : i32, i32
  }
  func.func @transform_4(%arg0: i32, %arg1: i32) -> (i32, i32) {
    %c0_i32 = arith.constant 0 : i32
    %c0_i32_0 = arith.constant 0 : i32
    %c0_i32_1 = arith.constant 0 : i32
    return %c0_i32, %c0_i32_0 : i32, i32
  }
  func.func @transform_5(%arg0: i32, %arg1: i32) -> (i32, i32) {
    %c0_i32 = arith.constant 0 : i32
    %c0_i32_0 = arith.constant 0 : i32
    %c0_i32_1 = arith.constant 0 : i32
    return %c0_i32, %c0_i32_0 : i32, i32
  }
  func.func @transform_6(%arg0: i32, %arg1: i32) -> (i32, i32) {
    %c0_i32 = arith.constant 0 : i32
    %c0_i32_0 = arith.constant 0 : i32
    %c0_i32_1 = arith.constant 0 : i32
    return %c0_i32, %c0_i32_0 : i32, i32
  }
  func.func @transform_7(%arg0: i32, %arg1: i32) -> (i32, i32, i32) {
    %c0_i32 = arith.constant 0 : i32
    %c0_i32_0 = arith.constant 0 : i32
    return %arg0, %arg1, %c0_i32 : i32, i32, i32
  }
}

module attributes {stable_mosaic.version = 11 : i64} {
  func.func @_basic_block_kernel(%arg0: i32, %arg1: i32, %arg2: memref<1x320x4xf32, #tpu.memory_space<vmem>>, %arg3: memref<36x8xbf16, #tpu.memory_space<vmem>>, %arg4: memref<1x8xf32, #tpu.memory_space<vmem>>, %arg5: memref<72x8xbf16, #tpu.memory_space<vmem>>, %arg6: memref<1x8xf32, #tpu.memory_space<vmem>>, %arg7: memref<192x1xf32, #tpu.memory_space<vmem>>, %arg8: memref<192x1xf32, #tpu.memory_space<vmem>>, %arg9: memref<1x4xf32, #tpu.memory_space<vmem>>, %arg10: memref<1x4xf32, #tpu.memory_space<vmem>>, %arg11: memref<4x8xbf16, #tpu.memory_space<vmem>>, %arg12: memref<1x128x8xf32, #tpu.memory_space<vmem>>, %arg13: memref<160x8xf32, #tpu.memory_space<vmem>>) attributes {dimension_semantics = [#tpu.dimension_semantics<parallel>, #tpu.dimension_semantics<parallel>], iteration_bounds = array<i64: 2, 2>, scalar_prefetch = 0 : i64, scratch_operands = 1 : i64, tpu.core_type = #tpu.core_type<tc>, window_params = [{transform_indices = @transform_0, window_bounds = array<i64: 1, 320, 4>}, {pipeline_mode = #tpu.pipeline_mode<synchronous>, transform_indices = @transform_1, window_bounds = array<i64: 36, 8>}, {pipeline_mode = #tpu.pipeline_mode<synchronous>, transform_indices = @transform_2, window_bounds = array<i64: 1, 8>}, {pipeline_mode = #tpu.pipeline_mode<synchronous>, transform_indices = @transform_3, window_bounds = array<i64: 72, 8>}, {pipeline_mode = #tpu.pipeline_mode<synchronous>, transform_indices = @transform_4, window_bounds = array<i64: 1, 8>}, {pipeline_mode = #tpu.pipeline_mode<synchronous>, transform_indices = @transform_5, window_bounds = array<i64: 192, 1>}, {pipeline_mode = #tpu.pipeline_mode<synchronous>, transform_indices = @transform_6, window_bounds = array<i64: 192, 1>}, {pipeline_mode = #tpu.pipeline_mode<synchronous>, transform_indices = @transform_7, window_bounds = array<i64: 1, 4>}, {pipeline_mode = #tpu.pipeline_mode<synchronous>, transform_indices = @transform_8, window_bounds = array<i64: 1, 4>}, {pipeline_mode = #tpu.pipeline_mode<synchronous>, transform_indices = @transform_9, window_bounds = array<i64: 4, 8>}, {transform_indices = @transform_10, window_bounds = array<i64: 1, 128, 8>}]} {
    %c128_i32 = arith.constant 128 : i32
    %0 = arith.muli %arg1, %c128_i32 : i32
    %1 = tpu.assume_multiple %0, 8 : i32
    %c0 = arith.constant 0 : index
    %2 = arith.index_cast %1 : i32 to index
    %c0_0 = arith.constant 0 : index
    %3 = vector.load %arg2[%c0, %2, %c0_0] : memref<1x320x4xf32, #tpu.memory_space<vmem>>, vector<1x192x4xf32>
    %4 = vector.shape_cast %3 : vector<1x192x4xf32> to vector<192x4xf32>
    %c0_1 = arith.constant 0 : index
    %c0_2 = arith.constant 0 : index
    %5 = vector.load %arg7[%c0_1, %c0_2] : memref<192x1xf32, #tpu.memory_space<vmem>>, vector<192x1xf32>
    %c0_3 = arith.constant 0 : index
    %c0_4 = arith.constant 0 : index
    %6 = vector.load %arg8[%c0_3, %c0_4] : memref<192x1xf32, #tpu.memory_space<vmem>>, vector<192x1xf32>
    %c1_i32 = arith.constant 1 : i32
    %7 = tpu.dynamic_rotate %4 by %c1_i32 dim 0 : vector<192x4xf32>, i32 -> vector<192x4xf32>
    %8 = vector.broadcast %5 : vector<192x1xf32> to vector<192x4xf32>
    %9 = arith.mulf %7, %8 : vector<192x4xf32>
    %c191_i32 = arith.constant 191 : i32
    %10 = tpu.dynamic_rotate %4 by %c191_i32 dim 0 : vector<192x4xf32>, i32 -> vector<192x4xf32>
    %11 = vector.broadcast %6 : vector<192x1xf32> to vector<192x4xf32>
    %12 = arith.mulf %10, %11 : vector<192x4xf32>
    %13 = arith.truncf %4 : vector<192x4xf32> to vector<192x4xbf16>
    %14 = arith.truncf %9 : vector<192x4xf32> to vector<192x4xbf16>
    %15 = arith.truncf %12 : vector<192x4xf32> to vector<192x4xbf16>
    %16 = vector.extract_strided_slice %14 {offsets = [0, 0], sizes = [160, 4], strides = [1, 1]} : vector<192x4xbf16> to vector<160x4xbf16>
    %17 = vector.extract_strided_slice %13 {offsets = [0, 0], sizes = [160, 4], strides = [1, 1]} : vector<192x4xbf16> to vector<160x4xbf16>
    %18 = vector.extract_strided_slice %15 {offsets = [0, 0], sizes = [160, 4], strides = [1, 1]} : vector<192x4xbf16> to vector<160x4xbf16>
    %19 = vector.extract_strided_slice %14 {offsets = [16, 0], sizes = [160, 4], strides = [1, 1]} : vector<192x4xbf16> to vector<160x4xbf16>
    %20 = vector.extract_strided_slice %13 {offsets = [16, 0], sizes = [160, 4], strides = [1, 1]} : vector<192x4xbf16> to vector<160x4xbf16>
    %21 = vector.extract_strided_slice %15 {offsets = [16, 0], sizes = [160, 4], strides = [1, 1]} : vector<192x4xbf16> to vector<160x4xbf16>
    %22 = vector.extract_strided_slice %14 {offsets = [32, 0], sizes = [160, 4], strides = [1, 1]} : vector<192x4xbf16> to vector<160x4xbf16>
    %23 = vector.extract_strided_slice %13 {offsets = [32, 0], sizes = [160, 4], strides = [1, 1]} : vector<192x4xbf16> to vector<160x4xbf16>
    %24 = vector.extract_strided_slice %15 {offsets = [32, 0], sizes = [160, 4], strides = [1, 1]} : vector<192x4xbf16> to vector<160x4xbf16>
    %25 = tpu.concatenate %16, %17, %18, %19, %20, %21, %22, %23, %24 in 1 : vector<160x4xbf16>, vector<160x4xbf16>, vector<160x4xbf16>, vector<160x4xbf16>, vector<160x4xbf16>, vector<160x4xbf16>, vector<160x4xbf16>, vector<160x4xbf16>, vector<160x4xbf16> -> vector<160x36xbf16>
    %c0_5 = arith.constant 0 : index
    %c0_6 = arith.constant 0 : index
    %26 = vector.load %arg3[%c0_5, %c0_6] : memref<36x8xbf16, #tpu.memory_space<vmem>>, vector<36x8xbf16>
    %cst = arith.constant dense<0.000000e+00> : vector<160x8xf32>
    %27 = tpu.matmul %25, %26, %cst {dimension_numbers = #tpu.dot_dimension_numbers<[1], [0], [0], [1], [0, 0, 1, 1], [], []>} : vector<160x36xbf16>, vector<36x8xbf16>, vector<160x8xf32> -> vector<160x8xf32>
    %c0_7 = arith.constant 0 : index
    %c0_8 = arith.constant 0 : index
    %28 = vector.load %arg4[%c0_7, %c0_8] : memref<1x8xf32, #tpu.memory_space<vmem>>, vector<1x8xf32>
    %29 = vector.broadcast %28 : vector<1x8xf32> to vector<160x8xf32>
    %30 = arith.addf %27, %29 : vector<160x8xf32>
    %cst_9 = arith.constant 0.000000e+00 : f32
    %31 = vector.broadcast %cst_9 : f32 to vector<160x8xf32>
    %32 = arith.maximumf %30, %31 : vector<160x8xf32>
    %c0_10 = arith.constant 0 : index
    %c0_11 = arith.constant 0 : index
    %33 = vector.load %arg13[%c0_10, %c0_11] : memref<160x8xf32, #tpu.memory_space<vmem>>, vector<160x8xf32>
    tpu.vector_store %arg13[%c0_10, %c0_11], %32 {strides = array<i32>} : memref<160x8xf32, #tpu.memory_space<vmem>>, vector<160x8xf32>,
    %c0_i32 = arith.constant 0 : i32
    %34 = arith.cmpi eq, %arg1, %c0_i32 : i32
    %35 = arith.extui %34 : i1 to i32
    %c0_i32_12 = arith.constant 0 : i32
    %36 = arith.cmpi ne, %35, %c0_i32_12 : i32
    scf.if %36 {
      %cst_35 = arith.constant 0.000000e+00 : f32
      %85 = vector.broadcast %cst_35 : f32 to vector<16x8xf32>
      %c0_36 = arith.constant 0 : index
      %c0_37 = arith.constant 0 : index
      %86 = vector.load %arg13[%c0_36, %c0_37] : memref<160x8xf32, #tpu.memory_space<vmem>>, vector<16x8xf32>
      tpu.vector_store %arg13[%c0_36, %c0_37], %85 {strides = array<i32>} : memref<160x8xf32, #tpu.memory_space<vmem>>, vector<16x8xf32>,
    } else {
    }
    %c1_i32_13 = arith.constant 1 : i32
    %37 = arith.cmpi eq, %arg1, %c1_i32_13 : i32
    %38 = arith.extui %37 : i1 to i32
    %c0_i32_14 = arith.constant 0 : i32
    %39 = arith.cmpi ne, %38, %c0_i32_14 : i32
    scf.if %39 {
      %cst_35 = arith.constant 0.000000e+00 : f32
      %85 = vector.broadcast %cst_35 : f32 to vector<16x8xf32>
      %c144 = arith.constant 144 : index
      %c0_36 = arith.constant 0 : index
      %86 = vector.load %arg13[%c144, %c0_36] : memref<160x8xf32, #tpu.memory_space<vmem>>, vector<16x8xf32>
      tpu.vector_store %arg13[%c144, %c0_36], %85 {strides = array<i32>} : memref<160x8xf32, #tpu.memory_space<vmem>>, vector<16x8xf32>,
    } else {
    }
    %c0_15 = arith.constant 0 : index
    %c0_16 = arith.constant 0 : index
    %40 = vector.load %arg13[%c0_15, %c0_16] : memref<160x8xf32, #tpu.memory_space<vmem>>, vector<160x8xf32>
    %c1_i32_17 = arith.constant 1 : i32
    %41 = tpu.dynamic_rotate %40 by %c1_i32_17 dim 0 : vector<160x8xf32>, i32 -> vector<160x8xf32>
    %42 = vector.extract_strided_slice %5 {offsets = [0, 0], sizes = [160, 1], strides = [1, 1]} : vector<192x1xf32> to vector<160x1xf32>
    %43 = vector.broadcast %42 : vector<160x1xf32> to vector<160x8xf32>
    %44 = arith.mulf %41, %43 : vector<160x8xf32>
    %c159_i32 = arith.constant 159 : i32
    %45 = tpu.dynamic_rotate %40 by %c159_i32 dim 0 : vector<160x8xf32>, i32 -> vector<160x8xf32>
    %46 = vector.extract_strided_slice %6 {offsets = [0, 0], sizes = [160, 1], strides = [1, 1]} : vector<192x1xf32> to vector<160x1xf32>
    %47 = vector.broadcast %46 : vector<160x1xf32> to vector<160x8xf32>
    %48 = arith.mulf %45, %47 : vector<160x8xf32>
    %49 = arith.truncf %40 : vector<160x8xf32> to vector<160x8xbf16>
    %50 = arith.truncf %44 : vector<160x8xf32> to vector<160x8xbf16>
    %51 = arith.truncf %48 : vector<160x8xf32> to vector<160x8xbf16>
    %52 = vector.extract_strided_slice %50 {offsets = [0, 0], sizes = [128, 8], strides = [1, 1]} : vector<160x8xbf16> to vector<128x8xbf16>
    %53 = vector.extract_strided_slice %49 {offsets = [0, 0], sizes = [128, 8], strides = [1, 1]} : vector<160x8xbf16> to vector<128x8xbf16>
    %54 = vector.extract_strided_slice %51 {offsets = [0, 0], sizes = [128, 8], strides = [1, 1]} : vector<160x8xbf16> to vector<128x8xbf16>
    %55 = vector.extract_strided_slice %50 {offsets = [16, 0], sizes = [128, 8], strides = [1, 1]} : vector<160x8xbf16> to vector<128x8xbf16>
    %56 = vector.extract_strided_slice %49 {offsets = [16, 0], sizes = [128, 8], strides = [1, 1]} : vector<160x8xbf16> to vector<128x8xbf16>
    %57 = vector.extract_strided_slice %51 {offsets = [16, 0], sizes = [128, 8], strides = [1, 1]} : vector<160x8xbf16> to vector<128x8xbf16>
    %58 = vector.extract_strided_slice %50 {offsets = [32, 0], sizes = [128, 8], strides = [1, 1]} : vector<160x8xbf16> to vector<128x8xbf16>
    %59 = vector.extract_strided_slice %49 {offsets = [32, 0], sizes = [128, 8], strides = [1, 1]} : vector<160x8xbf16> to vector<128x8xbf16>
    %60 = vector.extract_strided_slice %51 {offsets = [32, 0], sizes = [128, 8], strides = [1, 1]} : vector<160x8xbf16> to vector<128x8xbf16>
    %61 = tpu.concatenate %52, %53, %54, %55, %56, %57, %58, %59, %60 in 1 : vector<128x8xbf16>, vector<128x8xbf16>, vector<128x8xbf16>, vector<128x8xbf16>, vector<128x8xbf16>, vector<128x8xbf16>, vector<128x8xbf16>, vector<128x8xbf16>, vector<128x8xbf16> -> vector<128x72xbf16>
    %c0_18 = arith.constant 0 : index
    %c0_19 = arith.constant 0 : index
    %62 = vector.load %arg5[%c0_18, %c0_19] : memref<72x8xbf16, #tpu.memory_space<vmem>>, vector<72x8xbf16>
    %cst_20 = arith.constant dense<0.000000e+00> : vector<128x8xf32>
    %63 = tpu.matmul %61, %62, %cst_20 {dimension_numbers = #tpu.dot_dimension_numbers<[1], [0], [0], [1], [0, 0, 1, 1], [], []>} : vector<128x72xbf16>, vector<72x8xbf16>, vector<128x8xf32> -> vector<128x8xf32>
    %c0_21 = arith.constant 0 : index
    %c0_22 = arith.constant 0 : index
    %64 = vector.load %arg6[%c0_21, %c0_22] : memref<1x8xf32, #tpu.memory_space<vmem>>, vector<1x8xf32>
    %65 = vector.broadcast %64 : vector<1x8xf32> to vector<128x8xf32>
    %66 = arith.addf %63, %65 : vector<128x8xf32>
    %cst_23 = arith.constant 0.000000e+00 : f32
    %67 = vector.broadcast %cst_23 : f32 to vector<128x8xf32>
    %68 = arith.maximumf %66, %67 : vector<128x8xf32>
    %69 = vector.extract_strided_slice %4 {offsets = [32, 0], sizes = [128, 4], strides = [1, 1]} : vector<192x4xf32> to vector<128x4xf32>
    %c0_24 = arith.constant 0 : index
    %c0_25 = arith.constant 0 : index
    %70 = vector.load %arg9[%c0_24, %c0_25] : memref<1x4xf32, #tpu.memory_space<vmem>>, vector<1x4xf32>
    %71 = vector.broadcast %70 : vector<1x4xf32> to vector<128x4xf32>
    %72 = arith.mulf %69, %71 : vector<128x4xf32>
    %c0_26 = arith.constant 0 : index
    %c0_27 = arith.constant 0 : index
    %73 = vector.load %arg10[%c0_26, %c0_27] : memref<1x4xf32, #tpu.memory_space<vmem>>, vector<1x4xf32>
    %74 = vector.broadcast %73 : vector<1x4xf32> to vector<128x4xf32>
    %75 = arith.addf %72, %74 : vector<128x4xf32>
    %cst_28 = arith.constant 0.000000e+00 : f32
    %76 = vector.broadcast %cst_28 : f32 to vector<128x4xf32>
    %77 = arith.maximumf %75, %76 : vector<128x4xf32>
    %78 = arith.truncf %77 : vector<128x4xf32> to vector<128x4xbf16>
    %c0_29 = arith.constant 0 : index
    %c0_30 = arith.constant 0 : index
    %79 = vector.load %arg11[%c0_29, %c0_30] : memref<4x8xbf16, #tpu.memory_space<vmem>>, vector<4x8xbf16>
    %cst_31 = arith.constant dense<0.000000e+00> : vector<128x8xf32>
    %80 = tpu.matmul %78, %79, %cst_31 {dimension_numbers = #tpu.dot_dimension_numbers<[1], [0], [0], [1], [0, 0, 1, 1], [], []>} : vector<128x4xbf16>, vector<4x8xbf16>, vector<128x8xf32> -> vector<128x8xf32>
    %81 = arith.addf %68, %80 : vector<128x8xf32>
    %c0_32 = arith.constant 0 : index
    %c0_33 = arith.constant 0 : index
    %c0_34 = arith.constant 0 : index
    %82 = vector.load %arg12[%c0_32, %c0_33, %c0_34] : memref<1x128x8xf32, #tpu.memory_space<vmem>>, vector<1x128x8xf32>
    %83 = vector.shape_cast %82 : vector<1x128x8xf32> to vector<128x8xf32>
    %84 = vector.shape_cast %81 : vector<128x8xf32> to vector<1x128x8xf32>
    tpu.vector_store %arg12[%c0_32, %c0_33, %c0_34], %84 {strides = array<i32>} : memref<1x128x8xf32, #tpu.memory_space<vmem>>, vector<1x128x8xf32>,
    return
  }
  func.func @transform_0(%arg0: i32, %arg1: i32) -> (i32, i32, i32) {
    %c0_i32 = arith.constant 0 : i32
    %c0_i32_0 = arith.constant 0 : i32
    %c0_i32_1 = arith.constant 0 : i32
    return %arg0, %c0_i32, %c0_i32_0 : i32, i32, i32
  }
  func.func @transform_1(%arg0: i32, %arg1: i32) -> (i32, i32) {
    %c0_i32 = arith.constant 0 : i32
    %c0_i32_0 = arith.constant 0 : i32
    %c0_i32_1 = arith.constant 0 : i32
    return %c0_i32, %c0_i32_0 : i32, i32
  }
  func.func @transform_2(%arg0: i32, %arg1: i32) -> (i32, i32) {
    %c0_i32 = arith.constant 0 : i32
    %c0_i32_0 = arith.constant 0 : i32
    %c0_i32_1 = arith.constant 0 : i32
    return %c0_i32, %c0_i32_0 : i32, i32
  }
  func.func @transform_3(%arg0: i32, %arg1: i32) -> (i32, i32) {
    %c0_i32 = arith.constant 0 : i32
    %c0_i32_0 = arith.constant 0 : i32
    %c0_i32_1 = arith.constant 0 : i32
    return %c0_i32, %c0_i32_0 : i32, i32
  }
  func.func @transform_4(%arg0: i32, %arg1: i32) -> (i32, i32) {
    %c0_i32 = arith.constant 0 : i32
    %c0_i32_0 = arith.constant 0 : i32
    %c0_i32_1 = arith.constant 0 : i32
    return %c0_i32, %c0_i32_0 : i32, i32
  }
  func.func @transform_5(%arg0: i32, %arg1: i32) -> (i32, i32) {
    %c0_i32 = arith.constant 0 : i32
    %c0_i32_0 = arith.constant 0 : i32
    %c0_i32_1 = arith.constant 0 : i32
    return %c0_i32, %c0_i32_0 : i32, i32
  }
  func.func @transform_6(%arg0: i32, %arg1: i32) -> (i32, i32) {
    %c0_i32 = arith.constant 0 : i32
    %c0_i32_0 = arith.constant 0 : i32
    %c0_i32_1 = arith.constant 0 : i32
    return %c0_i32, %c0_i32_0 : i32, i32
  }
  func.func @transform_7(%arg0: i32, %arg1: i32) -> (i32, i32) {
    %c0_i32 = arith.constant 0 : i32
    %c0_i32_0 = arith.constant 0 : i32
    %c0_i32_1 = arith.constant 0 : i32
    return %c0_i32, %c0_i32_0 : i32, i32
  }
  func.func @transform_8(%arg0: i32, %arg1: i32) -> (i32, i32) {
    %c0_i32 = arith.constant 0 : i32
    %c0_i32_0 = arith.constant 0 : i32
    %c0_i32_1 = arith.constant 0 : i32
    return %c0_i32, %c0_i32_0 : i32, i32
  }
  func.func @transform_9(%arg0: i32, %arg1: i32) -> (i32, i32) {
    %c0_i32 = arith.constant 0 : i32
    %c0_i32_0 = arith.constant 0 : i32
    %c0_i32_1 = arith.constant 0 : i32
    return %c0_i32, %c0_i32_0 : i32, i32
  }
  func.func @transform_10(%arg0: i32, %arg1: i32) -> (i32, i32, i32) {
    %c0_i32 = arith.constant 0 : i32
    %c0_i32_0 = arith.constant 0 : i32
    return %arg0, %arg1, %c0_i32 : i32, i32, i32
  }
}

</mosaic_0001>

<bundles_post_ra>
// kernel: conv_block_pallas.2
= control target key start
LH: loop header
LB: loop body
LE: loop exit
PB: predicated region body
PF: predicated region fallthrough
CT: control target
= control target key end

     0   :  { %s5339_s0 = inlined_call_operand.hbm [shape: f32[2,320,4], index: 0, kind: input, shape index: {}]   ;;  %s5340_s1 = inlined_call_operand.hbm [shape: bf16[36,8], index: 1, kind: input, shape index: {}]   ;;  %s5341_s2 = inlined_call_operand.hbm [shape: f32[1,8], index: 2, kind: input, shape index: {}]   ;;  %s5342_s3 = inlined_call_operand.hbm [shape: bf16[72,8], index: 3, kind: input, shape index: {}]   ;;  %s5343_s4 = inlined_call_operand.hbm [shape: f32[1,8], index: 4, kind: input, shape index: {}]   ;;  %s5344_s5 = inlined_call_operand.hbm [shape: f32[192,1], index: 5, kind: input, shape index: {}]   ;;  %s5345_s6 = inlined_call_operand.hbm [shape: f32[192,1], index: 6, kind: input, shape index: {}]   ;;  %s5346_s7 = inlined_call_operand.hbm [shape: f32[1,4], index: 7, kind: input, shape index: {}]   ;;  %s5347_s8 = inlined_call_operand.hbm [shape: f32[1,4], index: 8, kind: input, shape index: {}]   ;;  %s5348_s9 = inlined_call_operand.hbm [shape: bf16[4,8], index: 9, kind: input, shape index: {}]   ;;  %s5349_s10 = inlined_call_operand.hbm [shape: f32[2,256,8], index: 10, kind: output, shape index: {}]  }
   0x1   :  { %5420 = sst [smem:[#allocation79_spill]] %s5339_s0 }
   0x2   :  { %5421 = sst [smem:[#allocation80_spill]] %s5340_s1 }
   0x3   :  { %5422 = sst [smem:[#allocation81_spill]] %s5341_s2 }
   0x4   :  { %5423 = sst [smem:[#allocation82_spill]] %s5342_s3 }
   0x5   :  { %5424 = sst [smem:[#allocation83_spill]] %s5343_s4 }
   0x6   :  { %5425 = sst [smem:[#allocation84_spill]] %s5349_s10 }
   0x7   :  { %15 = vsyncpa [#allocation4], 0 }
   0x8   :  { %17 = vsyncpa [#allocation4 + $0x1], 0 }
   0x9   :  { %18 = vsyncpa [#allocation7], 0 }
   0xa   :  { %19 = vsyncpa [#allocation10], 0 }
   0xb   :  { %20 = vsyncpa [#allocation13], 0 }
   0xc   :  { %21 = vsyncpa [#allocation16], 0 }
   0xd   :  { %22 = vsyncpa [#allocation19], 0 }
   0xe   :  { %23 = vsyncpa [#allocation5], 0 }
   0xf   :  { %25 = vsyncpa [#allocation5 + $0x1], 0  ;;  %s3590_s13 = smov 0   ;;  %s3592_s14 = smov 0  }
  0x10   :  { %s3594_s15 = smov 0   ;;  %s3596_s16 = smov 0  }
  0x11   :  { %s3598_s17 = smov 0   ;;  %s3600_s18 = smov 0  }
  0x12   :  { %s3602_s19 = smov 0   ;;  %s3604_s20 = smov 0  }
  0x13   :  { %s3606_s21 = smov 0   ;;  %s3608_s22 = smov 0  }
  0x14   :  { %s3610_s23 = smov 0  }
  0x15 LB: > { %5426 = sst [smem:[#allocation28_spill]] %s3462_s13  ;;  %s5350_s24 = sadd.s32 4294967295, %s3502_s23   ;;  %s3502_s23 = sphi %s3610_s23, %s31_s23   ;;  %s3498_s22 = sphi %s3608_s22, %s5584_s22   ;;  %s3494_s21 = sphi %s3606_s21, %s5583_s21   ;;  %s3490_s20 = sphi %s3604_s20, %s5582_s20   ;;  %s3486_s19 = sphi %s3602_s19, %s5581_s19   ;;  %s3482_s18 = sphi %s3600_s18, %s5580_s18   ;;  %s3478_s17 = sphi %s3598_s17, %s5579_s17   ;;  %s3474_s16 = sphi %s3596_s16, %s5578_s16   ;;  %s3470_s15 = sphi %s3594_s15, %s5577_s15   ;;  %s3466_s14 = sphi %s3592_s14, %s5576_s14   ;;  %s3462_s13 = sphi %s3590_s13, %s5575_s13  }
  0x16   : > { %5427 = sst [smem:[#allocation29_spill]] %s3466_s14  ;;  %p2667_p0 = scmp.ge.s32.totalorder %s3502_s23, 1 }
  0x17   : > { %5428 = sst [smem:[#allocation30_spill]] %s3470_s15  ;;  %p3649_p1 = scmp.eq.s32.totalorder %s5350_s24, 0 }
  0x18   : > { %5429 = sst [smem:[#allocation31_spill]] %s3486_s19  ;;  %p291_p2 = scmp.lt.s32.totalorder %s3502_s23, 5 }
  0x19   : > { %5430 = sst [smem:[#allocation32_spill]] %s3490_s20  ;;  %s3504_s27 = smov [#allocation6]  }
  0x1a   : > { %s5431_s25 = scalar_select %p3649_p1, 1, 0 }
  0x1b   : > { %p3654_p3 = pnand %p2667_p0, %p291_p2  ;;  %s303_s28 = sshll.u32 %s3504_s27, 4  ;;  %s3658_s28 = int_to_ptr.vmem [resolvable:$true] %s303_s28 }
  0x1c   : > { %5432 = sst [smem:[#allocation33_spill]] %s5431_s25  ;;  %s3505_s30 = smov [#allocation9]  }
  0x1d   : > { %s5433_s26 = scalar_select %p3654_p3, 1, 0 }
  0x1e   : > { %p2895_p4 = pneg %p3654_p3  ;;  %s327_s11 = sshll.u32 %s3505_s30, 4  ;;  %s3668_s11 = int_to_ptr.vmem [resolvable:$true] %s327_s11 }
  0x1f   : > { %5434 = sst [smem:[#allocation34_spill]] %s5433_s26  ;;  %s3506_s12 = smov [#allocation12]  }
  0x20   : > { %p3664_p5 = pnand %p2895_p4, %p3649_p1  ;;  %s3670_s24 = sshll.u32 %s3506_s12, 4  ;;  %s352_s24 = int_to_ptr.vmem [resolvable:$true] %s3670_s24 }
  0x21   : > { %s5436_s1 = sld [smem:[#allocation80_spill]] }
  0x22   : > { %p3680_p7 = pneg %p3664_p5 }
  0x27   : > { %s3078_s27 = scalar_lea.hbm %s5436_s1, 320 }
  0x28   : > { %p3079_p6 = scmp.ne.s32.totalorder %s5436_s1, %s3078_s27  ;;  %p3085_p10 = scmp.lt.u32.totalorder %s3078_s27, %s5436_s1 }
  0x2a   : > { %p3081_p8 = pnand %p3680_p7, %p3079_p6 }
  0x2c   : > { %p3082_p9 = pneg %p3081_p8 }
  0x2e   : > { %p3087_p11 = pnand %p3085_p10, %p3082_p9 }
  0x30   : > { %3090 = shalt.err (!%p3087_p11)
}
  0x31   : > { %s3091_s10 = scalar_lea.vmem %s3658_s28, 320  ;;  %p3099_p2 = scmp.lt.s32.totalorder %s3658_s28, %s3658_s28 }
  0x32   : > { %p3092_p12 = scmp.ne.s32.totalorder %s3658_s28, %s3091_s10  ;;  %p3100_p4 = scmp.lt.s32.totalorder %s3091_s10, %s3091_s10 }
  0x34   : > { %p3094_p13 = pnand %p3092_p12, %p3680_p7  ;;  %p3101_p6 = por %p3100_p4, %p3099_p2 }
  0x36   : > { %p3095_p0 = pneg %p3094_p13 }
  0x38   : > { %p3102_p8 = pnand %p3101_p6, %p3095_p0 }
  0x3a   : > { %3105 = shalt.err (!%p3102_p8)
}
  0x3b   : > { %s3507_s19 = smov 64   ;;  %s3508_s20 = smov 4  }
  0x3c   : > { %2898 = dma.hbm_to_vmem [thread:$0]  (!%p3664_p5), %s5436_s1, 320, %s3658_s28, [#allocation7], %s3507_s19, %s3507_s19, %s3508_s20  }
  0x3d   : > { %s5438_s3 = sld [smem:[#allocation82_spill]] }
  0x43   : > { %s3106_s13 = scalar_lea.hbm %s5438_s3, 576 }
  0x44   : > { %p3107_p9 = scmp.ne.s32.totalorder %s5438_s3, %s3106_s13  ;;  %p3113_p12 = scmp.lt.u32.totalorder %s3106_s13, %s5438_s3 }
  0x46   : > { %p3109_p10 = pnand %p3107_p9, %p3680_p7 }
  0x48   : > { %p3110_p11 = pneg %p3109_p10 }
  0x4a   : > { %p3115_p13 = pnand %p3113_p12, %p3110_p11 }
  0x4c   : > { %3118 = shalt.err (!%p3115_p13)
}
  0x4d   : > { %s3119_s28 = scalar_lea.vmem %s3668_s11, 576  ;;  %p3127_p6 = scmp.lt.s32.totalorder %s3668_s11, %s3668_s11 }
  0x4e   : > { %p3120_p0 = scmp.ne.s32.totalorder %s3668_s11, %s3119_s28  ;;  %p3128_p8 = scmp.lt.s32.totalorder %s3119_s28, %s3119_s28 }
  0x50   : > { %p3122_p2 = pnand %p3120_p0, %p3680_p7  ;;  %p3129_p9 = por %p3128_p8, %p3127_p6 }
  0x52   : > { %p3123_p4 = pneg %p3122_p2 }
  0x54   : > { %p3130_p10 = pnand %p3129_p9, %p3123_p4 }
  0x56   : > { %3133 = shalt.err (!%p3130_p10)
}
  0x57   : > { %2904 = dma.hbm_to_vmem [thread:$0]  (!%p3664_p5), %s5438_s3, 576, %s3668_s11, [#allocation10], %s3507_s19, %s3507_s19, %s3508_s20  }
  0x58   : > { %s3134_s26 = scalar_lea.hbm %s5344_s5, 3072 }
  0x59   : > { %p3135_p11 = scmp.ne.s32.totalorder %s5344_s5, %s3134_s26  ;;  %p3141_p0 = scmp.lt.u32.totalorder %s3134_s26, %s5344_s5 }
  0x5b   : > { %p3137_p12 = pnand %p3135_p11, %p3680_p7 }
  0x5d   : > { %p3138_p13 = pneg %p3137_p12 }
  0x5f   : > { %p3143_p2 = pnand %p3141_p0, %p3138_p13 }
  0x61   : > { %3146 = shalt.err (!%p3143_p2)
}
  0x62   : > { %s3147_s28 = scalar_lea.vmem %s352_s24, 3072  ;;  %p3155_p9 = scmp.lt.s32.totalorder %s352_s24, %s352_s24 }
  0x63   : > { %p3148_p4 = scmp.ne.s32.totalorder %s352_s24, %s3147_s28  ;;  %p3156_p10 = scmp.lt.s32.totalorder %s3147_s28, %s3147_s28 }
  0x65   : > { %p3150_p6 = pnand %p3148_p4, %p3680_p7  ;;  %p3157_p3 = por %p3156_p10, %p3155_p9 }
  0x67   : > { %p3151_p8 = pneg %p3150_p6 }
  0x69   : > { %p3158_p1 = pnand %p3157_p3, %p3151_p8 }
  0x6b   : > { %3161 = shalt.err (!%p3158_p1)
}
  0x6c   : > { %s5363_s11 = smov 128   ;;  %s5364_s19 = smov 8  }
  0x6d   : > { %2910 = dma.hbm_to_vmem [thread:$0]  (!%p3664_p5), %s5344_s5, 3072, %s352_s24, [#allocation13], %s5363_s11, %s5363_s11, %s5364_s19  }
  0x6e   : > { %s3511_s14 = smov [#allocation15]   ;;  %s3512_s25 = smov [#allocation8]  }
  0x6f   : > { %s378_s15 = sshll.u32 %s3511_s14, 4  ;;  %s317_s26 = sshll.u32 %s3512_s25, 4  ;;  %s379_s15 = int_to_ptr.vmem [resolvable:$true] %s378_s15  ;;  %s318_s26 = int_to_ptr.vmem [resolvable:$true] %s317_s26 }
  0x70   : > { %s3162_s12 = scalar_lea.hbm %s5346_s7, 16 }
  0x71   : > { %p3163_p1 = scmp.ne.s32.totalorder %s5346_s7, %s3162_s12  ;;  %p3169_p12 = scmp.lt.u32.totalorder %s3162_s12, %s5346_s7 }
  0x73   : > { %p3165_p3 = pnand %p3163_p1, %p3680_p7 }
  0x75   : > { %p3166_p11 = pneg %p3165_p3 }
  0x77   : > { %p3171_p13 = pnand %p3169_p12, %p3166_p11 }
  0x79   : > { %3174 = shalt.err (!%p3171_p13)
}
  0x7a   : > { %s3175_s24 = scalar_lea.vmem %s379_s15, 16  ;;  %s3182_s20 = scalar_lea.vmem %s379_s15, 32 }
  0x7b   : > { %p3176_p0 = scmp.ne.s32.totalorder %s379_s15, %s3175_s24  ;;  %p3183_p6 = scmp.lt.s32.totalorder %s379_s15, %s379_s15 }
  0x7c   : > { %p3184_p8 = scmp.lt.s32.totalorder %s3182_s20, %s3175_s24 }
  0x7d   : > { %p3178_p2 = pnand %p3176_p0, %p3680_p7 }
  0x7e   : > { %p3185_p9 = por %p3184_p8, %p3183_p6 }
  0x7f   : > { %p3179_p4 = pneg %p3178_p2 }
  0x81   : > { %p3186_p10 = pnand %p3185_p9, %p3179_p4 }
  0x83   : > { %3189 = shalt.err (!%p3186_p10)
}
  0x84   : > { %2916 = dma.hbm_to_vmem [thread:$0]  (!%p3664_p5), %s5346_s7, 16, %s379_s15, [#allocation16]  }
  0x85   : > { %s5439_s2 = sld [smem:[#allocation81_spill]] }
  0x8b   : > { %s3190_s25 = scalar_lea.hbm %s5439_s2, 16 }
  0x8c   : > { %p3191_p1 = scmp.ne.s32.totalorder %s5439_s2, %s3190_s25  ;;  %p3197_p12 = scmp.lt.u32.totalorder %s3190_s25, %s5439_s2 }
  0x8e   : > { %p3193_p3 = pnand %p3191_p1, %p3680_p7 }
  0x90   : > { %p3194_p11 = pneg %p3193_p3 }
  0x92   : > { %p3199_p13 = pnand %p3197_p12, %p3194_p11 }
  0x94   : > { %3202 = shalt.err (!%p3199_p13)
}
  0x95   : > { %s3203_s28 = scalar_lea.vmem %s318_s26, 16  ;;  %s3210_s15 = scalar_lea.vmem %s318_s26, 32 }
  0x96   : > { %p3204_p0 = scmp.ne.s32.totalorder %s318_s26, %s3203_s28  ;;  %p3211_p6 = scmp.lt.s32.totalorder %s318_s26, %s318_s26 }
  0x97   : > { %p3212_p8 = scmp.lt.s32.totalorder %s3210_s15, %s3203_s28 }
  0x98   : > { %p3206_p2 = pnand %p3204_p0, %p3680_p7 }
  0x99   : > { %p3213_p9 = por %p3212_p8, %p3211_p6 }
  0x9a   : > { %p3207_p4 = pneg %p3206_p2 }
  0x9c   : > { %p3214_p10 = pnand %p3213_p9, %p3207_p4 }
  0x9e   : > { %3217 = shalt.err (!%p3214_p10)
}
  0x9f   : > { %2901 = dma.hbm_to_vmem [thread:$0]  (!%p3664_p5), %s5439_s2, 16, %s318_s26, [#allocation7]  }
  0xa0   : > { %s3513_s13 = smov [#allocation11]   ;;  %s3514_s1 = smov [#allocation14]  }
  0xa1   : > { %s341_s14 = sshll.u32 %s3513_s13, 4  ;;  %s364_s3 = sshll.u32 %s3514_s1, 4  ;;  %s342_s14 = int_to_ptr.vmem [resolvable:$true] %s341_s14  ;;  %s365_s3 = int_to_ptr.vmem [resolvable:$true] %s364_s3 }
  0xa2   : > { %s5440_s4 = sld [smem:[#allocation83_spill]] }
  0xa8   : > { %s3218_s30 = scalar_lea.hbm %s5440_s4, 16 }
  0xa9   : > { %p3219_p1 = scmp.ne.s32.totalorder %s5440_s4, %s3218_s30  ;;  %p3225_p12 = scmp.lt.u32.totalorder %s3218_s30, %s5440_s4 }
  0xab   : > { %p3221_p3 = pnand %p3219_p1, %p3680_p7 }
  0xad   : > { %p3222_p11 = pneg %p3221_p3 }
  0xaf   : > { %p3227_p13 = pnand %p3225_p12, %p3222_p11 }
  0xb1   : > { %3230 = shalt.err (!%p3227_p13)
}
  0xb2   : > { %s3231_s26 = scalar_lea.vmem %s342_s14, 16  ;;  %s3238_s24 = scalar_lea.vmem %s342_s14, 32 }
  0xb3   : > { %p3232_p0 = scmp.ne.s32.totalorder %s342_s14, %s3231_s26  ;;  %p3239_p6 = scmp.lt.s32.totalorder %s342_s14, %s342_s14 }
  0xb4   : > { %p3240_p8 = scmp.lt.s32.totalorder %s3238_s24, %s3231_s26 }
  0xb5   : > { %p3234_p2 = pnand %p3232_p0, %p3680_p7 }
  0xb6   : > { %p3241_p9 = por %p3240_p8, %p3239_p6 }
  0xb7   : > { %p3235_p4 = pneg %p3234_p2 }
  0xb9   : > { %p3242_p10 = pnand %p3241_p9, %p3235_p4 }
  0xbb   : > { %3245 = shalt.err (!%p3242_p10)
}
  0xbc   : > { %2907 = dma.hbm_to_vmem [thread:$0]  (!%p3664_p5), %s5440_s4, 16, %s342_s14, [#allocation10]  }
  0xbd   : > { %s3246_s27 = scalar_lea.hbm %s5345_s6, 3072 }
  0xbe   : > { %p3247_p1 = scmp.ne.s32.totalorder %s5345_s6, %s3246_s27  ;;  %p3253_p12 = scmp.lt.u32.totalorder %s3246_s27, %s5345_s6 }
  0xc0   : > { %p3249_p3 = pnand %p3247_p1, %p3680_p7 }
  0xc2   : > { %p3250_p11 = pneg %p3249_p3 }
  0xc4   : > { %p3255_p13 = pnand %p3253_p12, %p3250_p11 }
  0xc6   : > { %3258 = shalt.err (!%p3255_p13)
}
  0xc7   : > { %s3259_s15 = scalar_lea.vmem %s365_s3, 3072  ;;  %p3267_p6 = scmp.lt.s32.totalorder %s365_s3, %s365_s3 }
  0xc8   : > { %p3260_p0 = scmp.ne.s32.totalorder %s365_s3, %s3259_s15  ;;  %p3268_p8 = scmp.lt.s32.totalorder %s3259_s15, %s3259_s15 }
  0xca   : > { %p3262_p2 = pnand %p3260_p0, %p3680_p7  ;;  %p3269_p9 = por %p3268_p8, %p3267_p6 }
  0xcc   : > { %p3263_p4 = pneg %p3262_p2 }
  0xce   : > { %p3270_p10 = pnand %p3269_p9, %p3263_p4 }
  0xd0   : > { %3273 = shalt.err (!%p3270_p10)
}
  0xd1   : > { %2913 = dma.hbm_to_vmem [thread:$0]  (!%p3664_p5), %s5345_s6, 3072, %s365_s3, [#allocation13], %s5363_s11, %s5363_s11, %s5364_s19  }
  0xd2   : > { %s3515_s24 = smov [#allocation17]   ;;  %s3516_s13 = smov [#allocation18]  }
  0xd3   : > { %s389_s20 = sshll.u32 %s3515_s24, 4  ;;  %s400_s1 = sshll.u32 %s3516_s13, 4  ;;  %s390_s20 = int_to_ptr.vmem [resolvable:$true] %s389_s20  ;;  %s401_s1 = int_to_ptr.vmem [resolvable:$true] %s400_s1 }
  0xd4   : > { %s3274_s30 = scalar_lea.hbm %s5347_s8, 16 }
  0xd5   : > { %p3275_p1 = scmp.ne.s32.totalorder %s5347_s8, %s3274_s30  ;;  %p3281_p12 = scmp.lt.u32.totalorder %s3274_s30, %s5347_s8 }
  0xd7   : > { %p3277_p3 = pnand %p3275_p1, %p3680_p7 }
  0xd9   : > { %p3278_p11 = pneg %p3277_p3 }
  0xdb   : > { %p3283_p13 = pnand %p3281_p12, %p3278_p11 }
  0xdd   : > { %3286 = shalt.err (!%p3283_p13)
}
  0xde   : > { %s3287_s3 = scalar_lea.vmem %s390_s20, 16  ;;  %s3294_s14 = scalar_lea.vmem %s390_s20, 32 }
  0xdf   : > { %p3288_p0 = scmp.ne.s32.totalorder %s390_s20, %s3287_s3  ;;  %p3295_p6 = scmp.lt.s32.totalorder %s390_s20, %s390_s20 }
  0xe0   : > { %p3296_p8 = scmp.lt.s32.totalorder %s3294_s14, %s3287_s3 }
  0xe1   : > { %p3290_p2 = pnand %p3288_p0, %p3680_p7 }
  0xe2   : > { %p3297_p9 = por %p3296_p8, %p3295_p6 }
  0xe3   : > { %p3291_p4 = pneg %p3290_p2 }
  0xe5   : > { %p3298_p10 = pnand %p3297_p9, %p3291_p4 }
  0xe7   : > { %3301 = shalt.err (!%p3298_p10)
}
  0xe8   : > { %2919 = dma.hbm_to_vmem [thread:$0]  (!%p3664_p5), %s5347_s8, 16, %s390_s20, [#allocation16]  }
  0xe9   : > { %s3302_s27 = scalar_lea.hbm %s5348_s9, 32 }
  0xea   : > { %p3303_p1 = scmp.ne.s32.totalorder %s5348_s9, %s3302_s27  ;;  %p3309_p12 = scmp.lt.u32.totalorder %s3302_s27, %s5348_s9 }
  0xec   : > { %p3305_p3 = pnand %p3303_p1, %p3680_p7 }
  0xee   : > { %p3306_p11 = pneg %p3305_p3 }
  0xf0   : > { %p3311_p13 = pnand %p3309_p12, %p3306_p11 }
  0xf2   : > { %3314 = shalt.err (!%p3311_p13)
}
  0xf3   : > { %s3315_s15 = scalar_lea.vmem %s401_s1, 32  ;;  %p3323_p6 = scmp.lt.s32.totalorder %s401_s1, %s401_s1 }
  0xf4   : > { %p3316_p0 = scmp.ne.s32.totalorder %s401_s1, %s3315_s15  ;;  %p3324_p8 = scmp.lt.s32.totalorder %s3315_s15, %s3315_s15 }
  0xf6   : > { %p3318_p2 = pnand %p3316_p0, %p3680_p7  ;;  %p3325_p9 = por %p3324_p8, %p3323_p6 }
  0xf8   : > { %p3319_p4 = pneg %p3318_p2 }
  0xfa   : > { %p3326_p10 = pnand %p3325_p9, %p3319_p4 }
  0xfc   : > { %3329 = shalt.err (!%p3326_p10)
}
  0xfd   : > { %s5441_s0 = sld [smem:[#allocation33_spill]]  ;;  %s5442_s14 = sld [smem:[#allocation30_spill]] }
  0xfe   : > { %2922 = dma.hbm_to_vmem [thread:$0]  (!%p3664_p5), %s5348_s9, 32, %s401_s1, [#allocation19]  }
  0xff   : > { %s2666_s26 = sadd.s32 4294967294, %s3502_s23   ;;  %s5443_s24 = sld [smem:[#allocation29_spill]] }
 0x100   : > { %s40_s29 = sadd.s32 1, %s3494_s21  ;;  %s43_s13 = sadd.s32 1, %s3498_s22 }
 0x101   : > { %p41_p7 = scmp.ge.s32.totalorder %s40_s29, 2  ;;  %s5444_s25 = sld [smem:[#allocation28_spill]] }
 0x102   : > { %s50_s27 = sadd.s32 1, %s3482_s18  ;;  %p57_p1 = scmp.ne.s32.totalorder %s3482_s18, %s3478_s17 }
 0x103   : > { %p58_p3 = scmp.eq.s32.totalorder %s3502_s23, 0  ;;  %s5586_s29 = smov (%p41_p7, %s40_s29), 0 }
 0x104   : > { %s5588_s13 = smov (!%p41_p7, %s43_s13), %s3498_s22  ;;  %p63_p5 = scmp.ne.s32.totalorder %s3478_s17, %s3474_s16 }
 0x105   : > { %p3867_p11 = por %p58_p3, %p57_p1  ;;  %p45_p12 = scmp.ge.s32.totalorder %s5588_s13, 2 }
 0x106   : > { %s263_s30 = ssub.s32 %s3494_s21, %s5586_s29  ;;  %p5446_p13 = scmp.ne.s32.totalorder %s5441_s0, 0 }
 0x107   : > { %s267_s10 = sadd.s32 1, %s5442_s14  ;;  %s5590_s13 = smov (%p45_p12, %s5588_s13), 0 }
 0x108   : > { %p3877_p0 = por %p5446_p13, %p63_p5  ;;  %p277_p2 = scmp.ne.s32.totalorder %s5442_s14, %s5443_s24 }
 0x109   : > { %s5448_s28 = sadd.s32 4294967295, %s3502_s23   ;;  %s47_s15 = ssub.s32 %s3498_s22, %s5590_s13 }
 0x10a   : > { %p278_p4 = scmp.eq.s32.totalorder %s5448_s28, 3  ;;  %p283_p6 = scmp.ne.s32.totalorder %s5443_s24, %s5444_s25 }
 0x10b   : > { %p48_p8 = scmp.eq.s32.totalorder %s47_s15, 0  ;;  %s264_s16 = sor.u32 %s263_s30, %s47_s15 }
 0x10c   : > { %p265_p9 = scmp.eq.s32.totalorder %s264_s16, 0  ;;  %p3892_p10 = por %p278_p4, %p277_p2 }
 0x10d   : > { %s3897_s3 = scalar_select %p48_p8, %s3482_s18, %s50_s27  }
 0x10e   : > { %s5449_s20 = scalar_select %p3892_p10, 1, 0 }
 0x10f   : > { %s5592_s14 = smov (!%p265_p9, %s5442_s14), %s267_s10  ;;  %p284_p7 = scmp.eq.s32.totalorder %s2666_s26, 3 }
 0x110   : > { %p2940_p1 = scmp.lt.s32.totalorder %s3502_s23, 4  ;;  %s411_s0 = sand.u32 1, %s3482_s18  }
 0x111   : > { %s2853_s11 = smul.u32 5120, %s3498_s22  ;;  %p3905_p3 = por %p284_p7, %p283_p6 }
 0x112   : > { %s2852_s24 = smul.u32 320, %s411_s0  ;;  %p3911_p5 = pnand %p2940_p1, %p3867_p11 }
 0x113   : > { %s5450_s19 = scalar_select %p3905_p3, 1, 0 }
 0x114   : > { %s5452_s27 = sld [smem:[#allocation79_spill]]  ;;  %s415_s26 = scalar_lea.vmem [#allocation3], %s2852_s24 }
 0x115   : > { %s422_s15 = sshll.u32 %s415_s26, 4  ;;  %s3922_s1 = scalar_lea.sflag [#allocation4], %s411_s0  ;;  %s3920_s15 = int_to_ptr.vmem [resolvable:$true] %s422_s15 }
 0x116   : > { %p3332_p12 = pneg %p3911_p5 }
 0x11a   : > { %s3918_s10 = scalar_lea.hbm %s5452_s27, %s2853_s11  ;;  %s3335_s28 = scalar_lea.hbm %s5452_s27, 10240 }
 0x11b   : > { %s3330_s16 = scalar_lea.hbm %s3918_s10, 5120  ;;  %p3336_p4 = scmp.lt.u32.totalorder %s3918_s10, %s5452_s27 }
 0x11c   : > { %p3331_p11 = scmp.ne.s32.totalorder %s3918_s10, %s3330_s16  ;;  %p3337_p6 = scmp.lt.u32.totalorder %s3335_s28, %s3330_s16 }
 0x11d   : > { %p3339_p9 = scmp.lt.u32.totalorder %s3330_s16, %s3918_s10 }
 0x11e   : > { %p3333_p13 = pnand %p3332_p12, %p3331_p11  ;;  %p3338_p8 = por %p3337_p6, %p3336_p4 }
 0x120   : > { %p3334_p2 = pneg %p3333_p13  ;;  %p3340_p7 = por %p3339_p9, %p3338_p8 }
 0x122   : > { %p3341_p1 = pnand %p3340_p7, %p3334_p2 }
 0x124   : > { %3344 = shalt.err (!%p3341_p1)
}
 0x125   : > { %s3345_s0 = scalar_lea.vmem %s3920_s15, 5120  ;;  %s3517_s24 = smov [#allocation3]  }
 0x126   : > { %p3346_p11 = scmp.ne.s32.totalorder %s3920_s15, %s3345_s0  ;;  %s3350_s26 = sshll.u32 %s3517_s24, 4  ;;  %s3351_s26 = int_to_ptr.vmem [resolvable:$false] %s3350_s26 }
 0x127   : > { %s3352_s2 = scalar_lea.vmem %s3351_s26, 10240  ;;  %p3353_p10 = scmp.lt.s32.totalorder %s3920_s15, %s3351_s26 }
 0x128   : > { %p3348_p13 = pnand %p3346_p11, %p3332_p12  ;;  %p3354_p4 = scmp.lt.s32.totalorder %s3352_s2, %s3345_s0 }
 0x12a   : > { %p3349_p3 = pneg %p3348_p13  ;;  %p3355_p6 = por %p3354_p4, %p3353_p10 }
 0x12c   : > { %p3356_p8 = pnand %p3355_p6, %p3349_p3 }
 0x12e   : > { %3359 = shalt.err (!%p3356_p8)
}
 0x12f   : > { %s5453_s4 = smov 8   ;;  %s5454_s16 = smov 128  }
 0x130   : > { %2926 = dma.hbm_to_vmem [thread:$0]  (!%p3911_p5), %s3918_s10, 5120, %s3920_s15, %s3922_s1, %s5454_s16, %s5454_s16, %s5453_s4  }
 0x131   : > { %s5455_s11 = sld [smem:[#allocation34_spill]] }
 0x137   : > { %p5456_p12 = scmp.ne.s32.totalorder %s5455_s11, 0 }
 0x139   : > { %434 = sbr.rel (%p5456_p12) target bundleno = 1460 (0x5b4), region = 60 }
 0x140   : > { %s436_s30 = sand.u32 1, %s3478_s17  }
 0x141   : > { %s3956_s28 = smul.u32 320, %s436_s30  ;;  %s437_s0 = scalar_lea.sflag [#allocation4], %s436_s30 }
 0x143   : > { %s440_s24 = scalar_lea.vmem [#allocation3], %s3956_s28 }
 0x144   : > { %3433 = dma.done.wait (%p3877_p0), %s437_s0, 5120  }
 0x145   : > { %3435 = vsyncadd (%p3877_p0), %s437_s0, 4294962176  ;;  %s5457_s25 = sld [smem:[#allocation33_spill]] }
 0x14b   : > { %p5458_p10 = scmp.ne.s32.totalorder %s5457_s25, 0 }
 0x14d   : > { %3437 = dma.done.wait (%p5458_p10), [#allocation7], 336  }
 0x14e   : > { %3439 = vsyncadd (%p5458_p10), [#allocation7], 4294966960 }
 0x14f   : > { %3441 = dma.done.wait (%p5458_p10), [#allocation10], 592  }
 0x150   : > { %3443 = vsyncadd (%p5458_p10), [#allocation10], 4294966704 }
 0x151   : > { %3445 = dma.done.wait (%p5458_p10), [#allocation13], 6144  }
 0x152   : > { %3447 = vsyncadd (%p5458_p10), [#allocation13], 4294961152 }
 0x153   : > { %3449 = dma.done.wait (%p5458_p10), [#allocation16], 32  }
 0x154   : > { %3451 = vsyncadd (%p5458_p10), [#allocation16], 4294967264 }
 0x155   : > { %3453 = dma.done.wait (%p5458_p10), [#allocation19], 32  }
 0x156   : > { %3455 = vsyncadd (%p5458_p10), [#allocation19], 4294967264  ;;  %v3518_v0 = vmov 0   ;;  %v565_v1 = vld [vmem:[#allocation14] sm:$0xff]  ;;  %v543_v2 = vld [vmem:[#allocation12 + $0x10] sm:$0xff]  ;;  %s5459_s12 = sld [smem:[#allocation31_spill]]  ;;  %v613_v35 = vlaneseq }
 0x157   : > { %3069 = vset.pattern.permute.xlu1 %v3518_v0  ;;  %3068 = vset.pattern.permute.xlu0 %v3518_v0  ;;  %v566_v3 = vld [vmem:[#allocation14 + $0x8] sm:$0xff]  ;;  %v544_v4 = vld [vmem:[#allocation12 + $0x18] sm:$0xff]  ;;  %v567_v5 = vld [vmem:[#allocation14 + $0x10] sm:$0xff]  ;;  %s3519_s1 = smov 4   ;;  %s3520_s26 = smov 16   ;;  %vm1434_vm2 = vcmask 1041408  }
 0x158   : > { %835 = vperm.xlu0 %3068, %v565_v1   ;;  %652 = vperm.xlu1 %3069, %v543_v2   ;;  %v568_v6 = vld [vmem:[#allocation14 + $0x18] sm:$0xff]  ;;  %v545_v7 = vld [vmem:[#allocation12 + $0x20] sm:$0xff]  ;;  %v546_v8 = vld [vmem:[#allocation12 + $0x28] sm:$0xff]  ;;  %v3984_v38 = vshrl.u32 %v613_v35, 7  ;;  %s3521_s2 = smov 28   ;;  %s5468_s4 = sld [smem:[#allocation29_spill]] }
 0x159   : > { %v569_v9 = vld [vmem:[#allocation14 + $0x20] sm:$0xff]  ;;  %v570_v10 = vld [vmem:[#allocation14 + $0x28] sm:$0xff]  ;;  %v547_v11 = vld [vmem:[#allocation12 + $0x30] sm:$0xff]  ;;  %s3522_s30 = smov 8   ;;  %s3523_s28 = smov 12   ;;  %vm1208_vm3 = vcmask 31744  }
 0x15a   : > { %v548_v12 = vld [vmem:[#allocation12 + $0x38] sm:$0xff]  ;;  %v571_v13 = vld [vmem:[#allocation14 + $0x30] sm:$0xff]  ;;  %v577_v15 = vld [vmem:[#allocation14 + $0x60] sm:$0xff]  ;;  %vm615_vm0 = vcmp.lt.s32.totalorder %v3984_v38, 1  ;;  %vm808_vm1 = vcmp.lt.s32.totalorder %v3984_v38, 7  ;;  %s3524_s0 = smov 20  }
 0x15b   : > { %v572_v14 = vld [vmem:[#allocation14 + $0x38] sm:$0xff]  ;;  %v578_v16 = vld [vmem:[#allocation14 + $0x68] sm:$0xff]  ;;  %v555_v17 = vld [vmem:[#allocation12 + $0x70] sm:$0xff]  ;;  %s3526_s25 = smov 32   ;;  %vm1239_vm4 = vcmask 64512   ;;  %vm1260_vm5 = vcmask 97280  }
 0x15c   : > { %840 = vperm.xlu0 %3068, %v566_v3   ;;  %657 = vperm.xlu1 %3069, %v544_v4   ;;  %v556_v18 = vld [vmem:[#allocation12 + $0x78] sm:$0xff]  ;;  %v579_v19 = vld [vmem:[#allocation14 + $0x70] sm:$0xff]  ;;  %v549_v21 = vld [vmem:[#allocation12 + $0x40] sm:$0xff]  ;;  %s2690_s10 = sshll.u32 %s5459_s12, 7  ;;  %vm1281_vm6 = vcmask 130048   ;;  %vm1302_vm7 = vcmask 162816  }
 0x15d   : > { %v580_v20 = vld [vmem:[#allocation14 + $0x78] sm:$0xff]  ;;  %v550_v22 = vld [vmem:[#allocation12 + $0x48] sm:$0xff]  ;;  %v557_v23 = vld [vmem:[#allocation12 + $0x80] sm:$0xff]  ;;  %s3988_s15 = scalar_lea.vmem %s440_s24, %s2690_s10 [#allocation3]  ;;  %s3525_s24 = smov 24   ;;  %vm1323_vm8 = vcmask 195584   ;;  %vm1344_vm9 = vcmask 228352  }
 0x15e   : > { %v558_v24 = vld [vmem:[#allocation12 + $0x88] sm:$0xff]  ;;  %v573_v25 = vld [vmem:[#allocation14 + $0x40] sm:$0xff]  ;;  %v551_v29 = vld [vmem:[#allocation12 + $0x50] sm:$0xff]  ;;  %s510_s16 = sand.u32 1, %s5468_s4   ;;  %vm1365_vm10 = vcmask 261120   ;;  %vm1413_vm11 = vcmask 293888  }
 0x15f   : > { %v574_v26 = vld [vmem:[#allocation14 + $0x48] sm:$0xff]  ;;  %v581_v27 = vld [vmem:[#allocation14 + $0x80] sm:$0xff]  ;;  %v552_v30 = vld [vmem:[#allocation12 + $0x58] sm:$0xff]  ;;  %s4098_s11 = sshll.u32 %s510_s16, 7  ;;  %p2705_p0 = scmp.ne.s32.totalorder %s5459_s12, 0 }
 0x160   : > { %845 = vperm.xlu0 %3068, %v567_v5   ;;  %850 = vperm.xlu1 %3069, %v568_v6   ;;  %v582_v28 = vld [vmem:[#allocation14 + $0x88] sm:$0xff]  ;;  %v559_v31 = vld [vmem:[#allocation12 + $0x90] sm:$0xff]  ;;  %v560_v32 = vld [vmem:[#allocation12 + $0x98] sm:$0xff]  ;;  %s4770_s10 = scalar_lea.vmem [#allocation20], %s4098_s11 }
 0x161   : > { %v575_v33 = vld [vmem:[#allocation14 + $0x50] sm:$0xff]  ;;  %v576_v34 = vld [vmem:[#allocation14 + $0x58] sm:$0xff]  ;;  %v3991_v39 = vld [vmem:[%s3988_s15 + $0x60] sm:$0xff] }
 0x162   : > { %v583_v36 = vld [vmem:[#allocation14 + $0x90] sm:$0xff]  ;;  %v584_v37 = vld [vmem:[#allocation14 + $0x98] sm:$0xff]  ;;  %5460 = vst [vmem:[#allocation35_spill] sm:$0xff] %v3991_v39  ;;  %v553_v41 = vld [vmem:[#allocation12 + $0x60] sm:$0xff]  ;;  %v5369_v44 = vrot.slane %v3991_v39, 7 }
 0x163   : > { %v3994_v40 = vld [vmem:[%s3988_s15 + $0x68] sm:$0xff]  ;;  %v561_v46 = vld [vmem:[#allocation12 + $0xa0] sm:$0xff]  ;;  %v564_v51 = vld [vmem:[#allocation12 + $0xb8] sm:$0xff] }
 0x164   : > { %662 = vperm.xlu0 %3068, %v545_v7   ;;  %667 = vperm.xlu1 %3069, %v546_v8   ;;  %5461 = vst [vmem:[#allocation36_spill] sm:$0xff] %v3994_v40  ;;  %v554_v42 = vld [vmem:[#allocation12 + $0x68] sm:$0xff]  ;;  %v602_v43 = vrot.slane %v3994_v40, 7  ;;  %v585_v48 = vld [vmem:[#allocation14 + $0xa0] sm:$0xff]  ;;  %v563_v50 = vld [vmem:[#allocation12 + $0xb0] sm:$0xff]  ;;  %v4047_v4 = vpack.c.bf16 %v3994_v40, %v3991_v39 }
 0x165   : > { %v562_v47 = vld [vmem:[#allocation12 + $0xa8] sm:$0xff]  ;;  %v587_v52 = vld [vmem:[#allocation14 + $0xb0] sm:$0xff]  ;;  %v588_v53 = vld [vmem:[#allocation14 + $0xb8] sm:$0xff] }
 0x166   : > { %v4005_v45 = vsel %vm615_vm0, %v5369_v44, %v602_v43  ;;  %v586_v49 = vld [vmem:[#allocation14 + $0xa8] sm:$0xff]  ;;  %v541_v55 = vld [vmem:[#allocation12] sm:$0xff]  ;;  %v519_v56 = vld [vmem:[%s3988_s15 + $0x10] sm:$0xff] }
 0x167   : > { %v542_v54 = vld [vmem:[#allocation12 + $0x8] sm:$0xff]  ;;  %v4009_v57 = vld [vmem:[%s3988_s15 + $0x18] sm:$0xff]  ;;  %v4031_v1 = vld [vmem:[%s3988_s15 + $0x30] sm:$0xff] }
 0x168   : > { %855 = vperm.xlu0 %3068, %v569_v9   ;;  %860 = vperm.xlu1 %3069, %v570_v10   ;;  %v4012_v58 = vld [vmem:[%s3988_s15] sm:$0xff]  ;;  %v4015_v59 = vld [vmem:[%s3988_s15 + $0x8] sm:$0xff]  ;;  %v978_v60 = vpack.c.bf16 %v4009_v57, %v519_v56  ;;  %5464 = vst [vmem:[#allocation39_spill] sm:$0xff] %v4031_v1  ;;  %v4034_v2 = vld [vmem:[%s3988_s15 + $0x38] sm:$0xff]  ;;  %v786_v10 = vrot.slane %v519_v56, 1 }
 0x169   : > { %v977_v61 = vpack.c.bf16 %v4015_v59, %v4012_v58  ;;  %v4021_v62 = vld [vmem:[%s3988_s15 + $0x20] sm:$0xff]  ;;  %v4024_v63 = vld [vmem:[%s3988_s15 + $0x28] sm:$0xff]  ;;  %5465 = vst [vmem:[#allocation40_spill] sm:$0xff] %v4034_v2  ;;  %v4040_v3 = vpack.c.bf16 %v4034_v2, %v4031_v1  ;;  %v4050_v5 = vld [vmem:[%s3988_s15 + $0x70] sm:$0xff]  ;;  %v5366_v8 = vrot.slane %v4012_v58, 1  ;;  %v785_v9 = vrot.slane %v4015_v59, 1 }
 0x16a   : > { %5462 = vst [vmem:[#allocation37_spill] sm:$0xff] %v4021_v62  ;;  %5463 = vst [vmem:[#allocation38_spill] sm:$0xff] %v4024_v63  ;;  %v979_v0 = vpack.c.bf16 %v4024_v63, %v4021_v62  ;;  %v4053_v6 = vld [vmem:[%s3988_s15 + $0x78] sm:$0xff] }
 0x16b   : > { %5466 = vst [vmem:[#allocation41_spill] sm:$0xff] %v4050_v5  ;;  %5467 = vst [vmem:[#allocation42_spill] sm:$0xff] %v4053_v6  ;;  %v4060_v7 = vpack.c.bf16 %v4053_v6, %v4050_v5 }
 0x16c   : > { %672 = vperm.xlu0 %3068, %v547_v11   ;;  %677 = vperm.xlu1 %3069, %v548_v12  }
 0x170   : > { %865 = vperm.xlu0 %3068, %v571_v13   ;;  %870 = vperm.xlu1 %3069, %v572_v14   ;;  %v592_v13 = vrot.slane %v4009_v57, 7  ;;  %v5367_v14 = vrot.slane %v4015_v59, 7 }
 0x174   : > { %895 = vperm.xlu0 %3068, %v577_v15   ;;  %900 = vperm.xlu1 %3069, %v578_v16   ;;  %v591_v15 = vrot.slane %v519_v56, 7  ;;  %v831_v16 = vsel %vm808_vm1, %v5366_v8, %v785_v9  ;;  %v595_v56 = vrot.slane %v4031_v1, 7 }
 0x178   : > { %712 = vperm.xlu0 %3068, %v555_v17   ;;  %717 = vperm.xlu1 %3069, %v556_v18   ;;  %v830_v17 = vsel %vm808_vm1, %v785_v9, %v786_v10  ;;  %v787_v18 = vrot.slane %v4009_v57, 1 }
 0x17c   : > { %905 = vperm.xlu0 %3068, %v579_v19   ;;  %910 = vperm.xlu1 %3069, %v580_v20   ;;  %v788_v19 = vrot.slane %v4021_v62, 1  ;;  %v3070_v20 = vld [vmem:[#allocation6] sm:$0xff]  }
 0x17d   : > { %2772 = vmatprep.subr.bf16.mxu0 %v3070_v20  ;;  %2842 = vmatprep.subr.bf16.mxu1 %v3070_v20 }
 0x17e   : > { %2773 = vmatpush3.bf16.msra.mxu0 %v3070_v20  ;;  %2845 = vmatpush3.bf16.msra.mxu1 %v3070_v20 }
 0x180   : > { %682 = vperm.xlu0 %3068, %v549_v21   ;;  %687 = vperm.xlu1 %3069, %v550_v22  }
 0x184   : > { %722 = vperm.xlu0 %3068, %v557_v23   ;;  %727 = vperm.xlu1 %3069, %v558_v24   ;;  %v636_v23 = vsel %vm615_vm0, %v591_v15, %v592_v13 }
 0x188   : > { %875 = vperm.xlu0 %3068, %v573_v25   ;;  %880 = vperm.xlu1 %3069, %v574_v26   ;;  %v637_v25 = vsel %vm615_vm0, %v5367_v14, %v591_v15 }
 0x18c   : > { %915 = vperm.xlu0 %3068, %v581_v27   ;;  %920 = vperm.xlu1 %3069, %v582_v28   ;;  %v829_v27 = vsel %vm808_vm1, %v786_v10, %v787_v18  ;;  %v828_v28 = vsel %vm808_vm1, %v787_v18, %v788_v19  ;;  %v4144_v10 = vld [vmem:[%s3988_s15 + $0x40] sm:$0xff]  ;;  %v791_v18 = vrot.slane %v4034_v2, 1 }
 0x18d   : > { %5469 = vst [vmem:[#allocation43_spill] sm:$0xff] %v4144_v10 }
 0x190   : > { %692 = vperm.xlu0 %3068, %v551_v29   ;;  %697 = vperm.xlu1 %3069, %v552_v30   ;;  %v593_v29 = vrot.slane %v4021_v62, 7  ;;  %v594_v30 = vrot.slane %v4024_v63, 7 }
 0x194   : > { %732 = vperm.xlu0 %3068, %v559_v31   ;;  %737 = vperm.xlu1 %3069, %v560_v32  }
 0x198   : > { %885 = vperm.xlu0 %3068, %v575_v33   ;;  %890 = vperm.xlu1 %3069, %v576_v34   ;;  %v3071_v33 = vld [vmem:[#allocation6 + $0x8] sm:$0xff]  }
 0x199   : > { %2774 = vmatprep.subr.bf16.mxu0 %v3071_v33  ;;  %2843 = vmatprep.subr.bf16.mxu1 %v3071_v33 }
 0x19a   : > { %2775 = vmatpush3.bf16.msra.mxu0 %v3071_v33  ;;  %2846 = vmatpush3.bf16.msra.mxu1 %v3071_v33  ;;  %v798_v33 = vrot.slane %v4050_v5, 1 }
 0x19c   : > { %925 = vperm.xlu0 %3068, %v583_v36   ;;  %930 = vperm.xlu1 %3069, %v584_v37  }
 0x1a0   : > { %702 = vperm.xlu0 %3068, %v553_v41   ;;  %707 = vperm.xlu1 %3069, %v554_v42   ;;  %v635_v42 = vsel %vm615_vm0, %v592_v13, %v593_v29 }
 0x1a4   : > { %742 = vperm.xlu0 %3068, %v561_v46   ;;  %747 = vperm.xlu1 %3069, %v562_v47   ;;  %v634_v46 = vsel %vm615_vm0, %v593_v29, %v594_v30  ;;  %v789_v47 = vrot.slane %v4024_v63, 1  ;;  %v4541_v63 = vld [vmem:[%s3988_s15 + $0xb8] sm:$0xff] }
 0x1a6   : > { %v827_v57 = vsel %vm808_vm1, %v788_v19, %v789_v47  ;;  %v633_v19 = vsel %vm615_vm0, %v594_v30, %v595_v56 }
 0x1a8   : > { %935 = vperm.xlu0 %3068, %v585_v48   ;;  %940 = vperm.xlu1 %3069, %v586_v49   ;;  %v790_v48 = vrot.slane %v4031_v1, 1 }
 0x1aa   : > { %v825_v29 = vsel %vm808_vm1, %v790_v48, %v791_v18 }
 0x1ac   : > { %752 = vperm.xlu0 %3068, %v563_v50   ;;  %757 = vperm.xlu1 %3069, %v564_v51   ;;  %v3072_v51 = vld [vmem:[#allocation6 + $0x10] ss:$0 sps:$4 sm:$0x33]  }
 0x1ad   : > { %2848 = vmatprep.subr.msk.bf16.mxu0 %vm1434_vm2, %v3072_v51  ;;  %2849 = vmatprep.subr.msk.bf16.mxu1 %vm1434_vm2, %v3072_v51 }
 0x1b0   : > { %945 = vperm.xlu0 %3068, %v587_v52   ;;  %950 = vperm.xlu1 %3069, %v588_v53  }
 0x1b4   : > { %647 = vperm.xlu1 %3069, %v542_v54   ;;  %642 = vperm.xlu0 %3068, %v541_v55  }
 0x1b8   : > { %1025 = vrot.lane.b32.xlu1 %v978_v60, %s3519_s1  ;;  %1023 = vrot.lane.b32.xlu0 %v977_v61, %s3519_s1  ;;  %v596_v61 = vrot.slane %v4034_v2, 7 }
 0x1ba   : > { %v632_v20 = vsel %vm615_vm0, %v595_v56, %v596_v61 }
 0x1bc   : > { %1106 = vrot.lane.b32.xlu1 %v979_v0, %s3520_s26  ;;  %1104 = vrot.lane.b32.xlu0 %v978_v60, %s3520_s26  ;;  %v826_v60 = vsel %vm808_vm1, %v789_v47, %v790_v48 }
 0x1c0   : > { %1169 = vrot.lane.b32.xlu1 %v4040_v3, %s3521_s2  ;;  %1167 = vrot.lane.b32.xlu0 %v979_v0, %s3521_s2 }
 0x1c4   : > { %1027 = vrot.lane.b32.xlu1 %v979_v0, %s3519_s1  ;;  %1035 = vrot.lane.b32.xlu0 %v4047_v4, %s3519_s1  ;;  %v1436_v0 = vsel %vm1434_vm2, %v3072_v51, 0  ;;  %v4201_v51 = vld [vmem:[%s3988_s15 + $0x80] sm:$0xff] }
 0x1c5   : > { %2777 = vmatpush3.bf16.msra.mxu0 %v1436_v0  ;;  %2847 = vmatpush3.bf16.msra.mxu1 %v1436_v0  ;;  %5474 = vst [vmem:[#allocation48_spill] sm:$0xff] %v4201_v51  ;;  %v5372_v0 = vrot.slane %v4201_v51, 1 }
 0x1c8   : > { %1037 = vrot.lane.b32.xlu1 %v4060_v7, %s3519_s1  ;;  %1029 = vrot.lane.b32.xlu0 %v4040_v3, %s3519_s1 }
 0x1d7   : > { %v4069_v11 = vpop.permute.xlu0 %835  ;;  %v4071_v12 = vpop.permute.xlu1 %652 }
 0x1d8   : > { %v953_v24 = vmul.f32 %v4069_v11, %v831_v16  ;;  %v762_v36 = vmul.f32 %v4071_v12, %v637_v25 }
 0x1db   : > { %v4083_v21 = vpop.permute.xlu0 %840  ;;  %v4085_v22 = vpop.permute.xlu1 %657 }
 0x1dc   : > { %v954_v26 = vmul.f32 %v4083_v21, %v830_v17  ;;  %v763_v32 = vmul.f32 %v4085_v22, %v636_v23  ;;  %v792_v23 = vrot.slane %v4144_v10, 1 }
 0x1de   : > { %v1001_v31 = vpack.c.bf16 %v954_v26, %v953_v24  ;;  %v4121_v49 = vpack.c.bf16 %v763_v32, %v762_v36  ;;  %v824_v30 = vsel %vm808_vm1, %v791_v18, %v792_v23  ;;  %v797_v32 = vrot.slane %v3994_v40, 1 }
 0x1df   : > { %v4107_v34 = vpop.permute.xlu0 %845  ;;  %v4109_v35 = vpop.permute.xlu1 %850 }
 0x1e0   : > { %v955_v37 = vmul.f32 %v4107_v34, %v829_v27  ;;  %v956_v41 = vmul.f32 %v4109_v35, %v828_v28  ;;  %1053 = vrot.lane.b32.xlu0 %v1001_v31, %s3522_s30  ;;  %v5368_v31 = vrot.slane %v3991_v39, 1  ;;  %v818_v48 = vsel %vm808_vm1, %v797_v32, %v798_v33 }
 0x1e2   : > { %v1002_v50 = vpack.c.bf16 %v956_v41, %v955_v37  ;;  %v819_v47 = vsel %vm808_vm1, %v5368_v31, %v797_v32  ;;  %v4238_v32 = vld [vmem:[%s3988_s15 + $0x88] sm:$0xff] }
 0x1e3   : > { %v4123_v52 = vpop.permute.xlu0 %662  ;;  %v4125_v53 = vpop.permute.xlu1 %667  ;;  %5480 = vst [vmem:[#allocation54_spill] sm:$0xff] %v4238_v32 }
 0x1e4   : > { %v764_v54 = vmul.f32 %v4123_v52, %v635_v42  ;;  %v765_v55 = vmul.f32 %v4125_v53, %v634_v46  ;;  %1055 = vrot.lane.b32.xlu1 %v1002_v50, %s3522_s30  ;;  %1083 = vrot.lane.b32.xlu0 %v4121_v49, %s3523_s28 }
 0x1e6   : > { %v4141_v9 = vpack.c.bf16 %v765_v55, %v764_v54 }
 0x1e7   : > { %v4146_v13 = vpop.permute.xlu0 %855  ;;  %v4148_v15 = vpop.permute.xlu1 %860 }
 0x1e8   : > { %v957_v16 = vmul.f32 %v4146_v13, %v827_v57  ;;  %v958_v17 = vmul.f32 %v4148_v15, %v826_v60  ;;  %1085 = vrot.lane.b32.xlu1 %v4141_v9, %s3523_s28  ;;  %1125 = vrot.lane.b32.xlu0 %v1002_v50, %s3524_s0  ;;  %v799_v60 = vrot.slane %v4053_v6, 1 }
 0x1ea   : > { %v1003_v24 = vpack.c.bf16 %v958_v17, %v957_v16  ;;  %v4217_v17 = vld [vmem:[%s3988_s15 + $0x48] sm:$0xff] }
 0x1eb   : > { %v4163_v25 = vpop.permute.xlu0 %672  ;;  %v4165_v26 = vpop.permute.xlu1 %677  ;;  %5477 = vst [vmem:[#allocation51_spill] sm:$0xff] %v4217_v17 }
 0x1ec   : > { %5470 = vst [vmem:[#allocation44_spill] sm:$0xff] %v4163_v25  ;;  %5471 = vst [vmem:[#allocation45_spill] sm:$0xff] %v4165_v26  ;;  %v766_v27 = vmul.f32 %v4163_v25, %v633_v19  ;;  %v767_v28 = vmul.f32 %v4165_v26, %v632_v20  ;;  %1127 = vrot.lane.b32.xlu1 %v1003_v24, %s3524_s0  ;;  %1146 = vrot.lane.b32.xlu0 %v4141_v9, %s3525_s24  ;;  %v603_v19 = vrot.slane %v4050_v5, 7 }
 0x1ee   : > { %v4181_v36 = vpack.c.bf16 %v767_v28, %v766_v27  ;;  %v604_v27 = vrot.slane %v4053_v6, 7  ;;  %v816_v28 = vsel %vm808_vm1, %v799_v60, %v5372_v0 }
 0x1ef   : > { %v4183_v37 = vpop.permute.xlu0 %865  ;;  %v4185_v41 = vpop.permute.xlu1 %870 }
 0x1f0   : > { %5472 = vst [vmem:[#allocation46_spill] sm:$0xff] %v4183_v37  ;;  %5473 = vst [vmem:[#allocation47_spill] sm:$0xff] %v4185_v41  ;;  %v959_v42 = vmul.f32 %v4183_v37, %v825_v29  ;;  %v960_v46 = vmul.f32 %v4185_v41, %v824_v30  ;;  %1148 = vrot.lane.b32.xlu1 %v4181_v36, %s3525_s24  ;;  %1188 = vrot.lane.b32.xlu0 %v1003_v24, %s3526_s25  ;;  %v597_v29 = vrot.slane %v4144_v10, 7 }
 0x1f1   : > { %v5370_v30 = vrot.slane %v4217_v17, 7 }
 0x1f2   : > { %v4198_v50 = vpack.c.bf16 %v960_v46, %v959_v42  ;;  %v625_v42 = vsel %vm615_vm0, %v602_v43, %v603_v19  ;;  %v624_v46 = vsel %vm615_vm0, %v603_v19, %v604_v27  ;;  %v5371_v19 = vrot.slane %v4238_v32, 7 }
 0x1f3   : > { %v4203_v54 = vpop.permute.xlu0 %895  ;;  %v4205_v55 = vpop.permute.xlu1 %900  ;;  %v630_v43 = vsel %vm615_vm0, %v597_v29, %v5370_v30 }
 0x1f4   : > { %5475 = vst [vmem:[#allocation49_spill] sm:$0xff] %v4203_v54  ;;  %5476 = vst [vmem:[#allocation50_spill] sm:$0xff] %v4205_v55  ;;  %v965_v56 = vmul.f32 %v4203_v54, %v819_v47  ;;  %v966_v57 = vmul.f32 %v4205_v55, %v818_v48  ;;  %1190 = vrot.lane.b32.xlu1 %v4198_v50, %s3526_s25  ;;  %1057 = vrot.lane.b32.xlu0 %v1003_v24, %s3522_s30 }
 0x1f5   : > { %v817_v24 = vsel %vm808_vm1, %v798_v33, %v799_v60  ;;  %v605_v60 = vrot.slane %v4201_v51, 7 }
 0x1f6   : > { %v4214_v16 = vpack.c.bf16 %v966_v57, %v965_v56  ;;  %v631_v57 = vsel %vm615_vm0, %v596_v61, %v597_v29 }
 0x1f7   : > { %v4219_v18 = vpop.permute.xlu0 %712  ;;  %v4222_v20 = vpop.permute.xlu1 %717  ;;  %v623_v29 = vsel %vm615_vm0, %v604_v27, %v605_v60  ;;  %v4297_v27 = vld [vmem:[%s3988_s15 + $0x50] sm:$0xff] }
 0x1f8   : > { %5478 = vst [vmem:[#allocation52_spill] sm:$0xff] %v4219_v18  ;;  %5479 = vst [vmem:[#allocation53_spill] sm:$0xff] %v4222_v20  ;;  %1065 = vrot.lane.b32.xlu1 %v4214_v16, %s3522_s30  ;;  %1059 = vrot.lane.b32.xlu0 %v4198_v50, %s3522_s30  ;;  %v599_v5 = vrot.slane %v4297_v27, 7 }
 0x1f9   : > { %5487 = vst [vmem:[#allocation61_spill] sm:$0xff] %v4297_v27 }
 0x1fb   : > { %v4246_v33 = vpop.permute.xlu0 %905  ;;  %v4248_v47 = vpop.permute.xlu1 %910 }
 0x1fc   : > { %5481 = vst [vmem:[#allocation55_spill] sm:$0xff] %v4246_v33  ;;  %5482 = vst [vmem:[#allocation56_spill] sm:$0xff] %v4248_v47  ;;  %v967_v48 = vmul.f32 %v4246_v33, %v817_v24  ;;  %v968_v56 = vmul.f32 %v4248_v47, %v816_v28  ;;  %1087 = vrot.lane.b32.xlu0 %v4181_v36, %s3523_s28  ;;  %v774_v24 = vmul.f32 %v4219_v18, %v625_v42 }
 0x1fd   : > { %v775_v28 = vmul.f32 %v4222_v20, %v624_v46  ;;  %v622_v42 = vsel %vm615_vm0, %v605_v60, %v5371_v19  ;;  %v5494_v47 = vrot.slane %v4201_v51, 1 }
 0x1fe   : > { %v4266_v8 = vpack.c.bf16 %v968_v56, %v967_v48 }
 0x1ff   : > { %v4268_v14 = vpop.permute.xlu0 %682  ;;  %v4270_v31 = vpop.permute.xlu1 %687  ;;  %v4282_v46 = vpack.c.bf16 %v775_v28, %v774_v24  ;;  %v793_v24 = vrot.slane %v4217_v17, 1 }
 0x200   : > { %5483 = vst [vmem:[#allocation57_spill] sm:$0xff] %v4268_v14  ;;  %5484 = vst [vmem:[#allocation58_spill] sm:$0xff] %v4270_v31  ;;  %v768_v61 = vmul.f32 %v4268_v14, %v631_v57  ;;  %v769_v44 = vmul.f32 %v4270_v31, %v630_v43  ;;  %1067 = vrot.lane.b32.xlu1 %v4266_v8, %s3522_s30  ;;  %v4538_v31 = vld [vmem:[%s3988_s15 + $0xb0] sm:$0xff] }
 0x201   : > { %v5516_v41 = vrot.slane %v4538_v31, 1  ;;  %v611_v26 = vrot.slane %v4538_v31, 7 }
 0x202   : > { %v4284_v48 = vpack.c.bf16 %v769_v44, %v768_v61  ;;  %v5374_v61 = vrot.slane %v4297_v27, 1 }
 0x203   : > { %v4286_v56 = vpop.permute.xlu0 %722  ;;  %v4288_v57 = vpop.permute.xlu1 %727 }
 0x204   : > { %5485 = vst [vmem:[#allocation59_spill] sm:$0xff] %v4286_v56  ;;  %5486 = vst [vmem:[#allocation60_spill] sm:$0xff] %v4288_v57  ;;  %v776_v43 = vmul.f32 %v4286_v56, %v623_v29  ;;  %v777_v30 = vmul.f32 %v4288_v57, %v622_v42  ;;  %1095 = vrot.lane.b32.xlu1 %v4282_v46, %s3523_s28  ;;  %1089 = vrot.lane.b32.xlu0 %v4284_v48, %s3523_s28  ;;  %v4312_v29 = vld [vmem:[%s3988_s15 + $0x90] sm:$0xff] }
 0x205   : > { %5490 = vst [vmem:[#allocation64_spill] sm:$0xff] %v4312_v29  ;;  %v823_v42 = vsel %vm808_vm1, %v792_v23, %v793_v24  ;;  %v4337_v23 = vld [vmem:[%s3988_s15 + $0x58] sm:$0xff]  ;;  %v5495_v33 = vrot.slane %v4312_v29, 1 }
 0x206   : > { %v4299_v60 = vpack.c.bf16 %v777_v30, %v776_v43  ;;  %v4316_v30 = vpack.c.bf16 %v4217_v17, %v4144_v10  ;;  %v822_v43 = vsel %vm808_vm1, %v793_v24, %v5374_v61  ;;  %5493 = vst [vmem:[#allocation67_spill] sm:$0xff] %v4337_v23  ;;  %v4341_v24 = vpack.c.bf16 %v4238_v32, %v4201_v51 }
 0x207   : > { %v4301_v44 = vpop.permute.xlu0 %875  ;;  %v4304_v28 = vpop.permute.xlu1 %880  ;;  %v5499_v51 = vrot.slane %v4217_v17, 7 }
 0x208   : > { %5488 = vst [vmem:[#allocation62_spill] sm:$0xff] %v4301_v44  ;;  %5489 = vst [vmem:[#allocation63_spill] sm:$0xff] %v4304_v28  ;;  %1097 = vrot.lane.b32.xlu1 %v4299_v60, %s3523_s28  ;;  %1108 = vrot.lane.b32.xlu0 %v4040_v3, %s3520_s26  ;;  %v801_v3 = vrot.slane %v4238_v32, 1  ;;  %v961_v61 = vmul.f32 %v4301_v44, %v823_v42  ;;  %v962_v56 = vmul.f32 %v4304_v28, %v822_v43 }
 0x209   : > { %v600_v42 = vrot.slane %v4337_v23, 7  ;;  %v629_v18 = vsel %vm615_vm0, %v5499_v51, %v599_v5 }
 0x20a   : > { %v815_v57 = vsel %vm808_vm1, %v5494_v47, %v801_v3  ;;  %v814_v20 = vsel %vm808_vm1, %v801_v3, %v5495_v33  ;;  %v4364_v47 = vld [vmem:[%s3988_s15 + $0x98] sm:$0xff]  ;;  %v4366_v43 = vpack.c.bf16 %v962_v56, %v961_v61 }
 0x20b   : > { %v4326_v19 = vpop.permute.xlu0 %915  ;;  %v4329_v0 = vpop.permute.xlu1 %920  ;;  %5498 = vst [vmem:[#allocation70_spill] sm:$0xff] %v4364_v47  ;;  %v628_v55 = vsel %vm615_vm0, %v599_v5, %v600_v42  ;;  %v5390_v56 = vrot.slane %v4364_v47, 7 }
 0x20c   : > { %5491 = vst [vmem:[#allocation65_spill] sm:$0xff] %v4326_v19  ;;  %5492 = vst [vmem:[#allocation66_spill] sm:$0xff] %v4329_v0  ;;  %1116 = vrot.lane.b32.xlu1 %v4060_v7, %s3520_s26  ;;  %1110 = vrot.lane.b32.xlu0 %v4316_v30, %s3520_s26  ;;  %v969_v33 = vmul.f32 %v4326_v19, %v815_v57  ;;  %v970_v3 = vmul.f32 %v4329_v0, %v814_v20  ;;  %v5502_v57 = vrot.slane %v4238_v32, 7 }
 0x20d   : > { %v5510_v32 = vrot.slane %v4297_v27, 1 }
 0x20e   : > { %v4386_v20 = vpack.c.bf16 %v970_v3, %v969_v33 }
 0x20f   : > { %v4353_v6 = vpop.permute.xlu0 %692  ;;  %v4356_v40 = vpop.permute.xlu1 %697 }
 0x210   : > { %5496 = vst [vmem:[#allocation68_spill] sm:$0xff] %v4353_v6  ;;  %5497 = vst [vmem:[#allocation69_spill] sm:$0xff] %v4356_v40  ;;  %1118 = vrot.lane.b32.xlu1 %v4341_v24, %s3520_s26  ;;  %1129 = vrot.lane.b32.xlu0 %v4198_v50, %s3524_s0  ;;  %v607_v50 = vrot.slane %v4312_v29, 7  ;;  %v770_v51 = vmul.f32 %v4353_v6, %v629_v18  ;;  %v771_v5 = vmul.f32 %v4356_v40, %v628_v55 }
 0x212   : > { %v621_v61 = vsel %vm615_vm0, %v5502_v57, %v607_v50  ;;  %v620_v0 = vsel %vm615_vm0, %v607_v50, %v5390_v56  ;;  %v4406_v55 = vpack.c.bf16 %v771_v5, %v770_v51  ;;  %v5507_v50 = vrot.slane %v3991_v39, 7 }
 0x213   : > { %v4376_v54 = vpop.permute.xlu0 %732  ;;  %v4379_v10 = vpop.permute.xlu1 %737 }
 0x214   : > { %5500 = vst [vmem:[#allocation71_spill] sm:$0xff] %v4376_v54  ;;  %5501 = vst [vmem:[#allocation72_spill] sm:$0xff] %v4379_v10  ;;  %1137 = vrot.lane.b32.xlu1 %v4266_v8, %s3524_s0  ;;  %1131 = vrot.lane.b32.xlu0 %v4366_v43, %s3524_s0  ;;  %v778_v18 = vmul.f32 %v4376_v54, %v621_v61  ;;  %v779_v33 = vmul.f32 %v4379_v10, %v620_v0 }
 0x215   : > { %v627_v51 = vsel %vm615_vm0, %v600_v42, %v5507_v50  ;;  %v4437_v42 = vpack.c.bf16 %v4337_v23, %v4297_v27  ;;  %v5512_v27 = vrot.slane %v4312_v29, 1 }
 0x216   : > { %v4422_v5 = vpack.c.bf16 %v779_v33, %v778_v18  ;;  %v795_v33 = vrot.slane %v4337_v23, 1 }
 0x217   : > { %v4398_v19 = vpop.permute.xlu0 %885  ;;  %v4400_v17 = vpop.permute.xlu1 %890 }
 0x218   : > { %5503 = vst [vmem:[#allocation73_spill] sm:$0xff] %v4398_v19  ;;  %5504 = vst [vmem:[#allocation74_spill] sm:$0xff] %v4400_v17  ;;  %1139 = vrot.lane.b32.xlu1 %v4386_v20, %s3524_s0  ;;  %1150 = vrot.lane.b32.xlu0 %v4284_v48, %s3525_s24 }
 0x21b   : > { %v4410_v3 = vpop.permute.xlu0 %925  ;;  %v4412_v57 = vpop.permute.xlu1 %930 }
 0x21c   : > { %5505 = vst [vmem:[#allocation75_spill] sm:$0xff] %v4410_v3  ;;  %5506 = vst [vmem:[#allocation76_spill] sm:$0xff] %v4412_v57  ;;  %1158 = vrot.lane.b32.xlu1 %v4299_v60, %s3525_s24  ;;  %1152 = vrot.lane.b32.xlu0 %v4406_v55, %s3525_s24 }
 0x21f   : > { %v4424_v61 = vpop.permute.xlu0 %702  ;;  %v4426_v0 = vpop.permute.xlu1 %707 }
 0x220   : > { %5508 = vst [vmem:[#allocation77_spill] sm:$0xff] %v4424_v61  ;;  %5509 = vst [vmem:[#allocation78_spill] sm:$0xff] %v4426_v0  ;;  %v772_v56 = vmul.f32 %v4424_v61, %v627_v51  ;;  %v773_v10 = vmul.f32 %v4426_v0, %v4005_v45  ;;  %1160 = vrot.lane.b32.xlu1 %v4422_v5, %s3525_s24  ;;  %1171 = vrot.lane.b32.xlu0 %v4316_v30, %s3521_s2  ;;  %v4443_v51 = vld [vmem:[%s3988_s15 + $0xa0] sm:$0xff]  ;;  %v803_v61 = vrot.slane %v4364_v47, 1 }
 0x221   : > { %v986_v45 = vpack.c.bf16 %v4364_v47, %v4312_v29  ;;  %v5405_v40 = vrot.slane %v4443_v51, 1  ;;  %v5515_v14 = vrot.slane %v4443_v51, 1 }
 0x222   : > { %v4439_v18 = vpack.c.bf16 %v773_v10, %v772_v56  ;;  %v821_v10 = vsel %vm808_vm1, %v5510_v32, %v795_v33  ;;  %v5511_v56 = vrot.slane %v3991_v39, 1 }
 0x223   : > { %v743_v50 = vpop.permute.xlu0 %742  ;;  %v748_v54 = vpop.permute.xlu1 %747  ;;  %v963_v32 = vmul.f32 %v4398_v19, %v821_v10 }
 0x224   : > { %1179 = vrot.lane.b32.xlu1 %v4341_v24, %s3521_s2  ;;  %1173 = vrot.lane.b32.xlu0 %v4437_v42, %s3521_s2  ;;  %v820_v0 = vsel %vm808_vm1, %v795_v33, %v5511_v56  ;;  %v813_v33 = vsel %vm808_vm1, %v5512_v27, %v803_v61  ;;  %v812_v56 = vsel %vm808_vm1, %v803_v61, %v5405_v40 }
 0x225   : > { %v964_v39 = vmul.f32 %v4400_v17, %v820_v0  ;;  %v971_v10 = vmul.f32 %v4410_v3, %v813_v33  ;;  %v972_v27 = vmul.f32 %v4412_v57, %v812_v56 }
 0x227   : > { %v4461_v23 = vpop.permute.xlu0 %935  ;;  %v4463_v6 = vpop.permute.xlu1 %940  ;;  %v1006_v0 = vpack.c.bf16 %v964_v39, %v963_v32  ;;  %v1010_v61 = vpack.c.bf16 %v972_v27, %v971_v10  ;;  %v609_v32 = vrot.slane %v4443_v51, 7  ;;  %v5513_v10 = vrot.slane %v4364_v47, 7 }
 0x228   : > { %1181 = vrot.lane.b32.xlu1 %v986_v45, %s3521_s2  ;;  %1192 = vrot.lane.b32.xlu0 %v4366_v43, %s3526_s25 }
 0x229   : > { %v619_v27 = vsel %vm615_vm0, %v5513_v10, %v609_v32 }
 0x22b   : > { %v4478_v28 = vpop.permute.xlu0 %752  ;;  %v4480_v44 = vpop.permute.xlu1 %757 }
 0x22c   : > { %1200 = vrot.lane.b32.xlu1 %v4386_v20, %s3526_s25  ;;  %1031 = vrot.lane.b32.xlu0 %v4316_v30, %s3519_s1  ;;  %v538_v30 = vld [vmem:[%s3988_s15 + $0xa8] sm:$0xff] }
 0x22d   : > { %v610_v33 = vrot.slane %v538_v30, 7 }
 0x22f   : > { %v4488_v29 = vpop.permute.xlu0 %945  ;;  %v4490_v17 = vpop.permute.xlu1 %950 }
 0x230   : > { %1039 = vrot.lane.b32.xlu1 %v4341_v24, %s3519_s1  ;;  %1194 = vrot.lane.b32.xlu0 %v1006_v0, %s3526_s25 }
 0x233   : > { %v4495_v40 = vpop.permute.xlu0 %642  ;;  %v4497_v19 = vpop.permute.xlu1 %647 }
 0x234   : > { %1202 = vrot.lane.b32.xlu1 %v1010_v61, %s3526_s25  ;;  %1033 = vrot.lane.b32.xlu0 %v4437_v42, %s3519_s1 }
 0x237   : > { %v1024_v39 = vpop.permute.xlu0 %1023  ;;  %v4506_v24 = vpop.permute.xlu1 %1025 }
 0x238   : > { %1041 = vrot.lane.b32.xlu1 %v986_v45, %s3519_s1  ;;  %1061 = vrot.lane.b32.xlu0 %v4366_v43, %s3522_s30  ;;  %v618_v43 = vsel %vm615_vm0, %v609_v32, %v610_v33 }
 0x239   : > { %v781_v2 = vmul.f32 %v748_v54, %v618_v43  ;;  %v589_v54 = vrot.slane %v4012_v58, 7 }
 0x23b   : > { %v4509_v56 = vpop.permute.xlu0 %1104  ;;  %v4522_v3 = vpop.permute.xlu1 %1106 }
 0x23c   : > { %1069 = vrot.lane.b32.xlu1 %v4386_v20, %s3522_s30  ;;  %1063 = vrot.lane.b32.xlu0 %v1006_v0, %s3522_s30  ;;  %v780_v20 = vmul.f32 %v743_v50, %v619_v27  ;;  %v612_v27 = vrot.slane %v4541_v63, 7 }
 0x23e   : > { %v999_v32 = vpack.c.bf16 %v781_v2, %v780_v20  ;;  %v987_v2 = vpack.c.bf16 %v538_v30, %v4443_v51  ;;  %v5514_v20 = vrot.slane %v4015_v59, 7  ;;  %v639_v62 = vsel %vm615_vm0, %v612_v27, %v589_v54 }
 0x23f   : > { %v4520_v57 = vpop.permute.xlu0 %1167  ;;  %v4535_v1 = vpop.permute.xlu1 %1169  ;;  %v760_v37 = vmul.f32 %v4495_v40, %v639_v62 }
 0x240   : > { %1071 = vrot.lane.b32.xlu1 %v1010_v61, %s3522_s30  ;;  %1091 = vrot.lane.b32.xlu0 %v4406_v55, %s3523_s28 }
 0x243   : > { %v1036_v47 = vpop.permute.xlu0 %1035  ;;  %v4549_v43 = vpop.permute.xlu1 %1027 }
 0x244   : > { %v4529_v10 = vsel %vm1208_vm3, %v4439_v18, %v1036_v47  ;;  %1099 = vrot.lane.b32.xlu1 %v4422_v5, %s3523_s28  ;;  %1093 = vrot.lane.b32.xlu0 %v4439_v18, %s3523_s28  ;;  %v805_v47 = vrot.slane %v538_v30, 1 }
 0x246   : > { %v810_v30 = vsel %vm808_vm1, %v805_v47, %v5516_v41 }
 0x247   : > { %v4561_v50 = vpop.permute.xlu0 %1029  ;;  %v974_v51 = vmul.f32 %v4463_v6, %v810_v30  ;;  %v616_v6 = vsel %vm615_vm0, %v611_v26, %v612_v27 }
 0x248   : > { %1101 = vrot.lane.b32.xlu1 %v999_v32, %s3523_s28  ;;  %1112 = vrot.lane.b32.xlu0 %v4437_v42, %s3520_s26  ;;  %v638_v42 = vsel %vm615_vm0, %v589_v54, %v5514_v20  ;;  %v4577_v20 = vpop.permute.xlu1 %1037 }
 0x249   : > { %v761_v59 = vmul.f32 %v4497_v19, %v638_v42  ;;  %v783_v42 = vmul.f32 %v4480_v44, %v616_v6  ;;  %v5517_v6 = vrot.slane %v4538_v31, 1 }
 0x24b   : > { %v989_v25 = vpack.c.bf16 %v761_v59, %v760_v37 }
 0x24c   : > { %1120 = vrot.lane.b32.xlu1 %v986_v45, %s3520_s26  ;;  %1114 = vrot.lane.b32.xlu0 %v4047_v4, %s3520_s26  ;;  %v811_v45 = vsel %vm808_vm1, %v5515_v14, %v805_v47 }
 0x24d   : > { %v973_v54 = vmul.f32 %v4461_v23, %v811_v45  ;;  %v617_v23 = vsel %vm615_vm0, %v610_v33, %v611_v26 }
 0x24f   : > { %v1011_v62 = vpack.c.bf16 %v974_v51, %v973_v54 }
 0x250   : > { %1122 = vrot.lane.b32.xlu1 %v987_v2, %s3520_s26  ;;  %1133 = vrot.lane.b32.xlu0 %v1006_v0, %s3524_s0  ;;  %v1211_v0 = vsel %vm1208_vm3, %v989_v25, %v1024_v39  ;;  %v1214_v25 = vsel %vm1208_vm3, %v4121_v49, %v4506_v24 }
 0x252   : > { %v1054_v14 = vpop.permute.xlu0 %1053 }
 0x253   : > { %v1241_v37 = vsel %vm1239_vm4, %v1211_v0, %v1054_v14  ;;  %v807_v14 = vrot.slane %v4541_v63, 1 }
 0x254   : > { %1141 = vrot.lane.b32.xlu1 %v1010_v61, %s3524_s0  ;;  %1135 = vrot.lane.b32.xlu0 %v4214_v16, %s3524_s0  ;;  %v782_v61 = vmul.f32 %v4478_v28, %v617_v23 }
 0x255   : > { %v809_v0 = vsel %vm808_vm1, %v5517_v6, %v807_v14 }
 0x256   : > { %v1056_v41 = vpop.permute.xlu1 %1055  ;;  %v1084_v47 = vpop.permute.xlu0 %1083  ;;  %v1000_v28 = vpack.c.bf16 %v783_v42, %v782_v61 }
 0x257   : > { %v1262_v45 = vsel %vm1260_vm5, %v1241_v37, %v1084_v47  ;;  %v1243_v26 = vsel %vm1239_vm4, %v1214_v25, %v1056_v41 }
 0x258   : > { %1143 = vrot.lane.b32.xlu1 %v1011_v62, %s3524_s0  ;;  %1154 = vrot.lane.b32.xlu0 %v4439_v18, %s3525_s24  ;;  %v1283_v44 = vsel %vm1281_vm6, %v1262_v45, %v4509_v56 }
 0x25a   : > { %v1086_v33 = vpop.permute.xlu1 %1085  ;;  %v1126_v30 = vpop.permute.xlu0 %1125 }
 0x25b   : > { %v1264_v18 = vsel %vm1260_vm5, %v1243_v26, %v1086_v33  ;;  %v1304_v39 = vsel %vm1302_vm7, %v1283_v44, %v1126_v30 }
 0x25c   : > { %1162 = vrot.lane.b32.xlu1 %v999_v32, %s3525_s24  ;;  %1156 = vrot.lane.b32.xlu0 %v4282_v46, %s3525_s24  ;;  %v1285_v24 = vsel %vm1281_vm6, %v1264_v18, %v4522_v3 }
 0x25e   : > { %v1128_v27 = vpop.permute.xlu1 %1127  ;;  %v1147_v59 = vpop.permute.xlu0 %1146 }
 0x25f   : > { %v1325_v49 = vsel %vm1323_vm8, %v1304_v39, %v1147_v59  ;;  %v1306_v56 = vsel %vm1302_vm7, %v1285_v24, %v1128_v27  ;;  %v1217_v24 = vsel %vm1208_vm3, %v4141_v9, %v4549_v43 }
 0x260   : > { %1164 = vrot.lane.b32.xlu1 %v1000_v28, %s3525_s24  ;;  %1175 = vrot.lane.b32.xlu0 %v4047_v4, %s3521_s2  ;;  %v1346_v51 = vsel %vm1344_vm9, %v1325_v49, %v4520_v57  ;;  %v988_v4 = vpack.c.bf16 %v4541_v63, %v4538_v31  ;;  %v975_v63 = vmul.f32 %v4488_v29, %v809_v0 }
 0x261   : > { %v1220_v0 = vsel %vm1208_vm3, %v4181_v36, %v4561_v50  ;;  %v1232_v36 = vsel %vm1208_vm3, %v4282_v46, %v4577_v20 }
 0x262   : > { %v1149_v32 = vpop.permute.xlu1 %1148  ;;  %v1189_v54 = vpop.permute.xlu0 %1188 }
 0x263   : > { %v1327_v41 = vsel %vm1323_vm8, %v1306_v56, %v1149_v32  ;;  %v1367_v47 = vsel %vm1365_vm10, %v1346_v51, %v1189_v54 }
 0x264   : > { %1183 = vrot.lane.b32.xlu1 %v987_v2, %s3521_s2  ;;  %1177 = vrot.lane.b32.xlu0 %v4060_v7, %s3521_s2  ;;  %v1348_v57 = vsel %vm1344_vm9, %v1327_v41, %v4535_v1  ;;  %v5518_v2 = vrot.slane %v4012_v58, 1 }
 0x265   : > { %2778 = vmatprep.mubr.msk.bf16.mxu0 %vm1413_vm11, %v1367_v47 }
 0x266   : > { %v1191_v3 = vpop.permute.xlu1 %1190  ;;  %v1058_v23 = vpop.permute.xlu0 %1057  ;;  %v832_v7 = vsel %vm808_vm1, %v807_v14, %v5518_v2 }
 0x267   : > { %v1369_v37 = vsel %vm1365_vm10, %v1348_v57, %v1191_v3  ;;  %v976_v1 = vmul.f32 %v4490_v17, %v832_v7  ;;  %v1245_v56 = vsel %vm1239_vm4, %v1217_v24, %v1058_v23 }
 0x268   : > { %1185 = vrot.lane.b32.xlu1 %v988_v4, %s3521_s2  ;;  %1196 = vrot.lane.b32.xlu0 %v4214_v16, %s3526_s25 }
 0x269   : > { %2779 = vmatmul.mubr.msk.bf16.vlgmr.msra.gmra.mrb[0].mxu0 %vm1413_vm11, %v1369_v37  ;;  %v1012_v58 = vpack.c.bf16 %v976_v1, %v975_v63 }
 0x26a   : > { %v1060_v31 = vpop.permute.xlu0 %1059  ;;  %v1066_v61 = vpop.permute.xlu1 %1065 }
 0x26b   : > { %v1253_v47 = vsel %vm1239_vm4, %v4529_v10, %v1066_v61  ;;  %v1247_v10 = vsel %vm1239_vm4, %v1220_v0, %v1060_v31 }
 0x26c   : > { %1204 = vrot.lane.b32.xlu1 %v1011_v62, %s3526_s25  ;;  %1198 = vrot.lane.b32.xlu0 %v4266_v8, %s3526_s25 }
 0x26e   : > { %v1088_v42 = vpop.permute.xlu0 %1087 }
 0x26f   : > { %v1266_v32 = vsel %vm1260_vm5, %v1245_v56, %v1088_v42 }
 0x270   : > { %1206 = vrot.lane.b32.xlu1 %v1012_v58, %s3526_s25 }
 0x272   : > { %v1068_v45 = vpop.permute.xlu1 %1067 }
 0x273   : > { %v1255_v31 = vsel %vm1239_vm4, %v1232_v36, %v1068_v45 }
 0x276   : > { %v1096_v33 = vpop.permute.xlu1 %1095  ;;  %v1090_v16 = vpop.permute.xlu0 %1089 }
 0x277   : > { %v1274_v3 = vsel %vm1260_vm5, %v1253_v47, %v1096_v33  ;;  %v1268_v37 = vsel %vm1260_vm5, %v1247_v10, %v1090_v16 }
 0x27a   : > { %v1098_v30 = vpop.permute.xlu1 %1097  ;;  %v1109_v25 = vpop.permute.xlu0 %1108 }
 0x27b   : > { %v1287_v14 = vsel %vm1281_vm6, %v1266_v32, %v1109_v25  ;;  %v1276_v16 = vsel %vm1260_vm5, %v1255_v31, %v1098_v30 }
 0x27e   : > { %v1117_v26 = vpop.permute.xlu1 %1116  ;;  %v1111_v29 = vpop.permute.xlu0 %1110 }
 0x27f   : > { %v1295_v23 = vsel %vm1281_vm6, %v1274_v3, %v1117_v26  ;;  %v1289_v61 = vsel %vm1281_vm6, %v1268_v37, %v1111_v29 }
 0x282   : > { %v1119_v44 = vpop.permute.xlu1 %1118  ;;  %v1130_v17 = vpop.permute.xlu0 %1129 }
 0x283   : > { %v1308_v41 = vsel %vm1302_vm7, %v1287_v14, %v1130_v17  ;;  %v1297_v17 = vsel %vm1281_vm6, %v1276_v16, %v1119_v44 }
 0x286   : > { %v1138_v28 = vpop.permute.xlu1 %1137  ;;  %v1132_v18 = vpop.permute.xlu0 %1131 }
 0x287   : > { %v1316_v2 = vsel %vm1302_vm7, %v1295_v23, %v1138_v28  ;;  %v1310_v50 = vsel %vm1302_vm7, %v1289_v61, %v1132_v18 }
 0x28a   : > { %v1140_v62 = vpop.permute.xlu1 %1139  ;;  %v1151_v39 = vpop.permute.xlu0 %1150 }
 0x28b   : > { %v1329_v4 = vsel %vm1323_vm8, %v1308_v41, %v1151_v39  ;;  %v1318_v46 = vsel %vm1302_vm7, %v1297_v17, %v1140_v62 }
 0x28e   : > { %v1159_v27 = vpop.permute.xlu1 %1158  ;;  %v1153_v8 = vpop.permute.xlu0 %1152 }
 0x28f   : > { %v1337_v7 = vsel %vm1323_vm8, %v1316_v2, %v1159_v27  ;;  %v1331_v33 = vsel %vm1323_vm8, %v1310_v50, %v1153_v8 }
 0x292   : > { %v1161_v59 = vpop.permute.xlu1 %1160  ;;  %v1172_v49 = vpop.permute.xlu0 %1171 }
 0x293   : > { %v1350_v57 = vsel %vm1344_vm9, %v1329_v4, %v1172_v49  ;;  %v1339_v20 = vsel %vm1323_vm8, %v1318_v46, %v1161_v59 }
 0x296   : > { %v1180_v54 = vpop.permute.xlu1 %1179  ;;  %v1174_v51 = vpop.permute.xlu0 %1173 }
 0x297   : > { %v1358_v63 = vsel %vm1344_vm9, %v1337_v7, %v1180_v54  ;;  %v1352_v25 = vsel %vm1344_vm9, %v1331_v33, %v1174_v51 }
 0x29a   : > { %v1182_v9 = vpop.permute.xlu1 %1181  ;;  %v1193_v43 = vpop.permute.xlu0 %1192 }
 0x29b   : > { %v1371_v6 = vsel %vm1365_vm10, %v1350_v57, %v1193_v43  ;;  %v1360_v45 = vsel %vm1344_vm9, %v1339_v20, %v1182_v9 }
 0x29c   : > { %2782 = vmatprep.mubr.msk.bf16.mxu0 %vm1413_vm11, %v1371_v6 }
 0x29e   : > { %v1201_v1 = vpop.permute.xlu1 %1200  ;;  %v1032_v58 = vpop.permute.xlu0 %1031 }
 0x29f   : > { %v1379_v42 = vsel %vm1365_vm10, %v1358_v63, %v1201_v1  ;;  %v1223_v2 = vsel %vm1208_vm3, %v4284_v48, %v1032_v58 }
 0x2a0   : > { %2790 = vmatprep.mubr.msk.bf16.mxu1 %vm1413_vm11, %v1379_v42 }
 0x2a2   : > { %v1040_v26 = vpop.permute.xlu1 %1039  ;;  %v1195_v29 = vpop.permute.xlu0 %1194 }
 0x2a3   : > { %v1373_v28 = vsel %vm1365_vm10, %v1352_v25, %v1195_v29  ;;  %v1235_v61 = vsel %vm1208_vm3, %v4299_v60, %v1040_v26 }
 0x2a4   : > { %2783 = vmatmul.mubr.msk.bf16.gmra.mrb[4].mxu0 %vm1413_vm11, %v1373_v28 }
 0x2a6   : > { %v1203_v18 = vpop.permute.xlu1 %1202  ;;  %v1034_v39 = vpop.permute.xlu0 %1033 }
 0x2a7   : > { %v1381_v30 = vsel %vm1365_vm10, %v1360_v45, %v1203_v18  ;;  %v1226_v42 = vsel %vm1208_vm3, %v4406_v55, %v1034_v39 }
 0x2a8   : > { %2791 = vmatmul.mubr.msk.bf16.vlgmr.msra.gmra.mrb[0].mxu1 %vm1413_vm11, %v1381_v30 }
 0x2aa   : > { %v1042_v27 = vpop.permute.xlu1 %1041  ;;  %v1062_v8 = vpop.permute.xlu0 %1061 }
 0x2ab   : > { %v1249_v10 = vsel %vm1239_vm4, %v1223_v2, %v1062_v8  ;;  %v1238_v17 = vsel %vm1208_vm3, %v4422_v5, %v1042_v27 }
 0x2ae   : > { %v1070_v49 = vpop.permute.xlu1 %1069  ;;  %v1064_v44 = vpop.permute.xlu0 %1063 }
 0x2af   : > { %v1257_v50 = vsel %vm1239_vm4, %v1235_v61, %v1070_v49  ;;  %v1251_v48 = vsel %vm1239_vm4, %v1226_v42, %v1064_v44 }
 0x2b2   : > { %v1072_v24 = vpop.permute.xlu1 %1071  ;;  %v1092_v56 = vpop.permute.xlu0 %1091 }
 0x2b3   : > { %v1270_v7 = vsel %vm1260_vm5, %v1249_v10, %v1092_v56  ;;  %v1259_v20 = vsel %vm1239_vm4, %v1238_v17, %v1072_v24 }
 0x2b6   : > { %v1100_v32 = vpop.permute.xlu1 %1099  ;;  %v1094_v62 = vpop.permute.xlu0 %1093 }
 0x2b7   : > { %v1278_v31 = vsel %vm1260_vm5, %v1257_v50, %v1100_v32  ;;  %v1272_v33 = vsel %vm1260_vm5, %v1251_v48, %v1094_v62 }
 0x2ba   : > { %v1102_v54 = vpop.permute.xlu1 %1101  ;;  %v1113_v51 = vpop.permute.xlu0 %1112 }
 0x2bb   : > { %v1291_v1 = vsel %vm1281_vm6, %v1270_v7, %v1113_v51  ;;  %v1280_v39 = vsel %vm1260_vm5, %v1259_v20, %v1102_v54 }
 0x2be   : > { %v1121_v14 = vpop.permute.xlu1 %1120  ;;  %v1115_v59 = vpop.permute.xlu0 %1114 }
 0x2bf   : > { %v1299_v60 = vsel %vm1281_vm6, %v1278_v31, %v1121_v14  ;;  %v1293_v55 = vsel %vm1281_vm6, %v1272_v33, %v1115_v59  ;;  %v4727_v14 = vld [vmem:[#allocation8] ss:$0 sm:$0xff] }
 0x2c2   : > { %v1123_v41 = vpop.permute.xlu1 %1122  ;;  %v1134_v47 = vpop.permute.xlu0 %1133 }
 0x2c3   : > { %v1312_v36 = vsel %vm1302_vm7, %v1291_v1, %v1134_v47  ;;  %v1301_v27 = vsel %vm1281_vm6, %v1280_v39, %v1123_v41 }
 0x2c6   : > { %v1142_v4 = vpop.permute.xlu1 %1141  ;;  %v1136_v3 = vpop.permute.xlu0 %1135 }
 0x2c7   : > { %v1320_v28 = vsel %vm1302_vm7, %v1299_v60, %v1142_v4  ;;  %v1314_v46 = vsel %vm1302_vm7, %v1293_v55, %v1136_v3 }
 0x2ca   : > { %v1144_v57 = vpop.permute.xlu1 %1143  ;;  %v1155_v9 = vpop.permute.xlu0 %1154 }
 0x2cb   : > { %v1333_v58 = vsel %vm1323_vm8, %v1312_v36, %v1155_v9  ;;  %v1322_v24 = vsel %vm1302_vm7, %v1301_v27, %v1144_v57 }
 0x2ce   : > { %v1163_v43 = vpop.permute.xlu1 %1162  ;;  %v1157_v23 = vpop.permute.xlu0 %1156 }
 0x2cf   : > { %v1341_v45 = vsel %vm1323_vm8, %v1320_v28, %v1163_v43  ;;  %v1335_v18 = vsel %vm1323_vm8, %v1314_v46, %v1157_v23 }
 0x2d2   : > { %v1165_v6 = vpop.permute.xlu1 %1164  ;;  %v1176_v0 = vpop.permute.xlu0 %1175 }
 0x2d3   : > { %v1354_v16 = vsel %vm1344_vm9, %v1333_v58, %v1176_v0  ;;  %v1343_v32 = vsel %vm1323_vm8, %v1322_v24, %v1165_v6 }
 0x2d6   : > { %v1184_v37 = vpop.permute.xlu1 %1183  ;;  %v1178_v63 = vpop.permute.xlu0 %1177 }
 0x2d7   : > { %v1362_v30 = vsel %vm1344_vm9, %v1341_v45, %v1184_v37  ;;  %v1356_v8 = vsel %vm1344_vm9, %v1335_v18, %v1178_v63 }
 0x2da   : > { %v1186_v25 = vpop.permute.xlu1 %1185  ;;  %v1197_v29 = vpop.permute.xlu0 %1196 }
 0x2db   : > { %v1375_v26 = vsel %vm1365_vm10, %v1354_v16, %v1197_v29  ;;  %v1364_v62 = vsel %vm1344_vm9, %v1343_v32, %v1186_v25 }
 0x2dc   : > { %2786 = vmatprep.mubr.msk.bf16.mxu0 %vm1413_vm11, %v1375_v26 }
 0x2de   : > { %v1205_v49 = vpop.permute.xlu1 %1204  ;;  %v1199_v5 = vpop.permute.xlu0 %1198 }
 0x2df   : > { %v1383_v44 = vsel %vm1365_vm10, %v1362_v30, %v1205_v49  ;;  %v1377_v56 = vsel %vm1365_vm10, %v1356_v8, %v1199_v5 }
 0x2e0   : > { %2787 = vmatmul.mubr.msk.bf16.gmra.mrb[8].mxu0 %vm1413_vm11, %v1377_v56  ;;  %2794 = vmatprep.mubr.msk.bf16.mxu1 %vm1413_vm11, %v1383_v44 }
 0x2e2   : > { %v1207_v54 = vpop.permute.xlu1 %1206 }
 0x2e3   : > { %v1385_v51 = vsel %vm1365_vm10, %v1364_v62, %v1207_v54 }
 0x2e4   : > { %2795 = vmatmul.mubr.msk.bf16.gmra.mrb[4].mxu1 %vm1413_vm11, %v1385_v51 }
 0x33c   : > { %v2780_v59 = vpop.f32.mrb[0].mxu0 }
 0x33d   : > { %v1481_v41 = vadd.f32 %v2780_v59, %v4727_v14  ;;  %v1472_v47 = vpop.f32.mrb[1].mxu0 }
 0x33e   : > { %v1473_v4 = vadd.f32 %v4727_v14, %v1472_v47  ;;  %v2781_v3 = vpop.f32.mrb[2].mxu0 }
 0x33f   : > { %v1553_v57 = vmax.f32 %v1481_v41, 0.0  ;;  %v1484_v9 = vadd.f32 %v2781_v3, %v4727_v14  ;;  %v1475_v43 = vpop.f32.mrb[3].mxu0 }
 0x340   : > { %v1551_v23 = vmax.f32 %v1473_v4, 0.0  ;;  %v1476_v6 = vadd.f32 %v4727_v14, %v1475_v43 }
 0x341   : > { %1573 = vst.msk [vmem:[#allocation2 + $0x10] sm:$0xff] %vm1239_vm4, %v1553_v57  ;;  %v1554_v0 = vmax.f32 %v1484_v9, 0.0 }
 0x342   : > { %1571 = vst.msk [vmem:[#allocation2] sm:$0xff] %vm1239_vm4, %v1551_v23  ;;  %v1552_v2 = vmax.f32 %v1476_v6, 0.0 }
 0x343   : > { %1574 = vst.msk [vmem:[#allocation2 + $0x18] sm:$0xff] %vm1239_vm4, %v1554_v0  ;;  %v3527_v0 = vmov (!%p2705_p0), 0.0  }
 0x344   : > { %1572 = vst.msk [vmem:[#allocation2 + $0x8] sm:$0xff] %vm1239_vm4, %v1552_v2  ;;  %1595 = vst.msk [vmem:[#allocation2] sm:$0xff] (!%p2705_p0), %vm1239_vm4, %v3527_v0 }
 0x345   : > { %1596 = vst.msk [vmem:[#allocation2 + $0x8] sm:$0xff] (!%p2705_p0), %vm1239_vm4, %v3527_v0 }
 0x377   : > { %v2784_v10 = vpop.f32.mrb[4].mxu0 }
 0x378   : > { %v1497_v7 = vadd.f32 %v2784_v10, %v4727_v14  ;;  %v1488_v37 = vpop.f32.mrb[5].mxu0 }
 0x379   : > { %v1489_v63 = vadd.f32 %v4727_v14, %v1488_v37  ;;  %v2785_v1 = vpop.f32.mrb[6].mxu0 }
 0x37a   : > { %v1557_v61 = vmax.f32 %v1497_v7, 0.0  ;;  %v1500_v42 = vadd.f32 %v2785_v1, %v4727_v14  ;;  %v1491_v36 = vpop.f32.mrb[7].mxu0 }
 0x37b   : > { %v1555_v50 = vmax.f32 %v1489_v63, 0.0  ;;  %v1492_v48 = vadd.f32 %v4727_v14, %v1491_v36  ;;  %v2792_v58 = vpop.f32.mrb[0].mxu1 }
 0x37c   : > { %1577 = vst.msk [vmem:[#allocation2 + $0x30] sm:$0xff] %vm1239_vm4, %v1557_v61  ;;  %v1558_v31 = vmax.f32 %v1500_v42, 0.0  ;;  %v1529_v33 = vadd.f32 %v2792_v58, %v4727_v14  ;;  %v1520_v16 = vpop.f32.mrb[1].mxu1 }
 0x37d   : > { %1575 = vst.msk [vmem:[#allocation2 + $0x20] sm:$0xff] %vm1239_vm4, %v1555_v50  ;;  %v1556_v25 = vmax.f32 %v1492_v48, 0.0  ;;  %v1521_v29 = vadd.f32 %v4727_v14, %v1520_v16  ;;  %v2793_v60 = vpop.f32.mrb[2].mxu1 }
 0x37e   : > { %1578 = vst.msk [vmem:[#allocation2 + $0x38] sm:$0xff] %vm1239_vm4, %v1558_v31  ;;  %v1565_v55 = vmax.f32 %v1529_v33, 0.0  ;;  %v1532_v26 = vadd.f32 %v2793_v60, %v4727_v14  ;;  %v1523_v17 = vpop.f32.mrb[3].mxu1 }
 0x37f   : > { %1576 = vst.msk [vmem:[#allocation2 + $0x28] sm:$0xff] %vm1239_vm4, %v1556_v25  ;;  %v1563_v28 = vmax.f32 %v1521_v29, 0.0  ;;  %v1524_v46 = vadd.f32 %v4727_v14, %v1523_v17 }
 0x380   : > { %1585 = vst.msk [vmem:[#allocation2 + $0x70] sm:$0xff] %vm1239_vm4, %v1565_v55  ;;  %v1566_v20 = vmax.f32 %v1532_v26, 0.0 }
 0x381   : > { %1583 = vst.msk [vmem:[#allocation2 + $0x60] sm:$0xff] %vm1239_vm4, %v1563_v28  ;;  %v1564_v45 = vmax.f32 %v1524_v46, 0.0 }
 0x382   : > { %1586 = vst.msk [vmem:[#allocation2 + $0x78] sm:$0xff] %vm1239_vm4, %v1566_v20 }
 0x383   : > { %1584 = vst.msk [vmem:[#allocation2 + $0x68] sm:$0xff] %vm1239_vm4, %v1564_v45 }
 0x3b3   : > { %v2788_v18 = vpop.f32.mrb[8].mxu0 }
 0x3b4   : > { %v1513_v39 = vadd.f32 %v2788_v18, %v4727_v14  ;;  %v1504_v30 = vpop.f32.mrb[9].mxu0 }
 0x3b5   : > { %v1505_v8 = vadd.f32 %v4727_v14, %v1504_v30  ;;  %v2789_v49 = vpop.f32.mrb[10].mxu0 }
 0x3b6   : > { %v1561_v5 = vmax.f32 %v1513_v39, 0.0  ;;  %v1516_v27 = vadd.f32 %v2789_v49, %v4727_v14  ;;  %v1507_v44 = vpop.f32.mrb[11].mxu0 }
 0x3b7   : > { %v1559_v56 = vmax.f32 %v1505_v8, 0.0  ;;  %v1508_v24 = vadd.f32 %v4727_v14, %v1507_v44  ;;  %v2796_v32 = vpop.f32.mrb[4].mxu1 }
 0x3b8   : > { %1581 = vst.msk [vmem:[#allocation2 + $0x50] sm:$0xff] %vm1239_vm4, %v1561_v5  ;;  %v1562_v62 = vmax.f32 %v1516_v27, 0.0  ;;  %v1545_v54 = vadd.f32 %v2796_v32, %v4727_v14  ;;  %v1536_v51 = vpop.f32.mrb[5].mxu1 }
 0x3b9   : > { %1579 = vst.msk [vmem:[#allocation2 + $0x40] sm:$0xff] %vm1239_vm4, %v1559_v56  ;;  %v1560_v59 = vmax.f32 %v1508_v24, 0.0  ;;  %v1537_v41 = vadd.f32 %v4727_v14, %v1536_v51  ;;  %v2797_v47 = vpop.f32.mrb[6].mxu1  ;;  %1594 = sbr.rel (%p2705_p0) target bundleno = 960 (0x3c0), region = 104 }
 0x3ba   : > { %1582 = vst.msk [vmem:[#allocation2 + $0x58] sm:$0xff] %vm1239_vm4, %v1562_v62  ;;  %v1569_v4 = vmax.f32 %v1545_v54, 0.0  ;;  %v1548_v3 = vadd.f32 %v2797_v47, %v4727_v14  ;;  %v1539_v57 = vpop.f32.mrb[7].mxu1 }
 0x3bb   : > { %1580 = vst.msk [vmem:[#allocation2 + $0x48] sm:$0xff] %vm1239_vm4, %v1560_v59  ;;  %v1567_v9 = vmax.f32 %v1537_v41, 0.0  ;;  %v1540_v43 = vadd.f32 %v4727_v14, %v1539_v57 }
 0x3bc   : > { %1589 = vst.msk [vmem:[#allocation2 + $0x90] sm:$0xff] %vm1239_vm4, %v1569_v4  ;;  %v1570_v23 = vmax.f32 %v1548_v3, 0.0 }
 0x3bd   : > { %1587 = vst.msk [vmem:[#allocation2 + $0x80] sm:$0xff] %vm1239_vm4, %v1567_v9  ;;  %v1568_v6 = vmax.f32 %v1540_v43, 0.0 }
 0x3be   : > { %1590 = vst.msk [vmem:[#allocation2 + $0x98] sm:$0xff] %vm1239_vm4, %v1570_v23 }
 0x3bf   : > { %1588 = vst.msk [vmem:[#allocation2 + $0x88] sm:$0xff] %vm1239_vm4, %v1568_v6 }
 0x3c0 PF: > { %s5519_s15 = sld [smem:[#allocation31_spill]] }
 0x3c6   : > { %p2706_p3 = scmp.ne.s32.totalorder %s5519_s15, 1 }
 0x3c7   : > { %v3528_v14 = vmov (!%p2706_p3), 0.0  }
 0x3c8   : > { %1600 = sbr.rel (%p2706_p3) target bundleno = 975 (0x3cf), region = 108  ;;  %1601 = vst.msk [vmem:[#allocation2 + $0x90] sm:$0xff] (!%p2706_p3), %vm1239_vm4, %v3528_v14  ;;  %1602 = vst.msk [vmem:[#allocation2 + $0x98] sm:$0xff] (!%p2706_p3), %vm1239_vm4, %v3528_v14 }
 0x3cf PF: > { %v4778_v2 = vld [vmem:[#allocation2] sm:$0xff]  ;;  %v4780_v10 = vld [vmem:[#allocation2 + $0x8] sm:$0xff]  ;;  %v1605_v7 = vld [vmem:[#allocation2 + $0x10] sm:$0xff]  ;;  %s3529_s12 = smov 40   ;;  %s3530_s1 = smov 48   ;;  %vm2130_vm12 = vcmask 1043456  }
 0x3d0   : > { %v1624_v37 = vrot.slane %v4780_v10, 7  ;;  %v1743_v63 = vpack.c.bf16 %v4780_v10, %v4778_v2  ;;  %v1606_v1 = vld [vmem:[#allocation2 + $0x18] sm:$0xff]  ;;  %v1683_v61 = vrot.slane %v4778_v2, 1  ;;  %v1607_v42 = vld [vmem:[#allocation2 + $0x20] sm:$0xff]  ;;  %v1608_v36 = vld [vmem:[#allocation2 + $0x28] sm:$0xff]  ;;  %v1684_v48 = vrot.slane %v4780_v10, 1 }
 0x3d1   : > { %v1744_v50 = vpack.c.bf16 %v1606_v1, %v1605_v7  ;;  %v1685_v58 = vrot.slane %v1605_v7, 1  ;;  %v1625_v31 = vrot.slane %v1605_v7, 7  ;;  %v1626_v33 = vrot.slane %v1606_v1, 7  ;;  %v3073_v27 = vld [vmem:[#allocation9] sm:$0xff]   ;;  %v3074_v32 = vld [vmem:[#allocation9 + $0x8] sm:$0xff]   ;;  %v3076_v9 = vld [vmem:[#allocation9 + $0x18] sm:$0xff]  }
 0x3d2   : > { %1781 = vrot.lane.b32.xlu0 %v1743_v63, %s3522_s30  ;;  %v1686_v16 = vrot.slane %v1606_v1, 1  ;;  %v1687_v25 = vrot.slane %v1607_v42, 1  ;;  %v1627_v29 = vrot.slane %v1607_v42, 7  ;;  %v1721_v55 = vsel %vm808_vm1, %v1683_v61, %v1684_v48  ;;  %2798 = vmatprep.subr.bf16.mxu1 %v3073_v27  ;;  %v4837_v57 = vld [vmem:[#allocation2 + $0x40] sm:$0xff]  ;;  %v5521_v7 = vld [vmem:[#allocation45_spill] sm:$0xff]  ;;  %s3531_s2 = smov 56  }
 0x3d3   : > { %v1720_v60 = vsel %vm808_vm1, %v1684_v48, %v1685_v58  ;;  %v1660_v26 = vsel %vm615_vm0, %v1624_v37, %v1625_v31  ;;  %v1628_v17 = vrot.slane %v1608_v36, 7  ;;  %v1723_v28 = vmul.f32 %v1721_v55, %v4069_v11  ;;  %2799 = vmatpush3.bf16.msra.mxu1 %v3073_v27  ;;  %v2317_v1 = vld [vmem:[#allocation18] sm:$0x3]  ;;  %v4861_v48 = vld [vmem:[#allocation2 + $0x98] sm:$0xff]  ;;  %s3532_s4 = smov 64   ;;  %s5565_s11 = sld [smem:[#allocation32_spill]] }
 0x3d4   : > { %v1724_v46 = vmul.f32 %v1720_v60, %v4083_v21  ;;  %v1659_v20 = vsel %vm615_vm0, %v1625_v31, %v1626_v33  ;;  %v1665_v45 = vmul.f32 %v1660_v26, %v4071_v12  ;;  %v1718_v39 = vsel %vm808_vm1, %v1686_v16, %v1687_v25  ;;  %2800 = vmatprep.subr.bf16.mxu1 %v3074_v32  ;;  %v5522_v31 = vld [vmem:[#allocation46_spill] sm:$0xff]  ;;  %v1612_v26 = vld [vmem:[#allocation2 + $0x48] sm:$0xff]  ;;  %p5568_p2 = scmp.ne.s32.totalorder %s5449_s20, 0 }
 0x3d5   : > { %v1666_v18 = vmul.f32 %v1659_v20, %v4085_v22  ;;  %v1719_v30 = vsel %vm808_vm1, %v1685_v58, %v1686_v16  ;;  %v1657_v8 = vsel %vm615_vm0, %v1627_v29, %v1628_v17  ;;  %v1726_v49 = vmul.f32 %v1718_v39, %v4109_v35  ;;  %v1609_v22 = vld [vmem:[#allocation2 + $0x30] sm:$0xff]  ;;  %v3075_v35 = vld [vmem:[#allocation9 + $0x10] sm:$0xff]   ;;  %2851 = vmatprep.subr.msk.bf16.mxu0 %vm1434_vm2, %v2317_v1  ;;  %v4897_v39 = vld [vmem:[#allocation15] ss:$0 sm:$0xff] }
 0x3d6   : > { %1783 = vrot.lane.b32.xlu0 %v1744_v50, %s3522_s30  ;;  %v1763_v11 = vpack.c.bf16 %v1724_v46, %v1723_v28  ;;  %v1725_v21 = vmul.f32 %v1719_v30, %v4107_v34  ;;  %v1658_v12 = vsel %vm615_vm0, %v1626_v33, %v1627_v29  ;;  %v1668_v24 = vmul.f32 %v1657_v8, %v4125_v53  ;;  %v4822_v34 = vld [vmem:[#allocation2 + $0x38] sm:$0xff]  ;;  %v5523_v16 = vld [vmem:[#allocation47_spill] sm:$0xff]  ;;  %v4902_v30 = vld [vmem:[#allocation2 + $0x50] sm:$0xff] }
 0x3d7   : > { %v4815_v5 = vpack.c.bf16 %v1666_v18, %v1665_v45  ;;  %v1667_v56 = vmul.f32 %v1658_v12, %v4123_v52  ;;  %v1688_v62 = vrot.slane %v1608_v36, 1  ;;  %v1689_v54 = vrot.slane %v1609_v22, 1  ;;  %2801 = vmatpush3.bf16.msra.mxu1 %v3074_v32 }
 0x3d8   : > { %1805 = vrot.lane.b32.xlu1 %v1763_v11, %s3520_s26  ;;  %v1764_v44 = vpack.c.bf16 %v1726_v49, %v1725_v21  ;;  %v1629_v59 = vrot.slane %v1609_v22, 7  ;;  %v1630_v41 = vrot.slane %v4822_v34, 7  ;;  %2802 = vmatprep.subr.bf16.mxu1 %v3075_v35  ;;  %v1745_v47 = vpack.c.bf16 %v1608_v36, %v1607_v42  ;;  %v4905_v11 = vld [vmem:[#allocation17] ss:$0 sm:$0xff]  ;;  %v5524_v21 = vld [vmem:[#allocation57_spill] sm:$0xff] }
 0x3d9   : > { %v4825_v51 = vpack.c.bf16 %v1668_v24, %v1667_v56  ;;  %v1716_v52 = vsel %vm808_vm1, %v1688_v62, %v1689_v54  ;;  %v1717_v53 = vsel %vm808_vm1, %v1687_v25, %v1688_v62  ;;  %v1690_v6 = vrot.slane %v4822_v34, 1  ;;  %v5527_v24 = vld [vmem:[#allocation58_spill] sm:$0xff]  ;;  %v5528_v62 = vld [vmem:[#allocation39_spill] sm:$0xff]  ;;  %s2733_s0 = sshll.u32 %s5565_s11, 5  ;;  %s5277_s11 = scalar_lea.sflag [#allocation5], %s510_s16 }
 0x3da   : > { %1829 = vrot.lane.b32.xlu0 %v4815_v5, %s3525_s24  ;;  %v1727_v4 = vmul.f32 %v1717_v53, %v4146_v13  ;;  %v1728_v3 = vmul.f32 %v1716_v52, %v4148_v15  ;;  %v1655_v43 = vsel %vm615_vm0, %v1629_v59, %v1630_v41  ;;  %v1656_v23 = vsel %vm615_vm0, %v1628_v17, %v1629_v59  ;;  %v5520_v15 = vld [vmem:[#allocation44_spill] sm:$0xff] }
 0x3db   : > { %v1691_v0 = vrot.slane %v4837_v57, 1  ;;  %2803 = vmatpush3.bf16.msra.mxu1 %v3075_v35  ;;  %v1669_v14 = vmul.f32 %v1656_v23, %v5520_v15  ;;  %v1670_v63 = vmul.f32 %v1655_v43, %v5521_v7  ;;  %v1715_v36 = vsel %vm808_vm1, %v1689_v54, %v1690_v6 }
 0x3dc   : > { %1807 = vrot.lane.b32.xlu1 %v1764_v44, %s3520_s26  ;;  %v1765_v13 = vpack.c.bf16 %v1728_v3, %v1727_v4  ;;  %2804 = vmatprep.subr.bf16.mxu1 %v3076_v9  ;;  %v1623_v58 = vrot.slane %v4778_v2, 7  ;;  %v1729_v33 = vmul.f32 %v1715_v36, %v5522_v31  ;;  %v1746_v29 = vpack.c.bf16 %v4822_v34, %v1609_v22  ;;  %v5525_v22 = vld [vmem:[#allocation37_spill] sm:$0xff]  ;;  %v5529_v34 = vld [vmem:[#allocation40_spill] sm:$0xff] }
 0x3dd   : > { %v1714_v42 = vsel %vm808_vm1, %v1690_v6, %v1691_v0  ;;  %v1642_v60 = vrot.slane %v4861_v48, 7  ;;  %v1631_v45 = vrot.slane %v4837_v57, 7  ;;  %v1632_v18 = vrot.slane %v1612_v26, 7 }
 0x3de   : > { %1846 = vrot.lane.b32.xlu0 %v1744_v50, %s3526_s25  ;;  %v4859_v50 = vpack.c.bf16 %v1670_v63, %v1669_v14  ;;  %v1730_v25 = vmul.f32 %v1714_v42, %v5523_v16  ;;  %v1661_v17 = vsel %vm615_vm0, %v1623_v58, %v1624_v37  ;;  %v3077_v37 = vld [vmem:[#allocation9 + $0x20] ss:$0 sps:$4 sm:$0xff]   ;;  %v2343_v8 = vsel %vm1434_vm2, %v2317_v1, 0 }
 0x3df   : > { %2805 = vmatpush3.bf16.msra.mxu1 %v3076_v9  ;;  %v1662_v28 = vsel %vm615_vm0, %v1642_v60, %v1623_v58  ;;  %v4886_v20 = vmul.f32 %v1661_v17, %v4497_v19  ;;  %v1653_v19 = vsel %vm615_vm0, %v1631_v45, %v1632_v18  ;;  %v2132_v12 = vsel %vm2130_vm12, %v3077_v37, 0  ;;  %2825 = vmatpush3.bf16.msra.mxu0 %v2343_v8  ;;  %v5530_v58 = vld [vmem:[#allocation62_spill] sm:$0xff] }
 0x3e0   : > { %1831 = vrot.lane.b32.xlu1 %v4825_v51, %s3525_s24  ;;  %v4872_v55 = vpack.c.bf16 %v1730_v25, %v1729_v33  ;;  %v4883_v46 = vmul.f32 %v1662_v28, %v4495_v40  ;;  %v1654_v40 = vsel %vm615_vm0, %v1630_v41, %v1631_v45  ;;  %2850 = vmatprep.subr.msk.bf16.mxu1 %vm2130_vm12, %v3077_v37  ;;  %v1692_v52 = vrot.slane %v1612_v26, 1  ;;  %v5531_v33 = vld [vmem:[#allocation63_spill] sm:$0xff]  ;;  %v5534_v37 = vld [vmem:[#allocation68_spill] sm:$0xff] }
 0x3e1   : > { %v1671_v49 = vmul.f32 %v1654_v40, %v5524_v21  ;;  %v2254_v27 = vmul.f32 %v4897_v39, %v5525_v22  ;;  %v1672_v32 = vmul.f32 %v1653_v19, %v5527_v24  ;;  %v2256_v54 = vmul.f32 %v4897_v39, %v5528_v62  ;;  %v4948_v25 = vld [vmem:[#allocation2 + $0x60] sm:$0xff]  ;;  %v5535_v19 = vld [vmem:[#allocation61_spill] sm:$0xff] }
 0x3e2   : > { %1863 = vrot.lane.b32.xlu0 %v1764_v44, %s3529_s12  ;;  %v1753_v10 = vpack.c.bf16 %v4886_v20, %v4883_v46  ;;  %v5526_v44 = vld [vmem:[#allocation38_spill] sm:$0xff]  ;;  %v2257_v35 = vmul.f32 %v4897_v39, %v5529_v34  ;;  %v1693_v53 = vrot.slane %v4902_v30, 1  ;;  %v1633_v6 = vrot.slane %v4902_v30, 7  ;;  %v5533_v28 = vld [vmem:[#allocation51_spill] sm:$0xff] }
 0x3e3   : > { %v2255_v56 = vmul.f32 %v4897_v39, %v5526_v44  ;;  %2807 = vmatpush3.bf16.msra.mxu1 %v2132_v12  ;;  %v2277_v59 = vadd.f32 %v4905_v11, %v2254_v27  ;;  %v2279_v4 = vadd.f32 %v4905_v11, %v2256_v54  ;;  %v4929_v23 = vpack.c.bf16 %v1672_v32, %v1671_v49  ;;  %v5536_v21 = vld [vmem:[#allocation67_spill] sm:$0xff]  ;;  %v5537_v12 = vld [vmem:[#allocation69_spill] sm:$0xff] }
 0x3e4   : > { %1848 = vrot.lane.b32.xlu1 %v1745_v47, %s3526_s25  ;;  %v2280_v3 = vadd.f32 %v4905_v11, %v2257_v35  ;;  %v1712_v14 = vsel %vm808_vm1, %v1692_v52, %v1693_v53  ;;  %v1713_v7 = vsel %vm808_vm1, %v1691_v0, %v1692_v52  ;;  %v1747_v36 = vpack.c.bf16 %v1612_v26, %v4837_v57  ;;  %v5532_v26 = vld [vmem:[#allocation43_spill] sm:$0xff] }
 0x3e5   : > { %v2278_v41 = vadd.f32 %v4905_v11, %v2255_v56  ;;  %v2293_v9 = vmax.f32 %v2277_v59, 0.0  ;;  %v1731_v31 = vmul.f32 %v1713_v7, %v5530_v58  ;;  %v1732_v16 = vmul.f32 %v1712_v14, %v5531_v33 }
 0x3e6   : > { %1880 = vrot.lane.b32.xlu0 %v4825_v51, %s3530_s1  ;;  %v2296_v15 = vmax.f32 %v2280_v3, 0.0  ;;  %v1652_v0 = vsel %vm615_vm0, %v1632_v18, %v1633_v6  ;;  %v2258_v17 = vmul.f32 %v4897_v39, %v5532_v26  ;;  %v2259_v45 = vmul.f32 %v4897_v39, %v5533_v28  ;;  %v5538_v3 = vld [vmem:[#allocation73_spill] sm:$0xff] }
 0x3e7   : > { %v2294_v43 = vmax.f32 %v2278_v41, 0.0  ;;  %v1673_v18 = vmul.f32 %v1652_v0, %v5534_v37  ;;  %v1695_v40 = vrot.slane %v4948_v25, 1  ;;  %v2260_v8 = vmul.f32 %v4897_v39, %v5535_v19  ;;  %v5542_v37 = vld [vmem:[#allocation49_spill] sm:$0xff]  ;;  %v5543_v19 = vld [vmem:[#allocation50_spill] sm:$0xff] }
 0x3e8   : > { %1865 = vrot.lane.b32.xlu1 %v1765_v13, %s3529_s12  ;;  %v2261_v49 = vmul.f32 %v4897_v39, %v5536_v21  ;;  %v2281_v27 = vadd.f32 %v4905_v11, %v2258_v17  ;;  %v2282_v44 = vadd.f32 %v4905_v11, %v2259_v45  ;;  %v1635_v14 = vrot.slane %v4948_v25, 7  ;;  %v1619_v21 = vld [vmem:[#allocation2 + $0x80] sm:$0xff] }
 0x3e9   : > { %v2309_v1 = vpack.c.bf16 %v2294_v43, %v2293_v9  ;;  %v2283_v56 = vadd.f32 %v4905_v11, %v2260_v8  ;;  %v5539_v43 = vld [vmem:[#allocation74_spill] sm:$0xff]  ;;  %vm2002_vm13 = vcmask 326656   ;;  %vm2019_vm14 = vcmask 392192  }
 0x3ea   : > { %1897 = vrot.lane.b32.xlu0 %v1745_v47, %s3531_s2  ;;  %v2284_v24 = vadd.f32 %v4905_v11, %v2261_v49  ;;  %v2297_v32 = vmax.f32 %v2281_v27, 0.0  ;;  %v2298_v62 = vmax.f32 %v2282_v44, 0.0  ;;  %v5546_v27 = vld [vmem:[#allocation36_spill] sm:$0xff]  ;;  %vm2036_vm15 = vcmask 457728  }
 0x3eb   : > { %2826 = vmatprep.mubr.msk.bf16.mxu0 %vm1208_vm3, %v2309_v1  ;;  %v2299_v35 = vmax.f32 %v2283_v56, 0.0  ;;  %v2263_v44 = vmul.f32 %v4897_v39, %v5546_v27 }
 0x3ec   : > { %1882 = vrot.lane.b32.xlu1 %v4859_v50, %s3530_s1  ;;  %v2300_v52 = vmax.f32 %v2284_v24, 0.0  ;;  %v2311_v41 = vpack.c.bf16 %v2298_v62, %v2297_v32  ;;  %v5547_v24 = vld [vmem:[#allocation41_spill] sm:$0xff]  ;;  %v5548_v62 = vld [vmem:[#allocation42_spill] sm:$0xff] }
 0x3ed   : > { %v2264_v32 = vmul.f32 %v4897_v39, %v5547_v24  ;;  %v5555_v24 = vld [vmem:[#allocation66_spill] sm:$0xff] }
 0x3ee   : > { %1914 = vrot.lane.b32.xlu0 %v1765_v13, %s3532_s4 }
 0x3f0   : > { %1899 = vrot.lane.b32.xlu1 %v1746_v29, %s3531_s2 }
 0x3f2   : > { %1916 = vrot.lane.b32.xlu0 %v4872_v55, %s3532_s4 }
 0x3f4   : > { %1785 = vrot.lane.b32.xlu1 %v1745_v47, %s3522_s30  ;;  %v4923_v47 = vld [vmem:[#allocation2 + $0x58] sm:$0xff] }
 0x3f5   : > { %v1634_v63 = vrot.slane %v4923_v47, 7  ;;  %v1694_v57 = vrot.slane %v4923_v47, 1 }
 0x3f6   : > { %1809 = vrot.lane.b32.xlu0 %v1765_v13, %s3520_s26  ;;  %v2295_v13 = vmax.f32 %v2279_v4, 0.0  ;;  %v2312_v4 = vpack.c.bf16 %v2300_v52, %v2299_v35  ;;  %v5549_v35 = vld [vmem:[#allocation53_spill] sm:$0xff] }
 0x3f7   : > { %v1710_v54 = vsel %vm808_vm1, %v1694_v57, %v1695_v40  ;;  %v1711_v34 = vsel %vm808_vm1, %v1693_v53, %v1694_v57  ;;  %v1748_v53 = vpack.c.bf16 %v4923_v47, %v4902_v30  ;;  %v1617_v30 = vld [vmem:[#allocation2 + $0x70] sm:$0xff] }
 0x3f8   : > { %1787 = vrot.lane.b32.xlu1 %v1746_v29, %s3522_s30  ;;  %v2310_v42 = vpack.c.bf16 %v2296_v15, %v2295_v13  ;;  %v1733_v9 = vmul.f32 %v1711_v34, %v5538_v3  ;;  %v1616_v15 = vld [vmem:[#allocation2 + $0x68] sm:$0xff]  ;;  %v5540_v47 = vld [vmem:[#allocation77_spill] sm:$0xff]  ;;  %v1697_v0 = vrot.slane %v1617_v30, 1  ;;  %v2287_v3 = vadd.f32 %v4905_v11, %v2264_v32 }
 0x3f9   : > { %v1636_v7 = vrot.slane %v1616_v15, 7  ;;  %v1749_v45 = vpack.c.bf16 %v1616_v15, %v4948_v25  ;;  %v1699_v25 = vrot.slane %v1619_v21, 1 }
 0x3fa   : > { %1833 = vrot.lane.b32.xlu0 %v4859_v50, %s3525_s24  ;;  %2827 = vmatmul.mubr.msk.bf16.vlgmr.msra.gmra.mrb[12].mxu0 %vm1208_vm3, %v2310_v42  ;;  %v1650_v42 = vsel %vm615_vm0, %v1634_v63, %v1635_v14 }
 0x3fb   : > { %2830 = vmatprep.mubr.msk.bf16.mxu0 %vm1208_vm3, %v2311_v41  ;;  %v1649_v1 = vsel %vm615_vm0, %v1635_v14, %v1636_v7  ;;  %v1675_v58 = vmul.f32 %v1650_v42, %v5540_v47  ;;  %v5550_v47 = vld [vmem:[#allocation55_spill] sm:$0xff] }
 0x3fc   : > { %1811 = vrot.lane.b32.xlu1 %v4872_v55, %s3520_s26 }
 0x3fe   : > { %1850 = vrot.lane.b32.xlu0 %v1746_v29, %s3526_s25  ;;  %v1651_v29 = vsel %vm615_vm0, %v1633_v6, %v1634_v63  ;;  %v1734_v6 = vmul.f32 %v1710_v54, %v5539_v43  ;;  %v2265_v54 = vmul.f32 %v4897_v39, %v5548_v62  ;;  %v5556_v62 = vld [vmem:[#allocation48_spill] sm:$0xff] }
 0x3ff   : > { %v1674_v22 = vmul.f32 %v1651_v29, %v5537_v12  ;;  %v1637_v29 = vrot.slane %v1617_v30, 7  ;;  %v5545_v12 = vld [vmem:[#allocation35_spill] sm:$0xff] }
 0x400   : > { %1835 = vrot.lane.b32.xlu1 %v4929_v23, %s3525_s24  ;;  %v1768_v13 = vpack.c.bf16 %v1734_v6, %v1733_v9  ;;  %v2288_v9 = vadd.f32 %v4905_v11, %v2265_v54  ;;  %v2266_v54 = vmul.f32 %v4897_v39, %v5556_v62 }
 0x401   : > { %v4979_v59 = vpack.c.bf16 %v1674_v22, %v1673_v18  ;;  %v1648_v28 = vsel %vm615_vm0, %v1636_v7, %v1637_v29  ;;  %v2262_v22 = vmul.f32 %v4897_v39, %v5545_v12 }
 0x402   : > { %1867 = vrot.lane.b32.xlu0 %v4872_v55, %s3529_s12  ;;  %v1767_v55 = vpack.c.bf16 %v1732_v16, %v1731_v31  ;;  %2831 = vmatmul.mubr.msk.bf16.gmra.mrb[16].mxu0 %vm1208_vm3, %v2312_v4  ;;  %v5541_v31 = vld [vmem:[#allocation78_spill] sm:$0xff]  ;;  %v1696_v16 = vrot.slane %v1616_v15, 1  ;;  %v2286_v4 = vadd.f32 %v4905_v11, %v2263_v44  ;;  %v2303_v15 = vmax.f32 %v2287_v3, 0.0  ;;  %v5554_v44 = vld [vmem:[#allocation65_spill] sm:$0xff] }
 0x403   : > { %v1676_v33 = vmul.f32 %v1649_v1, %v5541_v31  ;;  %v2285_v41 = vadd.f32 %v4905_v11, %v2262_v22  ;;  %v2304_v14 = vmax.f32 %v2288_v9, 0.0  ;;  %v5551_v31 = vld [vmem:[#allocation56_spill] sm:$0xff]  ;;  %v2289_v3 = vadd.f32 %v4905_v11, %v2266_v54 }
 0x404   : > { %1852 = vrot.lane.b32.xlu1 %v1747_v36, %s3526_s25  ;;  %v1708_v63 = vsel %vm808_vm1, %v1696_v16, %v1697_v0  ;;  %v1709_v26 = vsel %vm808_vm1, %v1695_v40, %v1696_v16  ;;  %v5544_v40 = vld [vmem:[#allocation52_spill] sm:$0xff]  ;;  %v2302_v6 = vmax.f32 %v2286_v4, 0.0 }
 0x405   : > { %v5006_v57 = vpack.c.bf16 %v1676_v33, %v1675_v58  ;;  %v1735_v18 = vmul.f32 %v1709_v26, %v5542_v37  ;;  %v1736_v8 = vmul.f32 %v1708_v63, %v5543_v19  ;;  %v2301_v43 = vmax.f32 %v2285_v41, 0.0  ;;  %v5553_v19 = vld [vmem:[#allocation60_spill] sm:$0xff]  ;;  %v5559_v41 = vld [vmem:[#allocation70_spill] sm:$0xff] }
 0x406   : > { %1884 = vrot.lane.b32.xlu0 %v4929_v23, %s3530_s1  ;;  %v2314_v42 = vpack.c.bf16 %v2304_v14, %v2303_v15  ;;  %v1639_v63 = vrot.slane %v1619_v21, 7  ;;  %v2269_v4 = vmul.f32 %v4897_v39, %v5559_v41  ;;  %v5561_v14 = vld [vmem:[#allocation72_spill] sm:$0xff] }
 0x407   : > { %v1769_v34 = vpack.c.bf16 %v1736_v8, %v1735_v18  ;;  %v2313_v1 = vpack.c.bf16 %v2302_v6, %v2301_v43  ;;  %v5560_v43 = vld [vmem:[#allocation71_spill] sm:$0xff] }
 0x408   : > { %1869 = vrot.lane.b32.xlu1 %v1767_v55, %s3529_s12 }
 0x409   : > { %2834 = vmatprep.mubr.msk.bf16.mxu0 %vm1208_vm3, %v2313_v1 }
 0x40a   : > { %1901 = vrot.lane.b32.xlu0 %v1747_v36, %s3531_s2  ;;  %2835 = vmatmul.mubr.msk.bf16.gmra.mrb[20].mxu0 %vm1208_vm3, %v2314_v42  ;;  %v2305_v42 = vmax.f32 %v2289_v3, 0.0 }
 0x40c   : > { %1886 = vrot.lane.b32.xlu1 %v4979_v59, %s3530_s1 }
 0x40e   : > { %1918 = vrot.lane.b32.xlu0 %v1767_v55, %s3532_s4 }
 0x410   : > { %1903 = vrot.lane.b32.xlu1 %v1748_v53, %s3531_s2 }
 0x412   : > { %1920 = vrot.lane.b32.xlu0 %v1768_v13, %s3532_s4 }
 0x414   : > { %1789 = vrot.lane.b32.xlu1 %v1747_v36, %s3522_s30  ;;  %v1618_v36 = vld [vmem:[#allocation2 + $0x78] sm:$0xff] }
 0x415   : > { %v1638_v17 = vrot.slane %v1618_v36, 7  ;;  %v1698_v56 = vrot.slane %v1618_v36, 1  ;;  %v1750_v16 = vpack.c.bf16 %v1618_v36, %v1617_v30  ;;  %v1621_v30 = vld [vmem:[#allocation2 + $0x90] sm:$0xff]  ;;  %v5552_v36 = vld [vmem:[#allocation59_spill] sm:$0xff] }
 0x416   : > { %1813 = vrot.lane.b32.xlu0 %v1767_v55, %s3520_s26  ;;  %v1677_v55 = vmul.f32 %v1648_v28, %v5544_v40  ;;  %v1701_v40 = vrot.slane %v1621_v30, 1 }
 0x417   : > { %v1647_v49 = vsel %vm615_vm0, %v1637_v29, %v1638_v17  ;;  %v1620_v29 = vld [vmem:[#allocation2 + $0x88] sm:$0xff]  ;;  %v1646_v37 = vsel %vm615_vm0, %v1638_v17, %v1639_v63 }
 0x418   : > { %1791 = vrot.lane.b32.xlu1 %v1748_v53, %s3522_s30  ;;  %v1678_v52 = vmul.f32 %v1647_v49, %v5549_v35  ;;  %v1640_v26 = vrot.slane %v1620_v29, 7  ;;  %v1679_v18 = vmul.f32 %v1646_v37, %v5552_v36  ;;  %v1700_v49 = vrot.slane %v1620_v29, 1  ;;  %v5562_v36 = vld [vmem:[#allocation75_spill] sm:$0xff] }
 0x419   : > { %v1751_v22 = vpack.c.bf16 %v1620_v29, %v1619_v21  ;;  %v1752_v37 = vpack.c.bf16 %v4861_v48, %v1621_v30 }
 0x41a   : > { %1837 = vrot.lane.b32.xlu0 %v4979_v59, %s3525_s24  ;;  %v5045_v7 = vpack.c.bf16 %v1678_v52, %v1677_v55  ;;  %v1645_v28 = vsel %vm615_vm0, %v1639_v63, %v1640_v26  ;;  %v1704_v17 = vsel %vm808_vm1, %v1700_v49, %v1701_v40  ;;  %v1705_v12 = vsel %vm808_vm1, %v1699_v25, %v1700_v49 }
 0x41b   : > { %v1680_v8 = vmul.f32 %v1645_v28, %v5553_v19  ;;  %v1740_v32 = vmul.f32 %v1704_v17, %v5555_v24  ;;  %v5563_v19 = vld [vmem:[#allocation76_spill] sm:$0xff] }
 0x41c   : > { %1815 = vrot.lane.b32.xlu1 %v1768_v13, %s3520_s26 }
 0x41d   : > { %v1761_v55 = vpack.c.bf16 %v1680_v8, %v1679_v18 }
 0x41e   : > { %1854 = vrot.lane.b32.xlu0 %v1748_v53, %s3526_s25  ;;  %v1706_v53 = vsel %vm808_vm1, %v1698_v56, %v1699_v25  ;;  %v5558_v25 = vld [vmem:[#allocation64_spill] sm:$0xff] }
 0x41f   : > { %v1738_v33 = vmul.f32 %v1706_v53, %v5551_v31  ;;  %v2268_v52 = vmul.f32 %v4897_v39, %v5558_v25 }
 0x420   : > { %1839 = vrot.lane.b32.xlu1 %v5006_v57, %s3525_s24 }
 0x421   : > { %v2291_v53 = vadd.f32 %v4905_v11, %v2268_v52 }
 0x422   : > { %1871 = vrot.lane.b32.xlu0 %v1768_v13, %s3529_s12  ;;  %v1707_v13 = vsel %vm808_vm1, %v1697_v0, %v1698_v56  ;;  %v1739_v56 = vmul.f32 %v1705_v12, %v5554_v44 }
 0x423   : > { %v1737_v58 = vmul.f32 %v1707_v13, %v5550_v47  ;;  %v2292_v13 = vadd.f32 %v4905_v11, %v2269_v4  ;;  %v1702_v47 = vrot.slane %v4861_v48, 1 }
 0x424   : > { %1856 = vrot.lane.b32.xlu1 %v1749_v45, %s3526_s25  ;;  %v1771_v15 = vpack.c.bf16 %v1740_v32, %v1739_v56 }
 0x425   : > { %v1770_v0 = vpack.c.bf16 %v1738_v33, %v1737_v58  ;;  %v2307_v58 = vmax.f32 %v2291_v53, 0.0  ;;  %v2308_v31 = vmax.f32 %v2292_v13, 0.0  ;;  %v1703_v29 = vsel %vm808_vm1, %v1701_v40, %v1702_v47 }
 0x426   : > { %1888 = vrot.lane.b32.xlu0 %v5006_v57, %s3530_s1  ;;  %v1722_v63 = vsel %vm808_vm1, %v1702_v47, %v1683_v61  ;;  %v1741_v18 = vmul.f32 %v1703_v29, %v5562_v36  ;;  %vm2113_vm1 = vcmask 588800  }
 0x427   : > { %v1742_v8 = vmul.f32 %v1722_v63, %v5563_v19 }
 0x428   : > { %1873 = vrot.lane.b32.xlu1 %v1769_v34, %s3529_s12 }
 0x429   : > { %v1772_v2 = vpack.c.bf16 %v1742_v8, %v1741_v18 }
 0x42a   : > { %1905 = vrot.lane.b32.xlu0 %v1749_v45, %s3531_s2 }
 0x42c   : > { %1890 = vrot.lane.b32.xlu1 %v5045_v7, %s3530_s1 }
 0x42e   : > { %1922 = vrot.lane.b32.xlu0 %v1769_v34, %s3532_s4 }
 0x430   : > { %1907 = vrot.lane.b32.xlu1 %v1750_v16, %s3531_s2 }
 0x432   : > { %1924 = vrot.lane.b32.xlu0 %v1770_v0, %s3532_s4 }
 0x434   : > { %1793 = vrot.lane.b32.xlu1 %v1749_v45, %s3522_s30  ;;  %v1641_v45 = vrot.slane %v1621_v30, 7 }
 0x436   : > { %1817 = vrot.lane.b32.xlu0 %v1769_v34, %s3520_s26  ;;  %v1644_v27 = vsel %vm615_vm0, %v1640_v26, %v1641_v45  ;;  %v5557_v34 = vld [vmem:[#allocation54_spill] sm:$0xff]  ;;  %v1643_v21 = vsel %vm615_vm0, %v1641_v45, %v1642_v60  ;;  %vm2053_vm0 = vcmask 523264  }
 0x437   : > { %v2267_v35 = vmul.f32 %v4897_v39, %v5557_v34  ;;  %v1681_v6 = vmul.f32 %v1644_v27, %v5560_v43  ;;  %v1682_v1 = vmul.f32 %v1643_v21, %v5561_v14 }
 0x438   : > { %1795 = vrot.lane.b32.xlu1 %v1750_v16, %s3522_s30 }
 0x439   : > { %v2290_v9 = vadd.f32 %v4905_v11, %v2267_v35  ;;  %v1762_v11 = vpack.c.bf16 %v1682_v1, %v1681_v6 }
 0x43a   : > { %1841 = vrot.lane.b32.xlu0 %v5045_v7, %s3525_s24 }
 0x43b   : > { %v2306_v39 = vmax.f32 %v2290_v9, 0.0 }
 0x43c   : > { %1819 = vrot.lane.b32.xlu1 %v1770_v0, %s3520_s26  ;;  %s5564_s26 = sld [smem:[#allocation31_spill]] }
 0x43d   : > { %v2315_v33 = vpack.c.bf16 %v2306_v39, %v2305_v42 }
 0x43e   : > { %1858 = vrot.lane.b32.xlu0 %v1750_v16, %s3526_s25  ;;  %v2316_v16 = vpack.c.bf16 %v2308_v31, %v2307_v58 }
 0x43f   : > { %2838 = vmatprep.mubr.msk.bf16.mxu0 %vm1208_vm3, %v2315_v33 }
 0x440   : > { %1843 = vrot.lane.b32.xlu1 %v1761_v55, %s3525_s24  ;;  %2839 = vmatmul.mubr.msk.bf16.gmra.mrb[24].mxu0 %vm1208_vm3, %v2316_v16 }
 0x442   : > { %1875 = vrot.lane.b32.xlu0 %v1770_v0, %s3529_s12  ;;  %s2732_s28 = sshll.u32 %s5564_s26, 4 }
 0x443   : > { %s2487_s24 = sadd.s32 %s2733_s0, %s2732_s28  ;;  %s3533_s0 = smov [#allocation20]  }
 0x444   : > { %1860 = vrot.lane.b32.xlu1 %v1751_v22, %s3526_s25  ;;  %v1782_v60 = vpop.permute.xlu0 %1781  ;;  %s2734_s15 = sshll.u32 %s2487_s24, 7  ;;  %s3364_s24 = sshll.u32 %s3533_s0, 4  ;;  %s3365_s24 = int_to_ptr.vmem [resolvable:$false] %s3364_s24 }
 0x445   : > { %v1932_v48 = vsel %vm1239_vm4, %v1753_v10, %v1782_v60 }
 0x446   : > { %1892 = vrot.lane.b32.xlu0 %v1761_v55, %s3530_s1 }
 0x448   : > { %1877 = vrot.lane.b32.xlu1 %v1771_v15, %s3529_s12  ;;  %v1784_v0 = vpop.permute.xlu0 %1783  ;;  %s2490_s12 = sshll.u32 %s4770_s10, 4  ;;  %s5269_s12 = int_to_ptr.vmem [resolvable:$true] %s2490_s12 }
 0x449   : > { %v1935_v12 = vsel %vm1239_vm4, %v4815_v5, %v1784_v0  ;;  %s3360_s28 = scalar_lea.vmem %s5269_s12, 2048  ;;  %p3367_p1 = scmp.lt.s32.totalorder %s5269_s12, %s3365_s24 }
 0x44a   : > { %v1806_v26 = vpop.permute.xlu1 %1805  ;;  %1909 = vrot.lane.b32.xlu0 %v1751_v22, %s3531_s2  ;;  %p3361_p5 = scmp.ne.s32.totalorder %s5269_s12, %s3360_s28 }
 0x44b   : > { %v1955_v17 = vsel %vm1281_vm6, %v1932_v48, %v1806_v26 }
 0x44c   : > { %1894 = vrot.lane.b32.xlu1 %v1762_v11, %s3530_s1  ;;  %v1830_v28 = vpop.permute.xlu0 %1829  ;;  %p3362_p9 = pnand %p3361_p5, %p5568_p2 }
 0x44d   : > { %v1971_v22 = vsel %vm1323_vm8, %v1955_v17, %v1830_v28 }
 0x44e   : > { %v1808_v49 = vpop.permute.xlu1 %1807  ;;  %1926 = vrot.lane.b32.xlu0 %v1771_v15, %s3532_s4  ;;  %p3363_p7 = pneg %p3362_p9 }
 0x44f   : > { %v1957_v20 = vsel %vm1281_vm6, %v1935_v12, %v1808_v49 }
 0x450   : > { %1911 = vrot.lane.b32.xlu1 %v1752_v37, %s3531_s2  ;;  %v1847_v38 = vpop.permute.xlu0 %1846 }
 0x451   : > { %v1987_v44 = vsel %vm1365_vm10, %v1971_v22, %v1847_v38 }
 0x452   : > { %v1832_v61 = vpop.permute.xlu1 %1831 }
 0x453   : > { %v1973_v24 = vsel %vm1323_vm8, %v1957_v20, %v1832_v61 }
 0x454   : > { %1928 = vrot.lane.b32.xlu1 %v1772_v2, %s3532_s4  ;;  %v1864_v40 = vpop.permute.xlu0 %1863  ;;  %s5567_s4 = sld [smem:[#allocation84_spill]] }
 0x455   : > { %v2004_v56 = vsel %vm2002_vm13, %v1987_v44, %v1864_v40 }
 0x456   : > { %v1849_v45 = vpop.permute.xlu1 %1848 }
 0x457   : > { %v1989_v62 = vsel %vm1365_vm10, %v1973_v24, %v1849_v45 }
 0x458   : > { %v1881_v30 = vpop.permute.xlu0 %1880 }
 0x459   : > { %v2021_v10 = vsel %vm2019_vm14, %v2004_v56, %v1881_v30 }
 0x45a   : > { %v1866_v55 = vpop.permute.xlu1 %1865  ;;  %s5264_s26 = scalar_lea.hbm %s5567_s4, %s2734_s15  ;;  %s3366_s15 = scalar_lea.vmem %s3365_s24, 4096 }
 0x45b   : > { %v2006_v34 = vsel %vm2002_vm13, %v1989_v62, %v1866_v55  ;;  %p3368_p11 = scmp.lt.s32.totalorder %s3366_s15, %s3360_s28 }
 0x45c   : > { %v1898_v27 = vpop.permute.xlu0 %1897 }
 0x45d   : > { %v2038_v5 = vsel %vm2036_vm15, %v2021_v10, %v1898_v27  ;;  %p3369_p13 = por %p3368_p11, %p3367_p1 }
 0x45e   : > { %v1883_v46 = vpop.permute.xlu1 %1882 }
 0x45f   : > { %v2023_v21 = vsel %vm2019_vm14, %v2006_v34, %v1883_v46  ;;  %p3370_p4 = pnand %p3369_p13, %p3363_p7 }
 0x460   : > { %v1915_v32 = vpop.permute.xlu0 %1914 }
 0x461   : > { %v2055_v54 = vsel %vm2053_vm0, %v2038_v5, %v1915_v32 }
 0x462   : > { %v1900_v35 = vpop.permute.xlu1 %1899  ;;  %2808 = vmatprep.mubr.msk.bf16.mxu1 %vm2113_vm1, %v2055_v54 }
 0x463   : > { %v2040_v25 = vsel %vm2036_vm15, %v2023_v21, %v1900_v35 }
 0x464   : > { %v1917_v52 = vpop.permute.xlu0 %1916 }
 0x465   : > { %v2057_v41 = vsel %vm2053_vm0, %v2040_v25, %v1917_v52 }
 0x466   : > { %v1786_v4 = vpop.permute.xlu1 %1785  ;;  %2809 = vmatmul.mubr.msk.bf16.vlgmr.msra.gmra.mrb[8].mxu1 %vm2113_vm1, %v2057_v41 }
 0x467   : > { %v1938_v1 = vsel %vm1239_vm4, %v4825_v51, %v1786_v4 }
 0x468   : > { %v1810_v3 = vpop.permute.xlu0 %1809 }
 0x469   : > { %v1959_v39 = vsel %vm1281_vm6, %v1938_v1, %v1810_v3 }
 0x46a   : > { %v1788_v9 = vpop.permute.xlu1 %1787 }
 0x46b   : > { %v1941_v33 = vsel %vm1239_vm4, %v4859_v50, %v1788_v9 }
 0x46c   : > { %v1834_v43 = vpop.permute.xlu0 %1833 }
 0x46d   : > { %v1975_v47 = vsel %vm1323_vm8, %v1959_v39, %v1834_v43 }
 0x46e   : > { %v1812_v6 = vpop.permute.xlu1 %1811 }
 0x46f   : > { %v1961_v11 = vsel %vm1281_vm6, %v1941_v33, %v1812_v6 }
 0x470   : > { %v1851_v53 = vpop.permute.xlu0 %1850 }
 0x471   : > { %v1991_v31 = vsel %vm1365_vm10, %v1975_v47, %v1851_v53 }
 0x472   : > { %v1836_v13 = vpop.permute.xlu1 %1835 }
 0x473   : > { %v1977_v51 = vsel %vm1323_vm8, %v1961_v11, %v1836_v13 }
 0x474   : > { %v1868_v60 = vpop.permute.xlu0 %1867 }
 0x475   : > { %v2008_v16 = vsel %vm2002_vm13, %v1991_v31, %v1868_v60 }
 0x476   : > { %v1853_v15 = vpop.permute.xlu1 %1852 }
 0x477   : > { %v1993_v28 = vsel %vm1365_vm10, %v1977_v51, %v1853_v15 }
 0x478   : > { %v1885_v14 = vpop.permute.xlu0 %1884 }
 0x479   : > { %v2025_v29 = vsel %vm2019_vm14, %v2008_v16, %v1885_v14 }
 0x47a   : > { %v1870_v42 = vpop.permute.xlu1 %1869 }
 0x47b   : > { %v2010_v36 = vsel %vm2002_vm13, %v1993_v28, %v1870_v42 }
 0x47c   : > { %v1902_v58 = vpop.permute.xlu0 %1901 }
 0x47d   : > { %v2042_v63 = vsel %vm2036_vm15, %v2025_v29, %v1902_v58 }
 0x47e   : > { %v1887_v0 = vpop.permute.xlu1 %1886 }
 0x47f   : > { %v2027_v50 = vsel %vm2019_vm14, %v2010_v36, %v1887_v0 }
 0x480   : > { %v1919_v26 = vpop.permute.xlu0 %1918 }
 0x481   : > { %v2059_v37 = vsel %vm2053_vm0, %v2042_v63, %v1919_v26 }
 0x482   : > { %v1904_v18 = vpop.permute.xlu1 %1903  ;;  %2812 = vmatprep.mubr.msk.bf16.mxu1 %vm2113_vm1, %v2059_v37 }
 0x483   : > { %v2044_v19 = vsel %vm2036_vm15, %v2027_v50, %v1904_v18 }
 0x484   : > { %v1921_v8 = vpop.permute.xlu0 %1920 }
 0x485   : > { %v2061_v49 = vsel %vm2053_vm0, %v2044_v19, %v1921_v8 }
 0x486   : > { %v1790_v38 = vpop.permute.xlu1 %1789  ;;  %2813 = vmatmul.mubr.msk.bf16.gmra.mrb[12].mxu1 %vm2113_vm1, %v2061_v49 }
 0x487   : > { %v1944_v22 = vsel %vm1239_vm4, %v4929_v23, %v1790_v38 }
 0x488   : > { %v1814_v2 = vpop.permute.xlu0 %1813 }
 0x489   : > { %v1963_v44 = vsel %vm1281_vm6, %v1944_v22, %v1814_v2 }
 0x48a   : > { %v1792_v61 = vpop.permute.xlu1 %1791 }
 0x48b   : > { %v1947_v10 = vsel %vm1239_vm4, %v4979_v59, %v1792_v61 }
 0x48c   : > { %v1838_v40 = vpop.permute.xlu0 %1837 }
 0x48d   : > { %v1979_v56 = vsel %vm1323_vm8, %v1963_v44, %v1838_v40 }
 0x48e   : > { %v1816_v45 = vpop.permute.xlu1 %1815 }
 0x48f   : > { %v1965_v32 = vsel %vm1281_vm6, %v1947_v10, %v1816_v45  ;;  %v5210_v10 = vld [vmem:[#allocation11] ss:$0 sm:$0xff] }
 0x490   : > { %v1855_v48 = vpop.permute.xlu0 %1854 }
 0x491   : > { %v1995_v20 = vsel %vm1365_vm10, %v1979_v56, %v1855_v48 }
 0x492   : > { %v1840_v30 = vpop.permute.xlu1 %1839 }
 0x493   : > { %v1981_v23 = vsel %vm1323_vm8, %v1965_v32, %v1840_v30 }
 0x494   : > { %v1872_v55 = vpop.permute.xlu0 %1871 }
 0x495   : > { %v2012_v24 = vsel %vm2002_vm13, %v1995_v20, %v1872_v55 }
 0x496   : > { %v1857_v17 = vpop.permute.xlu1 %1856 }
 0x497   : > { %v1997_v35 = vsel %vm1365_vm10, %v1981_v23, %v1857_v17 }
 0x498   : > { %v1889_v12 = vpop.permute.xlu0 %1888 }
 0x499   : > { %v2029_v62 = vsel %vm2019_vm14, %v2012_v24, %v1889_v12 }
 0x49a   : > { %v1874_v27 = vpop.permute.xlu1 %1873 }
 0x49b   : > { %v2014_v25 = vsel %vm2002_vm13, %v1997_v35, %v1874_v27 }
 0x49c   : > { %v1906_v46 = vpop.permute.xlu0 %1905 }
 0x49d   : > { %v2046_v54 = vsel %vm2036_vm15, %v2029_v62, %v1906_v46 }
 0x49e   : > { %v1891_v5 = vpop.permute.xlu1 %1890 }
 0x49f   : > { %v2031_v59 = vsel %vm2019_vm14, %v2014_v25, %v1891_v5 }
 0x4a0   : > { %v1923_v34 = vpop.permute.xlu0 %1922 }
 0x4a1   : > { %v2063_v21 = vsel %vm2053_vm0, %v2046_v54, %v1923_v34 }
 0x4a2   : > { %v1908_v52 = vpop.permute.xlu1 %1907  ;;  %2816 = vmatprep.mubr.msk.bf16.mxu1 %vm2113_vm1, %v2063_v21 }
 0x4a3   : > { %v2048_v41 = vsel %vm2036_vm15, %v2031_v59, %v1908_v52 }
 0x4a4   : > { %v1925_v4 = vpop.permute.xlu0 %1924 }
 0x4a5   : > { %v2065_v3 = vsel %vm2053_vm0, %v2048_v41, %v1925_v4 }
 0x4a6   : > { %v1794_v9 = vpop.permute.xlu1 %1793  ;;  %2817 = vmatmul.mubr.msk.bf16.gmra.mrb[16].mxu1 %vm2113_vm1, %v2065_v3 }
 0x4a7   : > { %v1950_v39 = vsel %vm1239_vm4, %v5006_v57, %v1794_v9 }
 0x4a8   : > { %v1818_v43 = vpop.permute.xlu0 %1817 }
 0x4a9   : > { %v1967_v58 = vsel %vm1281_vm6, %v1950_v39, %v1818_v43 }
 0x4aa   : > { %v1796_v6 = vpop.permute.xlu1 %1795 }
 0x4ab   : > { %v1953_v51 = vsel %vm1239_vm4, %v5045_v7, %v1796_v6 }
 0x4ac   : > { %v1842_v53 = vpop.permute.xlu0 %1841 }
 0x4ad   : > { %v1983_v31 = vsel %vm1323_vm8, %v1967_v58, %v1842_v53 }
 0x4ae   : > { %v1820_v13 = vpop.permute.xlu1 %1819 }
 0x4af   : > { %v1969_v57 = vsel %vm1281_vm6, %v1953_v51, %v1820_v13 }
 0x4b0   : > { %v1859_v60 = vpop.permute.xlu0 %1858 }
 0x4b1   : > { %v1999_v16 = vsel %vm1365_vm10, %v1983_v31, %v1859_v60 }
 0x4b2   : > { %v1844_v15 = vpop.permute.xlu1 %1843 }
 0x4b3   : > { %v1985_v37 = vsel %vm1323_vm8, %v1969_v57, %v1844_v15 }
 0x4b4   : > { %v1876_v14 = vpop.permute.xlu0 %1875 }
 0x4b5   : > { %v2016_v0 = vsel %vm2002_vm13, %v1999_v16, %v1876_v14 }
 0x4b6   : > { %v1861_v1 = vpop.permute.xlu1 %1860 }
 0x4b7   : > { %v2001_v18 = vsel %vm1365_vm10, %v1985_v37, %v1861_v1 }
 0x4b8   : > { %v1893_v42 = vpop.permute.xlu0 %1892 }
 0x4b9   : > { %v2033_v29 = vsel %vm2019_vm14, %v2016_v0, %v1893_v42 }
 0x4ba   : > { %v1878_v47 = vpop.permute.xlu1 %1877 }
 0x4bb   : > { %v2018_v50 = vsel %vm2002_vm13, %v2001_v18, %v1878_v47 }
 0x4bc   : > { %v1910_v33 = vpop.permute.xlu0 %1909 }
 0x4bd   : > { %v2050_v63 = vsel %vm2036_vm15, %v2033_v29, %v1910_v33 }
 0x4be   : > { %v1895_v11 = vpop.permute.xlu1 %1894 }
 0x4bf   : > { %v2035_v19 = vsel %vm2019_vm14, %v2018_v50, %v1895_v11 }
 0x4c0   : > { %v1927_v26 = vpop.permute.xlu0 %1926 }
 0x4c1   : > { %v2067_v28 = vsel %vm2053_vm0, %v2050_v63, %v1927_v26 }
 0x4c2   : > { %v1912_v36 = vpop.permute.xlu1 %1911  ;;  %2820 = vmatprep.mubr.msk.bf16.mxu1 %vm2113_vm1, %v2067_v28 }
 0x4c3   : > { %v2052_v7 = vsel %vm2036_vm15, %v2035_v19, %v1912_v36 }
 0x4c6   : > { %v1929_v8 = vpop.permute.xlu1 %1928 }
 0x4c7   : > { %v2069_v49 = vsel %vm2053_vm0, %v2052_v7, %v1929_v8 }
 0x4c8   : > { %2821 = vmatmul.mubr.msk.bf16.gmra.mrb[20].mxu1 %vm2113_vm1, %v2069_v49 }
 0x4cd   : > { %v2828_v38 = vpop.f32.mrb[12].mxu0 }
 0x4ce   : > { %v2379_v2 = vpop.f32.mrb[13].mxu0 }
 0x4cf   : > { %v2829_v61 = vpop.f32.mrb[14].mxu0 }
 0x4d0   : > { %v2382_v40 = vpop.f32.mrb[15].mxu0 }
 0x4d5   : > { %v2832_v45 = vpop.f32.mrb[16].mxu0 }
 0x4d6   : > { %v2395_v48 = vpop.f32.mrb[17].mxu0 }
 0x4d7   : > { %v2833_v30 = vpop.f32.mrb[18].mxu0 }
 0x4d8   : > { %v2398_v55 = vpop.f32.mrb[19].mxu0 }
 0x4dd   : > { %v2836_v17 = vpop.f32.mrb[20].mxu0 }
 0x4de   : > { %v2411_v12 = vpop.f32.mrb[21].mxu0 }
 0x4df   : > { %v2837_v22 = vpop.f32.mrb[22].mxu0 }
 0x4e0   : > { %v5200_v27 = vpop.f32.mrb[23].mxu0 }
 0x513   : > { %v5202_v44 = vpop.f32.mrb[24].mxu0 }
 0x514   : > { %v5204_v56 = vpop.f32.mrb[25].mxu0 }
 0x515   : > { %v5206_v46 = vpop.f32.mrb[26].mxu0 }
 0x516   : > { %v5208_v20 = vpop.f32.mrb[27].mxu0 }
 0x539   : > { %v2810_v24 = vpop.f32.mrb[8].mxu1 }
 0x53a   : > { %v2177_v5 = vadd.f32 %v2810_v24, %v5210_v10  ;;  %v2168_v32 = vpop.f32.mrb[9].mxu1 }
 0x53b   : > { %v2169_v62 = vadd.f32 %v5210_v10, %v2168_v32  ;;  %v2811_v23 = vpop.f32.mrb[10].mxu1 }
 0x53c   : > { %v2233_v54 = vmax.f32 %v2177_v5, 0.0  ;;  %v2180_v34 = vadd.f32 %v2811_v23, %v5210_v10  ;;  %v2171_v35 = vpop.f32.mrb[11].mxu1 }
 0x53d   : > { %v2231_v21 = vmax.f32 %v2169_v62, 0.0  ;;  %v2172_v25 = vadd.f32 %v5210_v10, %v2171_v35 }
 0x53e   : > { %v2234_v52 = vmax.f32 %v2180_v34, 0.0  ;;  %v2444_v59 = vadd.f32 %v2828_v38, %v2233_v54 }
 0x53f   : > { %v2232_v41 = vmax.f32 %v2172_v25, 0.0  ;;  %v2442_v4 = vadd.f32 %v2379_v2, %v2231_v21 }
 0x540   : > { %2460 = vst.msk [vmem:[%s4770_s10 + $0x10] sm:$0xff] %vm1239_vm4, %v2444_v59  ;;  %v2445_v3 = vadd.f32 %v2829_v61, %v2234_v52 }
 0x541   : > { %2458 = vst.msk [vmem:[%s4770_s10] sm:$0xff] %vm1239_vm4, %v2442_v4  ;;  %v2443_v9 = vadd.f32 %v2382_v40, %v2232_v41 }
 0x542   : > { %2461 = vst.msk [vmem:[%s4770_s10 + $0x18] sm:$0xff] %vm1239_vm4, %v2445_v3 }
 0x543   : > { %2459 = vst.msk [vmem:[%s4770_s10 + $0x8] sm:$0xff] %vm1239_vm4, %v2443_v9 }
 0x559   : > { %v2814_v43 = vpop.f32.mrb[12].mxu1 }
 0x55a   : > { %v2193_v6 = vadd.f32 %v2814_v43, %v5210_v10  ;;  %v2184_v53 = vpop.f32.mrb[13].mxu1 }
 0x55b   : > { %v2185_v13 = vadd.f32 %v5210_v10, %v2184_v53  ;;  %v2815_v60 = vpop.f32.mrb[14].mxu1 }
 0x55c   : > { %v2237_v15 = vmax.f32 %v2193_v6, 0.0  ;;  %v2196_v14 = vadd.f32 %v2815_v60, %v5210_v10  ;;  %v2187_v1 = vpop.f32.mrb[15].mxu1 }
 0x55d   : > { %v2235_v42 = vmax.f32 %v2185_v13, 0.0  ;;  %v2188_v39 = vadd.f32 %v5210_v10, %v2187_v1 }
 0x55e   : > { %v2238_v47 = vmax.f32 %v2196_v14, 0.0  ;;  %v2448_v58 = vadd.f32 %v2832_v45, %v2237_v15 }
 0x55f   : > { %v2236_v31 = vmax.f32 %v2188_v39, 0.0  ;;  %v2446_v33 = vadd.f32 %v2395_v48, %v2235_v42 }
 0x560   : > { %2464 = vst.msk [vmem:[%s4770_s10 + $0x30] sm:$0xff] %vm1239_vm4, %v2448_v58  ;;  %v2449_v16 = vadd.f32 %v2833_v30, %v2238_v47 }
 0x561   : > { %2462 = vst.msk [vmem:[%s4770_s10 + $0x20] sm:$0xff] %vm1239_vm4, %v2446_v33  ;;  %v2447_v0 = vadd.f32 %v2398_v55, %v2236_v31 }
 0x562   : > { %2465 = vst.msk [vmem:[%s4770_s10 + $0x38] sm:$0xff] %vm1239_vm4, %v2449_v16 }
 0x563   : > { %2463 = vst.msk [vmem:[%s4770_s10 + $0x28] sm:$0xff] %vm1239_vm4, %v2447_v0 }
 0x579   : > { %v2818_v11 = vpop.f32.mrb[16].mxu1 }
 0x57a   : > { %v2209_v29 = vadd.f32 %v2818_v11, %v5210_v10  ;;  %v2200_v51 = vpop.f32.mrb[17].mxu1 }
 0x57b   : > { %v2201_v63 = vadd.f32 %v5210_v10, %v2200_v51  ;;  %v2819_v26 = vpop.f32.mrb[18].mxu1 }
 0x57c   : > { %v2241_v57 = vmax.f32 %v2209_v29, 0.0  ;;  %v2212_v28 = vadd.f32 %v2819_v26, %v5210_v10  ;;  %v2203_v37 = vpop.f32.mrb[19].mxu1 }
 0x57d   : > { %v2239_v36 = vmax.f32 %v2201_v63, 0.0  ;;  %v2204_v18 = vadd.f32 %v5210_v10, %v2203_v37 }
 0x57e   : > { %v2242_v50 = vmax.f32 %v2212_v28, 0.0  ;;  %v2452_v19 = vadd.f32 %v2836_v17, %v2241_v57 }
 0x57f   : > { %v2240_v7 = vmax.f32 %v2204_v18, 0.0  ;;  %v2450_v8 = vadd.f32 %v2411_v12, %v2239_v36 }
 0x580   : > { %2468 = vst.msk [vmem:[%s4770_s10 + $0x50] sm:$0xff] %vm1239_vm4, %v2452_v19  ;;  %v2453_v49 = vadd.f32 %v2837_v22, %v2242_v50 }
 0x581   : > { %2466 = vst.msk [vmem:[%s4770_s10 + $0x40] sm:$0xff] %vm1239_vm4, %v2450_v8  ;;  %v2451_v38 = vadd.f32 %v5200_v27, %v2240_v7 }
 0x582   : > { %2469 = vst.msk [vmem:[%s4770_s10 + $0x58] sm:$0xff] %vm1239_vm4, %v2453_v49 }
 0x583   : > { %2467 = vst.msk [vmem:[%s4770_s10 + $0x48] sm:$0xff] %vm1239_vm4, %v2451_v38 }
 0x59b   : > { %v2822_v2 = vpop.f32.mrb[20].mxu1 }
 0x59c   : > { %v2225_v61 = vadd.f32 %v2822_v2, %v5210_v10  ;;  %v2216_v40 = vpop.f32.mrb[21].mxu1 }
 0x59d   : > { %v2217_v45 = vadd.f32 %v5210_v10, %v2216_v40  ;;  %v2823_v48 = vpop.f32.mrb[22].mxu1 }
 0x59e   : > { %v2245_v30 = vmax.f32 %v2225_v61, 0.0  ;;  %v2228_v55 = vadd.f32 %v2823_v48, %v5210_v10  ;;  %v2219_v17 = vpop.f32.mrb[23].mxu1 }
 0x59f   : > { %v2243_v12 = vmax.f32 %v2217_v45, 0.0  ;;  %v2220_v22 = vadd.f32 %v5210_v10, %v2219_v17 }
 0x5a0   : > { %v2456_v27 = vadd.f32 %v5202_v44, %v2245_v30  ;;  %v2246_v24 = vmax.f32 %v2228_v55, 0.0 }
 0x5a1   : > { %v2454_v5 = vadd.f32 %v5204_v56, %v2243_v12  ;;  %v2244_v32 = vmax.f32 %v2220_v22, 0.0 }
 0x5a2   : > { %2472 = vst.msk [vmem:[%s4770_s10 + $0x70] sm:$0xff] %vm1239_vm4, %v2456_v27  ;;  %v2457_v62 = vadd.f32 %v5206_v46, %v2246_v24 }
 0x5a3   : > { %2470 = vst.msk [vmem:[%s4770_s10 + $0x60] sm:$0xff] %vm1239_vm4, %v2454_v5  ;;  %v2455_v10 = vadd.f32 %v5208_v20, %v2244_v32 }
 0x5a4   : > { %2473 = vst.msk [vmem:[%s4770_s10 + $0x78] sm:$0xff] %vm1239_vm4, %v2457_v62 }
 0x5a5   : > { %2471 = vst.msk [vmem:[%s4770_s10 + $0x68] sm:$0xff] %vm1239_vm4, %v2455_v10 }
 0x5a6   : > { %3373 = shalt.err (!%p3370_p4)
}
 0x5a7   : > { %s3374_s16 = scalar_lea.hbm %s5264_s26, 2048  ;;  %s3378_s1 = scalar_lea.hbm %s5567_s4, 8192 }
 0x5a8   : > { %p3375_p6 = scmp.ne.s32.totalorder %s5264_s26, %s3374_s16  ;;  %p3379_p10 = scmp.lt.u32.totalorder %s5264_s26, %s5567_s4 }
 0x5a9   : > { %p3380_p0 = scmp.lt.u32.totalorder %s3378_s1, %s3374_s16  ;;  %p3382_p5 = scmp.lt.u32.totalorder %s3374_s16, %s5264_s26 }
 0x5aa   : > { %p3376_p8 = pnand %p3375_p6, %p5568_p2 }
 0x5ab   : > { %p3381_p3 = por %p3380_p0, %p3379_p10 }
 0x5ac   : > { %p3377_p12 = pneg %p3376_p8 }
 0x5ad   : > { %p3383_p9 = por %p3382_p5, %p3381_p3 }
 0x5af   : > { %p3384_p7 = pnand %p3383_p9, %p3377_p12 }
 0x5b1   : > { %3387 = shalt.err (!%p3384_p7)
}
 0x5b2   : > { %s3534_s28 = smov 128  }
 0x5b3   : > { %2893 = dma.vmem_to_hbm [thread:$0]  (%p5568_p2), %s5269_s12, 2048, %s5264_s26, %s5277_s11, %s3534_s28, %s3534_s28, %s3522_s30  }
 0x5b4 PF: > { %s5569_s24 = sld [smem:[#allocation28_spill]]  ;;  %p2950_p1 = scmp.ge.s32.totalorder %s3502_s23, 2 }
 0x5b5   : > { %p5570_p11 = scmp.ne.s32.totalorder %s5450_s19, 0 }
 0x5b7   : > { %p2928_p13 = pnand %p2950_p1, %p5570_p11 }
 0x5ba   : > { %s2505_s15 = sand.u32 1, %s5569_s24  }
 0x5bb   : > { %s2506_s16 = scalar_lea.sflag [#allocation5], %s2505_s15 }
 0x5bc   : > { %3457 = dma.done.wait (!%p2928_p13), %s2506_s16, 2048  }
 0x5bd   : > { %3459 = vsyncadd (!%p2928_p13), %s2506_s16, 4294965248  ;;  %s31_s23 = sadd.s32 1, %s3502_s23   ;;  %s5571_s20 = sld [smem:[#allocation29_spill]] }
 0x5be   : > { %p28_p4 = scmp.ge.s32.totalorder %s31_s23, 6   ;;  %s5572_s10 = sld [smem:[#allocation30_spill]] }
 0x5bf   : > { %s5573_s25 = smov %s5592_s14  ;;  %s5574_s30 = smov %s5590_s13 }
 0x5c0   : > { %s5577_s15 = smov %s5573_s25  ;;  %s5578_s16 = smov %s3478_s17 }
 0x5c1   : > { %s5579_s17 = smov %s3482_s18  ;;  %s5580_s18 = smov %s3897_s3 }
 0x5c2   : > { %s5581_s19 = smov %s3494_s21  ;;  %s5583_s21 = smov %s5586_s29 }
 0x5c3   : > { %s5575_s13 = smov %s5571_s20  ;;  %s5582_s20 = smov %s3498_s22 }
 0x5c4   : > { %s5576_s14 = smov %s5572_s10  ;;  %s5584_s22 = smov %s5574_s30 }
 0x5c5   :  { %30 = sbr.rel (!%p28_p4) target bundleno = 21 (0x15), region = 150 }
 0x5cc   :  { %2511 = vsyncpa [#allocation4], 1 }
 0x5cd   :  { %2513 = vsyncpa [#allocation4 + $0x1], 1 }
 0x5ce   :  { %2514 = vsyncpa [#allocation7], 1 }
 0x5cf   :  { %2515 = vsyncpa [#allocation10], 1 }
 0x5d0   :  { %2516 = vsyncpa [#allocation13], 1 }
 0x5d1   :  { %2517 = vsyncpa [#allocation16], 1 }
 0x5d2   :  { %2518 = vsyncpa [#allocation19], 1 }
 0x5d3   :  { %2519 = vsyncpa [#allocation5], 1 }
 0x5d4   :  { %2521 = vsyncpa [#allocation5 + $0x1], 1 }

// kernel: conv_block_pallas.3
= control target key start
LH: loop header
LB: loop body
LE: loop exit
PB: predicated region body
PF: predicated region fallthrough
CT: control target
= control target key end

     0   :  { %s4589_s0 = inlined_call_operand.hbm [shape: f32[2,320,8], index: 0, kind: input, shape index: {}]   ;;  %s4590_s1 = inlined_call_operand.hbm [shape: bf16[72,8], index: 1, kind: input, shape index: {}]   ;;  %s4591_s2 = inlined_call_operand.hbm [shape: f32[1,8], index: 2, kind: input, shape index: {}]   ;;  %s4592_s3 = inlined_call_operand.hbm [shape: bf16[72,8], index: 3, kind: input, shape index: {}]   ;;  %s4593_s4 = inlined_call_operand.hbm [shape: f32[1,8], index: 4, kind: input, shape index: {}]   ;;  %s4594_s5 = inlined_call_operand.hbm [shape: f32[192,1], index: 5, kind: input, shape index: {}]   ;;  %s4595_s6 = inlined_call_operand.hbm [shape: f32[192,1], index: 6, kind: input, shape index: {}]   ;;  %s4596_s7 = inlined_call_operand.hbm [shape: f32[2,256,8], index: 7, kind: output, shape index: {}]  }
   0x1   :  { %4655 = sst [smem:[#allocation71_spill]] %s4589_s0 }
   0x2   :  { %4656 = sst [smem:[#allocation72_spill]] %s4590_s1 }
   0x3   :  { %4657 = sst [smem:[#allocation73_spill]] %s4591_s2 }
   0x4   :  { %4658 = sst [smem:[#allocation74_spill]] %s4592_s3 }
   0x5   :  { %4659 = sst [smem:[#allocation75_spill]] %s4593_s4 }
   0x6   :  { %4660 = sst [smem:[#allocation76_spill]] %s4596_s7 }
   0x7   :  { %12 = vsyncpa [#allocation4], 0 }
   0x8   :  { %14 = vsyncpa [#allocation4 + $0x1], 0 }
   0x9   :  { %15 = vsyncpa [#allocation7], 0 }
   0xa   :  { %16 = vsyncpa [#allocation10], 0 }
   0xb   :  { %17 = vsyncpa [#allocation13], 0 }
   0xc   :  { %18 = vsyncpa [#allocation5], 0 }
   0xd   :  { %20 = vsyncpa [#allocation5 + $0x1], 0  ;;  %s3068_s24 = smov 0   ;;  %s3070_s25 = smov 0  }
   0xe   :  { %s3072_s26 = smov 0   ;;  %s3074_s27 = smov 0  }
   0xf   :  { %s3076_s28 = smov 0   ;;  %s3078_s29 = smov 0  }
  0x10   :  { %s3080_s30 = smov 0   ;;  %s3082_s8 = smov 0  }
  0x11   :  { %s3084_s9 = smov 0   ;;  %s3086_s10 = smov 0  }
  0x12   :  { %s3088_s11 = smov 0  }
  0x13 LB: > { %4661 = sst [smem:[#allocation21_spill]] %s2962_s24  ;;  %s2332_s12 = sadd.s32 4294967295, %s3002_s11   ;;  %s3002_s11 = sphi %s3088_s11, %s26_s11   ;;  %s2998_s10 = sphi %s3086_s10, %s4801_s10   ;;  %s2994_s9 = sphi %s3084_s9, %s4800_s9   ;;  %s2990_s8 = sphi %s3082_s8, %s4799_s8   ;;  %s2986_s30 = sphi %s3080_s30, %s4798_s30   ;;  %s2982_s29 = sphi %s3078_s29, %s4797_s29   ;;  %s2978_s28 = sphi %s3076_s28, %s4796_s28   ;;  %s2974_s27 = sphi %s3074_s27, %s4795_s27   ;;  %s2970_s26 = sphi %s3072_s26, %s4794_s26   ;;  %s2966_s25 = sphi %s3070_s25, %s4793_s25   ;;  %s2962_s24 = sphi %s3068_s24, %s4792_s24  }
  0x14   : > { %4662 = sst [smem:[#allocation22_spill]] %s2986_s30  ;;  %p2334_p0 = scmp.ge.s32.totalorder %s3002_s11, 1 }
  0x15   : > { %4663 = sst [smem:[#allocation23_spill]] %s2990_s8  ;;  %p3125_p1 = scmp.eq.s32.totalorder %s2332_s12, 0 }
  0x16   : > { %p3129_p2 = scmp.eq.s32.totalorder %s2332_s12, 3  ;;  %p223_p3 = scmp.lt.s32.totalorder %s3002_s11, 5 }
  0x17   : > { %s4664_s13 = scalar_select %p3125_p1, 1, 0 }
  0x18   : > { %s4665_s14 = scalar_select %p3129_p2, 1, 0 }
  0x19   : > { %p3134_p4 = pnand %p2334_p0, %p223_p3  ;;  %s3004_s16 = smov [#allocation6]  }
  0x1a   : > { %4666 = sst [smem:[#allocation24_spill]] %s4665_s14  ;;  %s235_s17 = sshll.u32 %s3004_s16, 4  ;;  %s3138_s17 = int_to_ptr.vmem [resolvable:$true] %s235_s17 }
  0x1b   : > { %s4667_s15 = scalar_select %p3134_p4, 1, 0 }
  0x1c   : > { %p2507_p5 = pneg %p3134_p4  ;;  %s3005_s19 = smov [#allocation9]  }
  0x1d   : > { %4668 = sst [smem:[#allocation25_spill]] %s4667_s15  ;;  %s259_s20 = sshll.u32 %s3005_s19, 4  ;;  %s3148_s20 = int_to_ptr.vmem [resolvable:$true] %s259_s20 }
  0x1e   : > { %p3144_p6 = pnand %p2507_p5, %p3125_p1  ;;  %s3006_s21 = smov [#allocation12]  }
  0x1f   : > { %s283_s22 = sshll.u32 %s3006_s21, 4  ;;  %s4670_s1 = sld [smem:[#allocation72_spill]]  ;;  %s3150_s22 = int_to_ptr.vmem [resolvable:$true] %s283_s22 }
  0x20   : > { %p3160_p8 = pneg %p3144_p6 }
  0x25   : > { %s2670_s16 = scalar_lea.hbm %s4670_s1, 576 }
  0x26   : > { %p2671_p7 = scmp.ne.s32.totalorder %s4670_s1, %s2670_s16  ;;  %p2677_p11 = scmp.lt.u32.totalorder %s2670_s16, %s4670_s1 }
  0x28   : > { %p2673_p9 = pnand %p3160_p8, %p2671_p7 }
  0x2a   : > { %p2674_p10 = pneg %p2673_p9 }
  0x2c   : > { %p2679_p12 = pnand %p2677_p11, %p2674_p10 }
  0x2e   : > { %2682 = shalt.err (!%p2679_p12)
}
  0x2f   : > { %s2683_s7 = scalar_lea.vmem %s3138_s17, 576  ;;  %p2691_p5 = scmp.lt.s32.totalorder %s3138_s17, %s3138_s17 }
  0x30   : > { %p2684_p13 = scmp.ne.s32.totalorder %s3138_s17, %s2683_s7  ;;  %p2692_p4 = scmp.lt.s32.totalorder %s2683_s7, %s2683_s7 }
  0x32   : > { %p2686_p0 = pnand %p2684_p13, %p3160_p8  ;;  %p2693_p7 = por %p2692_p4, %p2691_p5 }
  0x34   : > { %p2687_p3 = pneg %p2686_p0 }
  0x36   : > { %p2694_p9 = pnand %p2693_p7, %p2687_p3 }
  0x38   : > { %2697 = shalt.err (!%p2694_p9)
}
  0x39   : > { %s3007_s8 = smov 64   ;;  %s3008_s23 = smov 4  }
  0x3a   : > { %2510 = dma.hbm_to_vmem [thread:$0]  (!%p3144_p6), %s4670_s1, 576, %s3138_s17, [#allocation7], %s3007_s8, %s3007_s8, %s3008_s23  }
  0x3b   : > { %s4672_s3 = sld [smem:[#allocation74_spill]] }
  0x41   : > { %s2698_s15 = scalar_lea.hbm %s4672_s3, 576 }
  0x42   : > { %p2699_p4 = scmp.ne.s32.totalorder %s4672_s3, %s2698_s15  ;;  %p2705_p12 = scmp.lt.u32.totalorder %s2698_s15, %s4672_s3 }
  0x44   : > { %p2701_p10 = pnand %p2699_p4, %p3160_p8 }
  0x46   : > { %p2702_p11 = pneg %p2701_p10 }
  0x48   : > { %p2707_p13 = pnand %p2705_p12, %p2702_p11 }
  0x4a   : > { %2710 = shalt.err (!%p2707_p13)
}
  0x4b   : > { %s2711_s17 = scalar_lea.vmem %s3148_s20, 576  ;;  %p2719_p7 = scmp.lt.s32.totalorder %s3148_s20, %s3148_s20 }
  0x4c   : > { %p2712_p0 = scmp.ne.s32.totalorder %s3148_s20, %s2711_s17  ;;  %p2720_p9 = scmp.lt.s32.totalorder %s2711_s17, %s2711_s17 }
  0x4e   : > { %p2714_p3 = pnand %p2712_p0, %p3160_p8  ;;  %p2721_p4 = por %p2720_p9, %p2719_p7 }
  0x50   : > { %p2715_p5 = pneg %p2714_p3 }
  0x52   : > { %p2722_p10 = pnand %p2721_p4, %p2715_p5 }
  0x54   : > { %2725 = shalt.err (!%p2722_p10)
}
  0x55   : > { %2516 = dma.hbm_to_vmem [thread:$0]  (!%p3144_p6), %s4672_s3, 576, %s3148_s20, [#allocation10], %s3007_s8, %s3007_s8, %s3008_s23  }
  0x56   : > { %s2726_s12 = scalar_lea.hbm %s4594_s5, 3072 }
  0x57   : > { %p2727_p11 = scmp.ne.s32.totalorder %s4594_s5, %s2726_s12  ;;  %p2733_p0 = scmp.lt.u32.totalorder %s2726_s12, %s4594_s5 }
  0x59   : > { %p2729_p12 = pnand %p2727_p11, %p3160_p8 }
  0x5b   : > { %p2730_p13 = pneg %p2729_p12 }
  0x5d   : > { %p2735_p3 = pnand %p2733_p0, %p2730_p13 }
  0x5f   : > { %2738 = shalt.err (!%p2735_p3)
}
  0x60   : > { %s2739_s20 = scalar_lea.vmem %s3150_s22, 3072  ;;  %p2747_p4 = scmp.lt.s32.totalorder %s3150_s22, %s3150_s22 }
  0x61   : > { %p2740_p5 = scmp.ne.s32.totalorder %s3150_s22, %s2739_s20  ;;  %p2748_p10 = scmp.lt.s32.totalorder %s2739_s20, %s2739_s20 }
  0x63   : > { %p2742_p7 = pnand %p2740_p5, %p3160_p8  ;;  %p2749_p11 = por %p2748_p10, %p2747_p4 }
  0x65   : > { %p2743_p9 = pneg %p2742_p7 }
  0x67   : > { %p2750_p12 = pnand %p2749_p11, %p2743_p9 }
  0x69   : > { %2753 = shalt.err (!%p2750_p12)
}
  0x6a   : > { %s4605_s8 = smov 128   ;;  %s4606_s23 = smov 8  }
  0x6b   : > { %2522 = dma.hbm_to_vmem [thread:$0]  (!%p3144_p6), %s4594_s5, 3072, %s3150_s22, [#allocation13], %s4605_s8, %s4605_s8, %s4606_s23  }
  0x6c   : > { %s3011_s24 = smov [#allocation8]   ;;  %s3012_s15 = smov [#allocation11]  }
  0x6d   : > { %s249_s14 = sshll.u32 %s3011_s24, 4  ;;  %s273_s12 = sshll.u32 %s3012_s15, 4  ;;  %s250_s14 = int_to_ptr.vmem [resolvable:$true] %s249_s14  ;;  %s3230_s12 = int_to_ptr.vmem [resolvable:$true] %s273_s12 }
  0x6e   : > { %s4673_s2 = sld [smem:[#allocation73_spill]] }
  0x74   : > { %s2754_s21 = scalar_lea.hbm %s4673_s2, 16 }
  0x75   : > { %p2755_p13 = scmp.ne.s32.totalorder %s4673_s2, %s2754_s21  ;;  %p2761_p5 = scmp.lt.u32.totalorder %s2754_s21, %s4673_s2 }
  0x77   : > { %p2757_p0 = pnand %p2755_p13, %p3160_p8 }
  0x79   : > { %p2758_p3 = pneg %p2757_p0 }
  0x7b   : > { %p2763_p7 = pnand %p2761_p5, %p2758_p3 }
  0x7d   : > { %2766 = shalt.err (!%p2763_p7)
}
  0x7e   : > { %s2767_s0 = scalar_lea.vmem %s250_s14, 16  ;;  %s2774_s24 = scalar_lea.vmem %s250_s14, 32 }
  0x7f   : > { %p2768_p9 = scmp.ne.s32.totalorder %s250_s14, %s2767_s0  ;;  %p2775_p11 = scmp.lt.s32.totalorder %s250_s14, %s250_s14 }
  0x80   : > { %p2776_p12 = scmp.lt.s32.totalorder %s2774_s24, %s2767_s0 }
  0x81   : > { %p2770_p4 = pnand %p2768_p9, %p3160_p8 }
  0x82   : > { %p2777_p2 = por %p2776_p12, %p2775_p11 }
  0x83   : > { %p2771_p10 = pneg %p2770_p4 }
  0x85   : > { %p2778_p1 = pnand %p2777_p2, %p2771_p10 }
  0x87   : > { %2781 = shalt.err (!%p2778_p1)
}
  0x88   : > { %2513 = dma.hbm_to_vmem [thread:$0]  (!%p3144_p6), %s4673_s2, 16, %s250_s14, [#allocation7]  }
  0x89   : > { %s4674_s4 = sld [smem:[#allocation75_spill]] }
  0x8f   : > { %s2782_s7 = scalar_lea.hbm %s4674_s4, 16 }
  0x90   : > { %p2783_p13 = scmp.ne.s32.totalorder %s4674_s4, %s2782_s7  ;;  %p2789_p1 = scmp.lt.u32.totalorder %s2782_s7, %s4674_s4 }
  0x92   : > { %p2785_p0 = pnand %p2783_p13, %p3160_p8 }
  0x94   : > { %p2786_p3 = pneg %p2785_p0 }
  0x96   : > { %p2791_p2 = pnand %p2789_p1, %p2786_p3 }
  0x98   : > { %2794 = shalt.err (!%p2791_p2)
}
  0x99   : > { %s2795_s14 = scalar_lea.vmem %s3230_s12, 16  ;;  %s2802_s24 = scalar_lea.vmem %s3230_s12, 32 }
  0x9a   : > { %p2796_p5 = scmp.ne.s32.totalorder %s3230_s12, %s2795_s14  ;;  %p2803_p4 = scmp.lt.s32.totalorder %s3230_s12, %s3230_s12 }
  0x9b   : > { %p2804_p10 = scmp.lt.s32.totalorder %s2802_s24, %s2795_s14 }
  0x9c   : > { %p2798_p7 = pnand %p2796_p5, %p3160_p8 }
  0x9d   : > { %p2805_p11 = por %p2804_p10, %p2803_p4 }
  0x9e   : > { %p2799_p9 = pneg %p2798_p7 }
  0xa0   : > { %p2806_p12 = pnand %p2805_p11, %p2799_p9 }
  0xa2   : > { %2809 = shalt.err (!%p2806_p12)
}
  0xa3   : > { %2519 = dma.hbm_to_vmem [thread:$0]  (!%p3144_p6), %s4674_s4, 16, %s3230_s12, [#allocation10]  }
  0xa4   : > { %s3013_s19 = smov [#allocation14]   ;;  %s2810_s17 = scalar_lea.hbm %s4595_s6, 3072 }
  0xa5   : > { %s296_s21 = sshll.u32 %s3013_s19, 4  ;;  %p2811_p13 = scmp.ne.s32.totalorder %s4595_s6, %s2810_s17  ;;  %s297_s21 = int_to_ptr.vmem [resolvable:$true] %s296_s21 }
  0xa6   : > { %p2817_p1 = scmp.lt.u32.totalorder %s2810_s17, %s4595_s6 }
  0xa7   : > { %p2813_p0 = pnand %p2811_p13, %p3160_p8 }
  0xa9   : > { %p2814_p3 = pneg %p2813_p0 }
  0xab   : > { %p2819_p2 = pnand %p2817_p1, %p2814_p3 }
  0xad   : > { %2822 = shalt.err (!%p2819_p2)
}
  0xae   : > { %s2823_s12 = scalar_lea.vmem %s297_s21, 3072  ;;  %p2831_p4 = scmp.lt.s32.totalorder %s297_s21, %s297_s21 }
  0xaf   : > { %p2824_p5 = scmp.ne.s32.totalorder %s297_s21, %s2823_s12  ;;  %p2832_p10 = scmp.lt.s32.totalorder %s2823_s12, %s2823_s12 }
  0xb1   : > { %p2826_p7 = pnand %p2824_p5, %p3160_p8  ;;  %p2833_p11 = por %p2832_p10, %p2831_p4 }
  0xb3   : > { %p2827_p9 = pneg %p2826_p7 }
  0xb5   : > { %p2834_p12 = pnand %p2833_p11, %p2827_p9 }
  0xb7   : > { %2837 = shalt.err (!%p2834_p12)
}
  0xb8   : > { %2525 = dma.hbm_to_vmem [thread:$0]  (!%p3144_p6), %s4595_s6, 3072, %s297_s21, [#allocation13], %s4605_s8, %s4605_s8, %s4606_s23  }
  0xb9   : > { %s2333_s30 = sadd.s32 4294967294, %s3002_s11   ;;  %s35_s18 = sadd.s32 1, %s2994_s9 }
  0xba   : > { %s4675_s19 = sld [smem:[#allocation21_spill]]  ;;  %s38_s7 = sadd.s32 1, %s2998_s10 }
  0xbb   : > { %p36_p8 = scmp.ge.s32.totalorder %s35_s18, 2  ;;  %s45_s20 = sadd.s32 1, %s2982_s29 }
  0xbc   : > { %p52_p13 = scmp.ne.s32.totalorder %s2982_s29, %s2978_s28  ;;  %p53_p0 = scmp.eq.s32.totalorder %s3002_s11, 0 }
  0xbd   : > { %s4803_s18 = smov (%p36_p8, %s35_s18), 0  ;;  %s4676_s17 = sld [smem:[#allocation24_spill]] }
  0xbe   : > { %s4805_s7 = smov (!%p36_p8, %s38_s7), %s2998_s10  ;;  %p3305_p3 = por %p53_p0, %p52_p13 }
  0xbf   : > { %p58_p6 = scmp.ne.s32.totalorder %s2978_s28, %s2974_s27  ;;  %p40_p1 = scmp.ge.s32.totalorder %s4805_s7, 2 }
  0xc0   : > { %s195_s22 = ssub.s32 %s2994_s9, %s4803_s18  ;;  %p4678_p2 = scmp.ne.s32.totalorder %s4664_s13, 0 }
  0xc1   : > { %s199_s14 = sadd.s32 1, %s2970_s26  ;;  %s4807_s7 = smov (%p40_p1, %s4805_s7), 0 }
  0xc2   : > { %p3315_p5 = por %p4678_p2, %p58_p6  ;;  %p209_p7 = scmp.ne.s32.totalorder %s2970_s26, %s2966_s25 }
  0xc3   : > { %p215_p9 = scmp.ne.s32.totalorder %s2966_s25, %s4675_s19  ;;  %s42_s24 = ssub.s32 %s2998_s10, %s4807_s7 }
  0xc4   : > { %p216_p4 = scmp.eq.s32.totalorder %s2333_s30, 3  ;;  %p43_p10 = scmp.eq.s32.totalorder %s42_s24, 0 }
  0xc5   : > { %s196_s27 = sor.u32 %s195_s22, %s42_s24  ;;  %p4680_p12 = scmp.ne.s32.totalorder %s4676_s17, 0 }
  0xc6   : > { %p197_p11 = scmp.eq.s32.totalorder %s196_s27, 0  ;;  %p3340_p13 = por %p216_p4, %p215_p9 }
  0xc7   : > { %p3330_p8 = por %p4680_p12, %p209_p7  ;;  %p2540_p0 = scmp.lt.s32.totalorder %s3002_s11, 4 }
  0xc8   : > { %s3335_s15 = scalar_select %p43_p10, %s2982_s29, %s45_s20  }
  0xc9   : > { %s4681_s12 = scalar_select %p3330_p8, 1, 0 }
  0xca   : > { %s3338_s16 = scalar_select %p197_p11, %s2970_s26, %s199_s14  }
  0xcb   : > { %s4682_s8 = scalar_select %p3340_p13, 1, 0 }
  0xcc   : > { %s310_s19 = sand.u32 1, %s2982_s29   ;;  %s2477_s23 = smul.u32 5120, %s2998_s10 }
  0xcd   : > { %s2476_s30 = smul.u32 320, %s310_s19  ;;  %p3349_p6 = pnand %p2540_p0, %p3305_p3 }
  0xce   : > { %s4684_s27 = sld [smem:[#allocation71_spill]]  ;;  %s3360_s21 = scalar_lea.sflag [#allocation4], %s310_s19 }
  0xcf   : > { %s314_s14 = scalar_lea.vmem [#allocation3], %s2476_s30  ;;  %p2840_p1 = pneg %p3349_p6 }
  0xd0   : > { %s321_s2 = sshll.u32 %s314_s14, 4  ;;  %s3358_s2 = int_to_ptr.vmem [resolvable:$true] %s321_s2 }
  0xd4   : > { %s4685_s1 = smov %s4684_s27  ;;  %s3356_s20 = scalar_lea.hbm %s4684_s27, %s2477_s23 }
  0xd5   : > { %s2838_s3 = scalar_lea.hbm %s3356_s20, 5120  ;;  %s2843_s24 = scalar_lea.hbm %s4685_s1, 10240 }
  0xd6   : > { %p2839_p3 = scmp.ne.s32.totalorder %s3356_s20, %s2838_s3  ;;  %p2844_p9 = scmp.lt.u32.totalorder %s3356_s20, %s4685_s1 }
  0xd7   : > { %p2845_p4 = scmp.lt.u32.totalorder %s2843_s24, %s2838_s3  ;;  %p2847_p11 = scmp.lt.u32.totalorder %s2838_s3, %s3356_s20 }
  0xd8   : > { %p2841_p2 = pnand %p2840_p1, %p2839_p3 }
  0xd9   : > { %p2846_p10 = por %p2845_p4, %p2844_p9 }
  0xda   : > { %p2842_p7 = pneg %p2841_p2 }
  0xdb   : > { %p2848_p12 = por %p2847_p11, %p2846_p10 }
  0xdd   : > { %p2849_p0 = pnand %p2848_p12, %p2842_p7 }
  0xdf   : > { %2852 = shalt.err (!%p2849_p0)
}
  0xe0   : > { %s2853_s19 = scalar_lea.vmem %s3358_s2, 5120  ;;  %s3014_s30 = smov [#allocation3]  }
  0xe1   : > { %p2854_p3 = scmp.ne.s32.totalorder %s3358_s2, %s2853_s19  ;;  %s2858_s14 = sshll.u32 %s3014_s30, 4  ;;  %s2859_s14 = int_to_ptr.vmem [resolvable:$false] %s2858_s14 }
  0xe2   : > { %s2860_s4 = scalar_lea.vmem %s2859_s14, 10240  ;;  %p2861_p8 = scmp.lt.s32.totalorder %s3358_s2, %s2859_s14 }
  0xe3   : > { %p2856_p2 = pnand %p2854_p3, %p2840_p1  ;;  %p2862_p9 = scmp.lt.s32.totalorder %s2860_s4, %s2853_s19 }
  0xe5   : > { %p2857_p13 = pneg %p2856_p2  ;;  %p2863_p4 = por %p2862_p9, %p2861_p8 }
  0xe7   : > { %p2864_p10 = pnand %p2863_p4, %p2857_p13 }
  0xe9   : > { %2867 = shalt.err (!%p2864_p10)
}
  0xea   : > { %s4686_s3 = smov 8   ;;  %s4687_s23 = smov 128  }
  0xeb   : > { %2529 = dma.hbm_to_vmem [thread:$0]  (!%p3349_p6), %s3356_s20, 5120, %s3358_s2, %s3360_s21, %s4687_s23, %s4687_s23, %s4686_s3  }
  0xec   : > { %s4688_s17 = sld [smem:[#allocation25_spill]] }
  0xf2   : > { %p4689_p1 = scmp.ne.s32.totalorder %s4688_s17, 0 }
  0xf4   : > { %333 = sbr.rel (%p4689_p1) target bundleno = 1378 (0x562), region = 48 }
  0xfb   : > { %s335_s24 = sand.u32 1, %s2978_s28  }
  0xfc   : > { %s3394_s27 = smul.u32 320, %s335_s24  ;;  %s336_s19 = scalar_lea.sflag [#allocation4], %s335_s24 }
  0xfe   : > { %s339_s30 = scalar_lea.vmem [#allocation3], %s3394_s27 }
  0xff   : > { %2941 = dma.done.wait (%p3315_p5), %s336_s19, 5120  }
 0x100   : > { %2943 = vsyncadd (%p3315_p5), %s336_s19, 4294962176  ;;  %p4690_p8 = scmp.ne.s32.totalorder %s4664_s13, 0 }
 0x102   : > { %2945 = dma.done.wait (%p4690_p8), [#allocation7], 592  }
 0x103   : > { %2947 = vsyncadd (%p4690_p8), [#allocation7], 4294966704 }
 0x104   : > { %2949 = dma.done.wait (%p4690_p8), [#allocation10], 592  }
 0x105   : > { %2951 = vsyncadd (%p4690_p8), [#allocation10], 4294966704 }
 0x106   : > { %2953 = dma.done.wait (%p4690_p8), [#allocation13], 6144  }
 0x107   : > { %2955 = vsyncadd (%p4690_p8), [#allocation13], 4294961152  ;;  %v3015_v0 = vmov 0   ;;  %v446_v1 = vld [vmem:[#allocation14] sm:$0xff]  ;;  %v424_v2 = vld [vmem:[#allocation12 + $0x10] sm:$0xff]  ;;  %s4691_s2 = sld [smem:[#allocation22_spill]] }
 0x108   : > { %2659 = vset.pattern.permute.xlu1 %v3015_v0  ;;  %2658 = vset.pattern.permute.xlu0 %v3015_v0  ;;  %v447_v3 = vld [vmem:[#allocation14 + $0x8] sm:$0xff]  ;;  %v425_v4 = vld [vmem:[#allocation12 + $0x18] sm:$0xff]  ;;  %v448_v5 = vld [vmem:[#allocation14 + $0x10] sm:$0xff]  ;;  %s3016_s22 = smov 8   ;;  %s3017_s20 = smov 32   ;;  %v494_v0 = vlaneseq  ;;  %vm1331_vm2 = vcmask 1043456  }
 0x109   : > { %716 = vperm.xlu0 %2658, %v446_v1   ;;  %533 = vperm.xlu1 %2659, %v424_v2   ;;  %v449_v6 = vld [vmem:[#allocation14 + $0x18] sm:$0xff]  ;;  %v426_v7 = vld [vmem:[#allocation12 + $0x20] sm:$0xff]  ;;  %v427_v8 = vld [vmem:[#allocation12 + $0x28] sm:$0xff]  ;;  %s3018_s21 = smov 56   ;;  %s391_s14 = sand.u32 1, %s2966_s25   ;;  %vm1089_vm3 = vcmask 64512  }
 0x10a   : > { %v450_v9 = vld [vmem:[#allocation14 + $0x20] sm:$0xff]  ;;  %v451_v10 = vld [vmem:[#allocation14 + $0x28] sm:$0xff]  ;;  %v428_v11 = vld [vmem:[#allocation12 + $0x30] sm:$0xff]  ;;  %v3471_v1 = vshrl.u32 %v494_v0, 7  ;;  %s3476_s4 = sshll.u32 %s391_s14, 7  ;;  %s3019_s3 = smov 16  }
 0x10b   : > { %v429_v12 = vld [vmem:[#allocation12 + $0x38] sm:$0xff]  ;;  %v452_v13 = vld [vmem:[#allocation14 + $0x30] sm:$0xff]  ;;  %v430_v15 = vld [vmem:[#allocation12 + $0x40] sm:$0xff]  ;;  %s3020_s23 = smov 24   ;;  %s3021_s17 = smov 40   ;;  %vm1120_vm4 = vcmask 130048  }
 0x10c   : > { %v453_v14 = vld [vmem:[#allocation14 + $0x38] sm:$0xff]  ;;  %v431_v16 = vld [vmem:[#allocation12 + $0x48] sm:$0xff]  ;;  %v454_v17 = vld [vmem:[#allocation14 + $0x40] sm:$0xff]  ;;  %vm689_vm0 = vcmp.lt.s32.totalorder %v3471_v1, 7  ;;  %vm496_vm1 = vcmp.lt.s32.totalorder %v3471_v1, 1  ;;  %s3022_s24 = smov 48  }
 0x10d   : > { %721 = vperm.xlu0 %2658, %v447_v3   ;;  %538 = vperm.xlu1 %2659, %v425_v4   ;;  %v455_v18 = vld [vmem:[#allocation14 + $0x48] sm:$0xff]  ;;  %v432_v19 = vld [vmem:[#allocation12 + $0x50] sm:$0xff]  ;;  %v433_v20 = vld [vmem:[#allocation12 + $0x58] sm:$0xff]  ;;  %s2351_s13 = sshll.u32 %s4691_s2, 7  ;;  %s3023_s27 = smov 64   ;;  %vm1141_vm5 = vcmask 195584  }
 0x10e   : > { %v456_v21 = vld [vmem:[#allocation14 + $0x50] sm:$0xff]  ;;  %v457_v22 = vld [vmem:[#allocation14 + $0x58] sm:$0xff]  ;;  %v434_v23 = vld [vmem:[#allocation12 + $0x60] sm:$0xff]  ;;  %s3416_s0 = scalar_lea.vmem %s339_s30, %s2351_s13 [#allocation3]  ;;  %vm1162_vm6 = vcmask 261120   ;;  %vm1183_vm7 = vcmask 326656   ;;  %vm1204_vm8 = vcmask 392192  }
 0x10f   : > { %v435_v24 = vld [vmem:[#allocation12 + $0x68] sm:$0xff]  ;;  %v458_v25 = vld [vmem:[#allocation14 + $0x60] sm:$0xff]  ;;  %v436_v27 = vld [vmem:[#allocation12 + $0x70] sm:$0xff]  ;;  %vm1225_vm9 = vcmask 457728   ;;  %vm1246_vm10 = vcmask 523264   ;;  %vm1310_vm11 = vcmask 588800  }
 0x110   : > { %v459_v26 = vld [vmem:[#allocation14 + $0x68] sm:$0xff]  ;;  %v437_v28 = vld [vmem:[#allocation12 + $0x78] sm:$0xff]  ;;  %v460_v29 = vld [vmem:[#allocation14 + $0x70] sm:$0xff]  ;;  %s4108_s19 = scalar_lea.vmem [#allocation15], %s3476_s4  ;;  %p2368_p5 = scmp.ne.s32.totalorder %s4691_s2, 0 }
 0x111   : > { %726 = vperm.xlu0 %2658, %v448_v5   ;;  %731 = vperm.xlu1 %2659, %v449_v6   ;;  %v461_v30 = vld [vmem:[#allocation14 + $0x78] sm:$0xff]  ;;  %v438_v31 = vld [vmem:[#allocation12 + $0x80] sm:$0xff]  ;;  %v439_v32 = vld [vmem:[#allocation12 + $0x88] sm:$0xff] }
 0x112   : > { %v462_v33 = vld [vmem:[#allocation14 + $0x80] sm:$0xff]  ;;  %v463_v34 = vld [vmem:[#allocation14 + $0x88] sm:$0xff]  ;;  %v440_v35 = vld [vmem:[#allocation12 + $0x90] sm:$0xff] }
 0x113   : > { %v441_v36 = vld [vmem:[#allocation12 + $0x98] sm:$0xff]  ;;  %v464_v37 = vld [vmem:[#allocation14 + $0x90] sm:$0xff]  ;;  %v442_v39 = vld [vmem:[#allocation12 + $0xa0] sm:$0xff] }
 0x114   : > { %v465_v38 = vld [vmem:[#allocation14 + $0x98] sm:$0xff]  ;;  %v443_v40 = vld [vmem:[#allocation12 + $0xa8] sm:$0xff]  ;;  %v466_v41 = vld [vmem:[#allocation14 + $0xa0] sm:$0xff] }
 0x115   : > { %543 = vperm.xlu0 %2658, %v426_v7   ;;  %548 = vperm.xlu1 %2659, %v427_v8   ;;  %v467_v42 = vld [vmem:[#allocation14 + $0xa8] sm:$0xff]  ;;  %v444_v43 = vld [vmem:[#allocation12 + $0xb0] sm:$0xff]  ;;  %v445_v44 = vld [vmem:[#allocation12 + $0xb8] sm:$0xff] }
 0x116   : > { %v468_v45 = vld [vmem:[#allocation14 + $0xb0] sm:$0xff]  ;;  %v469_v46 = vld [vmem:[#allocation14 + $0xb8] sm:$0xff]  ;;  %v423_v47 = vld [vmem:[#allocation12 + $0x8] sm:$0xff] }
 0x117   : > { %v422_v48 = vld [vmem:[#allocation12] sm:$0xff]  ;;  %v3422_v50 = vld [vmem:[%s3416_s0 + $0x18] sm:$0xff]  ;;  %v3425_v51 = vld [vmem:[%s3416_s0] sm:$0xff] }
 0x118   : > { %v3419_v49 = vld [vmem:[%s3416_s0 + $0x10] sm:$0xff]  ;;  %v3428_v52 = vld [vmem:[%s3416_s0 + $0x8] sm:$0xff]  ;;  %v3435_v55 = vld [vmem:[%s3416_s0 + $0x20] sm:$0xff]  ;;  %v4608_v3 = vrot.slane %v3425_v51, 1 }
 0x119   : > { %736 = vperm.xlu0 %2658, %v450_v9   ;;  %741 = vperm.xlu1 %2659, %v451_v10   ;;  %v859_v53 = vpack.c.bf16 %v3422_v50, %v3419_v49  ;;  %v858_v54 = vpack.c.bf16 %v3428_v52, %v3425_v51  ;;  %4692 = vst [vmem:[#allocation26_spill] sm:$0xff] %v3435_v55  ;;  %v3438_v56 = vld [vmem:[%s3416_s0 + $0x28] sm:$0xff]  ;;  %v3445_v58 = vld [vmem:[%s3416_s0 + $0x30] sm:$0xff]  ;;  %v3448_v59 = vld [vmem:[%s3416_s0 + $0x38] sm:$0xff]  ;;  %v666_v4 = vrot.slane %v3428_v52, 1  ;;  %v667_v5 = vrot.slane %v3419_v49, 1 }
 0x11a   : > { %4693 = vst [vmem:[#allocation27_spill] sm:$0xff] %v3438_v56  ;;  %v860_v57 = vpack.c.bf16 %v3438_v56, %v3435_v55  ;;  %4694 = vst [vmem:[#allocation28_spill] sm:$0xff] %v3445_v58  ;;  %v861_v60 = vpack.c.bf16 %v3448_v59, %v3445_v58  ;;  %v3459_v61 = vld [vmem:[%s3416_s0 + $0x40] sm:$0xff]  ;;  %v3462_v62 = vld [vmem:[%s3416_s0 + $0x48] sm:$0xff]  ;;  %v473_v9 = vrot.slane %v3422_v50, 7  ;;  %v4609_v10 = vrot.slane %v3428_v52, 7 }
 0x11b   : > { %4695 = vst [vmem:[#allocation29_spill] sm:$0xff] %v3448_v59  ;;  %4696 = vst [vmem:[#allocation30_spill] sm:$0xff] %v3459_v61  ;;  %v3467_v63 = vpack.c.bf16 %v3462_v62, %v3459_v61  ;;  %v2660_v2 = vld [vmem:[#allocation6] sm:$0xff]   ;;  %v2661_v6 = vld [vmem:[#allocation6 + $0x8] sm:$0xff]  }
 0x11c   : > { %4697 = vst [vmem:[#allocation31_spill] sm:$0xff] %v3462_v62  ;;  %2418 = vmatprep.subr.bf16.mxu0 %v2660_v2 }
 0x11d   : > { %553 = vperm.xlu0 %2658, %v428_v11   ;;  %558 = vperm.xlu1 %2659, %v429_v12   ;;  %v472_v11 = vrot.slane %v3419_v49, 7  ;;  %v712_v12 = vsel %vm689_vm0, %v4608_v3, %v666_v4  ;;  %v477_v49 = vrot.slane %v3448_v59, 7  ;;  %v3707_v3 = vld [vmem:[%s3416_s0 + $0x78] sm:$0xff] }
 0x11e   : > { %2419 = vmatpush3.bf16.msra.mxu0 %v2660_v2  ;;  %4724 = vst [vmem:[#allocation58_spill] sm:$0xff] %v3707_v3 }
 0x11f   : > { %2420 = vmatprep.subr.bf16.mxu0 %v2661_v6 }
 0x121   : > { %746 = vperm.xlu0 %2658, %v452_v13   ;;  %751 = vperm.xlu1 %2659, %v453_v14   ;;  %v711_v13 = vsel %vm689_vm0, %v666_v4, %v667_v5  ;;  %v668_v14 = vrot.slane %v3422_v50, 1 }
 0x122   : > { %2421 = vmatpush3.bf16.msra.mxu0 %v2661_v6  ;;  %v673_v6 = vrot.slane %v3459_v61, 1 }
 0x125   : > { %563 = vperm.xlu0 %2658, %v430_v15   ;;  %568 = vperm.xlu1 %2659, %v431_v16   ;;  %v669_v15 = vrot.slane %v3435_v55, 1  ;;  %v2662_v16 = vld [vmem:[#allocation6 + $0x10] sm:$0xff]  }
 0x126   : > { %2422 = vmatprep.subr.bf16.mxu0 %v2662_v16 }
 0x127   : > { %2423 = vmatpush3.bf16.msra.mxu0 %v2662_v16 }
 0x129   : > { %756 = vperm.xlu0 %2658, %v454_v17   ;;  %761 = vperm.xlu1 %2659, %v455_v18  }
 0x12d   : > { %573 = vperm.xlu0 %2658, %v432_v19   ;;  %578 = vperm.xlu1 %2659, %v433_v20   ;;  %v517_v19 = vsel %vm496_vm1, %v472_v11, %v473_v9 }
 0x131   : > { %766 = vperm.xlu0 %2658, %v456_v21   ;;  %771 = vperm.xlu1 %2659, %v457_v22   ;;  %v518_v21 = vsel %vm496_vm1, %v4609_v10, %v472_v11 }
 0x135   : > { %583 = vperm.xlu0 %2658, %v434_v23   ;;  %588 = vperm.xlu1 %2659, %v435_v24   ;;  %v710_v23 = vsel %vm689_vm0, %v667_v5, %v668_v14  ;;  %v709_v24 = vsel %vm689_vm0, %v668_v14, %v669_v15  ;;  %v672_v5 = vrot.slane %v3448_v59, 1 }
 0x137   : > { %v705_v16 = vsel %vm689_vm0, %v672_v5, %v673_v6 }
 0x139   : > { %776 = vperm.xlu0 %2658, %v458_v25   ;;  %781 = vperm.xlu1 %2659, %v459_v26   ;;  %v474_v25 = vrot.slane %v3435_v55, 7  ;;  %v475_v26 = vrot.slane %v3438_v56, 7 }
 0x13d   : > { %593 = vperm.xlu0 %2658, %v436_v27   ;;  %598 = vperm.xlu1 %2659, %v437_v28  }
 0x141   : > { %786 = vperm.xlu0 %2658, %v460_v29   ;;  %791 = vperm.xlu1 %2659, %v461_v30   ;;  %v2663_v29 = vld [vmem:[#allocation6 + $0x18] sm:$0xff]  }
 0x142   : > { %2424 = vmatprep.subr.bf16.mxu0 %v2663_v29 }
 0x143   : > { %2425 = vmatpush3.bf16.msra.mxu0 %v2663_v29  ;;  %v674_v29 = vrot.slane %v3462_v62, 1 }
 0x145   : > { %603 = vperm.xlu0 %2658, %v438_v31   ;;  %608 = vperm.xlu1 %2659, %v439_v32  }
 0x149   : > { %796 = vperm.xlu0 %2658, %v462_v33   ;;  %801 = vperm.xlu1 %2659, %v463_v34  }
 0x14d   : > { %613 = vperm.xlu0 %2658, %v440_v35   ;;  %618 = vperm.xlu1 %2659, %v441_v36   ;;  %v516_v35 = vsel %vm496_vm1, %v473_v9, %v474_v25  ;;  %v515_v36 = vsel %vm496_vm1, %v474_v25, %v475_v26 }
 0x151   : > { %806 = vperm.xlu0 %2658, %v464_v37   ;;  %811 = vperm.xlu1 %2659, %v465_v38   ;;  %v670_v37 = vrot.slane %v3438_v56, 1  ;;  %v671_v38 = vrot.slane %v3445_v58, 1 }
 0x155   : > { %623 = vperm.xlu0 %2658, %v442_v39   ;;  %628 = vperm.xlu1 %2659, %v443_v40  }
 0x159   : > { %816 = vperm.xlu0 %2658, %v466_v41   ;;  %821 = vperm.xlu1 %2659, %v467_v42   ;;  %v2664_v41 = vld [vmem:[#allocation6 + $0x20] ss:$0 sps:$4 sm:$0xff]  }
 0x15a   : > { %2474 = vmatprep.subr.msk.bf16.mxu0 %vm1331_vm2, %v2664_v41  ;;  %v1333_v50 = vsel %vm1331_vm2, %v2664_v41, 0 }
 0x15b   : > { %2427 = vmatpush3.bf16.msra.mxu0 %v1333_v50 }
 0x15d   : > { %633 = vperm.xlu0 %2658, %v444_v43   ;;  %638 = vperm.xlu1 %2659, %v445_v44  }
 0x161   : > { %826 = vperm.xlu0 %2658, %v468_v45   ;;  %831 = vperm.xlu1 %2659, %v469_v46   ;;  %v476_v46 = vrot.slane %v3445_v58, 7 }
 0x163   : > { %v514_v2 = vsel %vm496_vm1, %v475_v26, %v476_v46  ;;  %v513_v4 = vsel %vm496_vm1, %v476_v46, %v477_v49 }
 0x165   : > { %528 = vperm.xlu1 %2659, %v423_v47   ;;  %523 = vperm.xlu0 %2658, %v422_v48   ;;  %v708_v47 = vsel %vm689_vm0, %v669_v15, %v670_v37  ;;  %v707_v48 = vsel %vm689_vm0, %v670_v37, %v671_v38  ;;  %v706_v15 = vsel %vm689_vm0, %v671_v38, %v672_v5 }
 0x169   : > { %906 = vrot.lane.b32.xlu1 %v859_v53, %s3016_s22  ;;  %904 = vrot.lane.b32.xlu0 %v858_v54, %s3016_s22 }
 0x16d   : > { %987 = vrot.lane.b32.xlu1 %v860_v57, %s3017_s20  ;;  %985 = vrot.lane.b32.xlu0 %v859_v53, %s3017_s20 }
 0x171   : > { %1050 = vrot.lane.b32.xlu1 %v861_v60, %s3018_s21  ;;  %1048 = vrot.lane.b32.xlu0 %v860_v57, %s3018_s21 }
 0x175   : > { %908 = vrot.lane.b32.xlu1 %v860_v57, %s3016_s22  ;;  %989 = vrot.lane.b32.xlu0 %v861_v60, %s3017_s20 }
 0x179   : > { %910 = vrot.lane.b32.xlu1 %v861_v60, %s3016_s22 }
 0x17d   : > { %991 = vrot.lane.b32.xlu1 %v3467_v63, %s3017_s20 }
 0x188   : > { %v3482_v7 = vpop.permute.xlu0 %716  ;;  %v3484_v8 = vpop.permute.xlu1 %533 }
 0x189   : > { %v834_v20 = vmul.f32 %v3482_v7, %v712_v12  ;;  %v643_v32 = vmul.f32 %v3484_v8, %v518_v21 }
 0x18c   : > { %v3498_v17 = vpop.permute.xlu0 %721  ;;  %v3500_v18 = vpop.permute.xlu1 %538 }
 0x18d   : > { %v835_v22 = vmul.f32 %v3498_v17, %v711_v13  ;;  %v644_v28 = vmul.f32 %v3500_v18, %v517_v19  ;;  %v478_v19 = vrot.slane %v3459_v61, 7 }
 0x18f   : > { %v882_v27 = vpack.c.bf16 %v835_v22, %v834_v20  ;;  %v3531_v39 = vpack.c.bf16 %v644_v28, %v643_v32  ;;  %v479_v20 = vrot.slane %v3462_v62, 7  ;;  %v3585_v22 = vld [vmem:[%s3416_s0 + $0x50] sm:$0xff] }
 0x190   : > { %v3517_v30 = vpop.permute.xlu0 %726  ;;  %v3519_v31 = vpop.permute.xlu1 %731  ;;  %4701 = vst [vmem:[#allocation35_spill] sm:$0xff] %v3585_v22  ;;  %v675_v32 = vrot.slane %v3585_v22, 1 }
 0x191   : > { %v836_v33 = vmul.f32 %v3517_v30, %v710_v23  ;;  %v837_v34 = vmul.f32 %v3519_v31, %v709_v24  ;;  %934 = vrot.lane.b32.xlu0 %v882_v27, %s3019_s3  ;;  %v512_v27 = vsel %vm496_vm1, %v477_v49, %v478_v19  ;;  %v511_v28 = vsel %vm496_vm1, %v478_v19, %v479_v20 }
 0x192   : > { %v703_v41 = vsel %vm689_vm0, %v674_v29, %v675_v32 }
 0x193   : > { %v883_v40 = vpack.c.bf16 %v837_v34, %v836_v33  ;;  %v3603_v34 = vld [vmem:[%s3416_s0 + $0x58] sm:$0xff] }
 0x194   : > { %v3533_v42 = vpop.permute.xlu0 %543  ;;  %v3535_v43 = vpop.permute.xlu1 %548  ;;  %4704 = vst [vmem:[#allocation38_spill] sm:$0xff] %v3603_v34  ;;  %v863_v19 = vpack.c.bf16 %v3603_v34, %v3585_v22 }
 0x195   : > { %v645_v44 = vmul.f32 %v3533_v42, %v516_v35  ;;  %v646_v45 = vmul.f32 %v3535_v43, %v515_v36  ;;  %936 = vrot.lane.b32.xlu1 %v883_v40, %s3019_s3  ;;  %964 = vrot.lane.b32.xlu0 %v3531_v39, %s3020_s23 }
 0x197   : > { %v3550_v53 = vpack.c.bf16 %v646_v45, %v645_v44  ;;  %v480_v44 = vrot.slane %v3585_v22, 7  ;;  %v481_v45 = vrot.slane %v3603_v34, 7 }
 0x198   : > { %v3552_v54 = vpop.permute.xlu0 %736  ;;  %v3554_v57 = vpop.permute.xlu1 %741 }
 0x199   : > { %4698 = vst [vmem:[#allocation32_spill] sm:$0xff] %v3554_v57  ;;  %v838_v60 = vmul.f32 %v3552_v54, %v708_v47  ;;  %v839_v0 = vmul.f32 %v3554_v57, %v707_v48  ;;  %966 = vrot.lane.b32.xlu1 %v3550_v53, %s3020_s23  ;;  %1006 = vrot.lane.b32.xlu0 %v883_v40, %s3021_s17 }
 0x19a   : > { %v704_v40 = vsel %vm689_vm0, %v673_v6, %v674_v29 }
 0x19b   : > { %v884_v9 = vpack.c.bf16 %v839_v0, %v838_v60  ;;  %v510_v60 = vsel %vm496_vm1, %v479_v20, %v480_v44  ;;  %v509_v0 = vsel %vm496_vm1, %v480_v44, %v481_v45  ;;  %v676_v20 = vrot.slane %v3603_v34, 1 }
 0x19c   : > { %v3567_v11 = vpop.permute.xlu0 %553  ;;  %v3569_v12 = vpop.permute.xlu1 %558 }
 0x19d   : > { %4699 = vst [vmem:[#allocation33_spill] sm:$0xff] %v3567_v11  ;;  %4700 = vst [vmem:[#allocation34_spill] sm:$0xff] %v3569_v12  ;;  %v647_v13 = vmul.f32 %v3567_v11, %v514_v2  ;;  %v648_v14 = vmul.f32 %v3569_v12, %v513_v4  ;;  %1008 = vrot.lane.b32.xlu1 %v884_v9, %s3021_s17  ;;  %1027 = vrot.lane.b32.xlu0 %v3550_v53, %s3022_s24 }
 0x19e   : > { %v702_v29 = vsel %vm689_vm0, %v675_v32, %v676_v20 }
 0x19f   : > { %v3582_v21 = vpack.c.bf16 %v648_v14, %v647_v13 }
 0x1a0   : > { %v3587_v23 = vpop.permute.xlu0 %746  ;;  %v3589_v24 = vpop.permute.xlu1 %751 }
 0x1a1   : > { %4702 = vst [vmem:[#allocation36_spill] sm:$0xff] %v3587_v23  ;;  %4703 = vst [vmem:[#allocation37_spill] sm:$0xff] %v3589_v24  ;;  %v840_v25 = vmul.f32 %v3587_v23, %v706_v15  ;;  %v841_v26 = vmul.f32 %v3589_v24, %v705_v16  ;;  %1029 = vrot.lane.b32.xlu1 %v3582_v21, %s3022_s24  ;;  %1069 = vrot.lane.b32.xlu0 %v884_v9, %s3023_s27  ;;  %v3650_v16 = vld [vmem:[%s3416_s0 + $0x60] sm:$0xff] }
 0x1a2   : > { %4713 = vst [vmem:[#allocation47_spill] sm:$0xff] %v3650_v16 }
 0x1a3   : > { %v885_v33 = vpack.c.bf16 %v841_v26, %v840_v25  ;;  %v677_v25 = vrot.slane %v3650_v16, 1 }
 0x1a4   : > { %v3605_v35 = vpop.permute.xlu0 %563  ;;  %v3607_v36 = vpop.permute.xlu1 %568 }
 0x1a5   : > { %4705 = vst [vmem:[#allocation39_spill] sm:$0xff] %v3605_v35  ;;  %4706 = vst [vmem:[#allocation40_spill] sm:$0xff] %v3607_v36  ;;  %v649_v37 = vmul.f32 %v3605_v35, %v512_v27  ;;  %v650_v38 = vmul.f32 %v3607_v36, %v511_v28  ;;  %940 = vrot.lane.b32.xlu1 %v885_v33, %s3019_s3  ;;  %1071 = vrot.lane.b32.xlu0 %v885_v33, %s3023_s27  ;;  %v3664_v28 = vld [vmem:[%s3416_s0 + $0x68] sm:$0xff]  ;;  %v3893_v35 = vld [vmem:[%s3416_s0 + $0xb0] sm:$0xff] }
 0x1a6   : > { %4716 = vst [vmem:[#allocation50_spill] sm:$0xff] %v3664_v28  ;;  %v687_v12 = vrot.slane %v3893_v35, 1 }
 0x1a7   : > { %v3619_v46 = vpack.c.bf16 %v650_v38, %v649_v37  ;;  %v482_v37 = vrot.slane %v3650_v16, 7  ;;  %v483_v38 = vrot.slane %v3664_v28, 7 }
 0x1a8   : > { %v3621_v47 = vpop.permute.xlu0 %756  ;;  %v3623_v48 = vpop.permute.xlu1 %761 }
 0x1a9   : > { %4707 = vst [vmem:[#allocation41_spill] sm:$0xff] %v3621_v47  ;;  %4708 = vst [vmem:[#allocation42_spill] sm:$0xff] %v3623_v48  ;;  %v842_v49 = vmul.f32 %v3621_v47, %v704_v40  ;;  %v843_v50 = vmul.f32 %v3623_v48, %v703_v41  ;;  %970 = vrot.lane.b32.xlu1 %v3619_v46, %s3020_s23  ;;  %938 = vrot.lane.b32.xlu0 %v884_v9, %s3019_s3 }
 0x1ab   : > { %v886_v2 = vpack.c.bf16 %v843_v50, %v842_v49  ;;  %v508_v49 = vsel %vm496_vm1, %v481_v45, %v482_v37  ;;  %v507_v50 = vsel %vm496_vm1, %v482_v37, %v483_v38  ;;  %v678_v45 = vrot.slane %v3664_v28, 1 }
 0x1ac   : > { %v3634_v4 = vpop.permute.xlu0 %573  ;;  %v3636_v5 = vpop.permute.xlu1 %578 }
 0x1ad   : > { %4709 = vst [vmem:[#allocation43_spill] sm:$0xff] %v3634_v4  ;;  %4710 = vst [vmem:[#allocation44_spill] sm:$0xff] %v3636_v5  ;;  %v651_v6 = vmul.f32 %v3634_v4, %v510_v60  ;;  %v652_v13 = vmul.f32 %v3636_v5, %v509_v0  ;;  %1012 = vrot.lane.b32.xlu1 %v886_v2, %s3021_s17  ;;  %968 = vrot.lane.b32.xlu0 %v3582_v21, %s3020_s23 }
 0x1af   : > { %v3643_v9 = vpack.c.bf16 %v652_v13, %v651_v6  ;;  %v3694_v6 = vld [vmem:[%s3416_s0 + $0x70] sm:$0xff] }
 0x1b0   : > { %v3645_v14 = vpop.permute.xlu0 %766  ;;  %v3647_v15 = vpop.permute.xlu1 %771  ;;  %4721 = vst [vmem:[#allocation55_spill] sm:$0xff] %v3694_v6 }
 0x1b1   : > { %4711 = vst [vmem:[#allocation45_spill] sm:$0xff] %v3645_v14  ;;  %4712 = vst [vmem:[#allocation46_spill] sm:$0xff] %v3647_v15  ;;  %1033 = vrot.lane.b32.xlu1 %v3643_v9, %s3022_s24  ;;  %1010 = vrot.lane.b32.xlu0 %v885_v33, %s3021_s17  ;;  %v701_v33 = vsel %vm689_vm0, %v676_v20, %v677_v25  ;;  %v844_v44 = vmul.f32 %v3645_v14, %v702_v29  ;;  %v679_v29 = vrot.slane %v3694_v6, 1 }
 0x1b2   : > { %v845_v32 = vmul.f32 %v3647_v15, %v701_v33 }
 0x1b4   : > { %v3659_v26 = vpop.permute.xlu0 %583  ;;  %v3661_v27 = vpop.permute.xlu1 %588 }
 0x1b5   : > { %4714 = vst [vmem:[#allocation48_spill] sm:$0xff] %v3659_v26  ;;  %4715 = vst [vmem:[#allocation49_spill] sm:$0xff] %v3661_v27  ;;  %1054 = vrot.lane.b32.xlu1 %v863_v19, %s3018_s21  ;;  %1031 = vrot.lane.b32.xlu0 %v3619_v46, %s3022_s24  ;;  %v653_v13 = vmul.f32 %v3659_v26, %v508_v49  ;;  %v654_v20 = vmul.f32 %v3661_v27, %v507_v50  ;;  %v484_v49 = vrot.slane %v3694_v6, 7  ;;  %v3798_v26 = vld [vmem:[%s3416_s0 + $0x90] sm:$0xff] }
 0x1b6   : > { %v485_v50 = vrot.slane %v3707_v3, 7  ;;  %4735 = vst [vmem:[#allocation69_spill] sm:$0xff] %v3798_v26 }
 0x1b7   : > { %v3711_v10 = vpack.c.bf16 %v654_v20, %v653_v13  ;;  %v864_v13 = vpack.c.bf16 %v3664_v28, %v3650_v16 }
 0x1b8   : > { %v3675_v40 = vpop.permute.xlu0 %776  ;;  %v3677_v41 = vpop.permute.xlu1 %781  ;;  %v505_v61 = vsel %vm496_vm1, %v484_v49, %v485_v50 }
 0x1b9   : > { %4717 = vst [vmem:[#allocation51_spill] sm:$0xff] %v3675_v40  ;;  %4718 = vst [vmem:[#allocation52_spill] sm:$0xff] %v3677_v41  ;;  %912 = vrot.lane.b32.xlu1 %v3467_v63, %s3016_s22  ;;  %1052 = vrot.lane.b32.xlu0 %v3467_v63, %s3018_s21  ;;  %v887_v63 = vpack.c.bf16 %v845_v32, %v844_v44  ;;  %v700_v44 = vsel %vm689_vm0, %v677_v25, %v678_v45 }
 0x1ba   : > { %v699_v32 = vsel %vm689_vm0, %v678_v45, %v679_v29  ;;  %v846_v25 = vmul.f32 %v3675_v40, %v700_v44  ;;  %v506_v45 = vsel %vm496_vm1, %v483_v38, %v484_v49 }
 0x1bb   : > { %v847_v20 = vmul.f32 %v3677_v41, %v699_v32 }
 0x1bc   : > { %v3689_v60 = vpop.permute.xlu0 %593  ;;  %v3691_v0 = vpop.permute.xlu1 %598 }
 0x1bd   : > { %4719 = vst [vmem:[#allocation53_spill] sm:$0xff] %v3689_v60  ;;  %4720 = vst [vmem:[#allocation54_spill] sm:$0xff] %v3691_v0  ;;  %914 = vrot.lane.b32.xlu1 %v863_v19, %s3016_s22  ;;  %1073 = vrot.lane.b32.xlu0 %v886_v2, %s3023_s27  ;;  %v655_v44 = vmul.f32 %v3689_v60, %v506_v45  ;;  %v656_v32 = vmul.f32 %v3691_v0, %v505_v61 }
 0x1be   : > { %v865_v61 = vpack.c.bf16 %v3707_v3, %v3694_v6 }
 0x1bf   : > { %v3749_v49 = vpack.c.bf16 %v656_v32, %v655_v44  ;;  %v3770_v32 = vld [vmem:[%s3416_s0 + $0x88] sm:$0xff] }
 0x1c0   : > { %v3702_v33 = vpop.permute.xlu0 %786  ;;  %v3704_v37 = vpop.permute.xlu1 %791  ;;  %4734 = vst [vmem:[#allocation68_spill] sm:$0xff] %v3770_v32  ;;  %v487_v55 = vrot.slane %v3770_v32, 7 }
 0x1c1   : > { %4722 = vst [vmem:[#allocation56_spill] sm:$0xff] %v3702_v33  ;;  %4723 = vst [vmem:[#allocation57_spill] sm:$0xff] %v3704_v37  ;;  %944 = vrot.lane.b32.xlu1 %v887_v63, %s3019_s3  ;;  %1075 = vrot.lane.b32.xlu0 %v887_v63, %s3023_s27 }
 0x1c4   : > { %v3719_v62 = vpop.permute.xlu0 %603  ;;  %v3721_v34 = vpop.permute.xlu1 %608 }
 0x1c5   : > { %4725 = vst [vmem:[#allocation59_spill] sm:$0xff] %v3719_v62  ;;  %4726 = vst [vmem:[#allocation60_spill] sm:$0xff] %v3721_v34  ;;  %974 = vrot.lane.b32.xlu1 %v3711_v10, %s3020_s23  ;;  %942 = vrot.lane.b32.xlu0 %v886_v2, %s3019_s3  ;;  %v888_v2 = vpack.c.bf16 %v847_v20, %v846_v25  ;;  %v3756_v25 = vld [vmem:[%s3416_s0 + $0x80] sm:$0xff]  ;;  %v680_v20 = vrot.slane %v3707_v3, 1 }
 0x1c6   : > { %4733 = vst [vmem:[#allocation67_spill] sm:$0xff] %v3756_v25  ;;  %v486_v6 = vrot.slane %v3756_v25, 7 }
 0x1c8   : > { %v3734_v22 = vpop.permute.xlu0 %796  ;;  %v3736_v56 = vpop.permute.xlu1 %801  ;;  %v503_v41 = vsel %vm496_vm1, %v486_v6, %v487_v55 }
 0x1c9   : > { %4727 = vst [vmem:[#allocation61_spill] sm:$0xff] %v3734_v22  ;;  %4728 = vst [vmem:[#allocation62_spill] sm:$0xff] %v3736_v56  ;;  %995 = vrot.lane.b32.xlu1 %v864_v13, %s3017_s20  ;;  %972 = vrot.lane.b32.xlu0 %v3643_v9, %s3020_s23 }
 0x1cc   : > { %v3743_v38 = vpop.permute.xlu0 %613  ;;  %v3745_v28 = vpop.permute.xlu1 %618 }
 0x1cd   : > { %4729 = vst [vmem:[#allocation63_spill] sm:$0xff] %v3743_v38  ;;  %4730 = vst [vmem:[#allocation64_spill] sm:$0xff] %v3745_v28  ;;  %1016 = vrot.lane.b32.xlu1 %v888_v2, %s3021_s17  ;;  %993 = vrot.lane.b32.xlu0 %v863_v19, %s3017_s20  ;;  %v681_v19 = vrot.slane %v3756_v25, 1 }
 0x1cf   : > { %v697_v3 = vsel %vm689_vm0, %v680_v20, %v681_v19 }
 0x1d0   : > { %v3751_v16 = vpop.permute.xlu0 %806  ;;  %v3753_v59 = vpop.permute.xlu1 %811 }
 0x1d1   : > { %4731 = vst [vmem:[#allocation65_spill] sm:$0xff] %v3751_v16  ;;  %4732 = vst [vmem:[#allocation66_spill] sm:$0xff] %v3753_v59  ;;  %1037 = vrot.lane.b32.xlu1 %v3749_v49, %s3022_s24  ;;  %1014 = vrot.lane.b32.xlu0 %v887_v63, %s3021_s17  ;;  %v698_v63 = vsel %vm689_vm0, %v679_v29, %v680_v20  ;;  %v849_v29 = vmul.f32 %v3704_v37, %v697_v3  ;;  %v683_v37 = vrot.slane %v3798_v26, 1 }
 0x1d2   : > { %v848_v60 = vmul.f32 %v3702_v33, %v698_v63  ;;  %v504_v20 = vsel %vm496_vm1, %v485_v50, %v486_v6  ;;  %v658_v3 = vmul.f32 %v3721_v34, %v503_v41  ;;  %v682_v50 = vrot.slane %v3770_v32, 1  ;;  %v3809_v33 = vld [vmem:[%s3416_s0 + $0x98] sm:$0xff] }
 0x1d3   : > { %v657_v63 = vmul.f32 %v3719_v62, %v504_v20  ;;  %4736 = vst [vmem:[#allocation70_spill] sm:$0xff] %v3809_v33  ;;  %v489_v20 = vrot.slane %v3809_v33, 7 }
 0x1d4   : > { %v3765_v45 = vpop.permute.xlu0 %623  ;;  %v3767_v44 = vpop.permute.xlu1 %628  ;;  %v695_v41 = vsel %vm689_vm0, %v682_v50, %v683_v37 }
 0x1d5   : > { %1058 = vrot.lane.b32.xlu1 %v865_v61, %s3018_s21  ;;  %1035 = vrot.lane.b32.xlu0 %v3711_v10, %s3022_s24  ;;  %v3815_v14 = vpack.c.bf16 %v658_v3, %v657_v63  ;;  %v866_v63 = vpack.c.bf16 %v3770_v32, %v3756_v25 }
 0x1d8   : > { %v3781_v58 = vpop.permute.xlu0 %816  ;;  %v3783_v0 = vpop.permute.xlu1 %821 }
 0x1d9   : > { %916 = vrot.lane.b32.xlu1 %v864_v13, %s3016_s22  ;;  %1056 = vrot.lane.b32.xlu0 %v864_v13, %s3018_s21  ;;  %v889_v13 = vpack.c.bf16 %v849_v29, %v848_v60  ;;  %v696_v60 = vsel %vm689_vm0, %v681_v19, %v682_v50  ;;  %v488_v29 = vrot.slane %v3798_v26, 7  ;;  %v851_v19 = vmul.f32 %v3736_v56, %v695_v41 }
 0x1da   : > { %v850_v3 = vmul.f32 %v3734_v22, %v696_v60  ;;  %v470_v22 = vrot.slane %v3425_v51, 7 }
 0x1db   : > { %v502_v62 = vsel %vm496_vm1, %v487_v55, %v488_v29  ;;  %v501_v5 = vsel %vm496_vm1, %v488_v29, %v489_v20  ;;  %v418_v29 = vld [vmem:[%s3416_s0 + $0xa0] sm:$0xff] }
 0x1dc   : > { %v3793_v40 = vpop.permute.xlu0 %633  ;;  %v3795_v27 = vpop.permute.xlu1 %638  ;;  %v659_v60 = vmul.f32 %v3743_v38, %v502_v62  ;;  %v660_v41 = vmul.f32 %v3745_v28, %v501_v5  ;;  %v3861_v62 = vpack.c.bf16 %v3809_v33, %v3798_v26  ;;  %v3880_v38 = vld [vmem:[%s3416_s0 + $0xb8] sm:$0xff] }
 0x1dd   : > { %918 = vrot.lane.b32.xlu1 %v865_v61, %s3016_s22  ;;  %1077 = vrot.lane.b32.xlu0 %v888_v2, %s3023_s27  ;;  %v493_v36 = vrot.slane %v3880_v38, 7 }
 0x1de   : > { %v3851_v55 = vpack.c.bf16 %v660_v41, %v659_v60 }
 0x1e0   : > { %v3806_v6 = vpop.permute.xlu1 %831  ;;  %v3811_v15 = vpop.permute.xlu0 %826 }
 0x1e1   : > { %948 = vrot.lane.b32.xlu1 %v889_v13, %s3019_s3  ;;  %1079 = vrot.lane.b32.xlu0 %v889_v13, %s3023_s27 }
 0x1e4   : > { %v3823_v34 = vpop.permute.xlu1 %528  ;;  %v3832_v50 = vpop.permute.xlu0 %523 }
 0x1e5   : > { %978 = vrot.lane.b32.xlu1 %v3815_v14, %s3020_s23  ;;  %946 = vrot.lane.b32.xlu0 %v888_v2, %s3019_s3  ;;  %v890_v2 = vpack.c.bf16 %v851_v19, %v850_v3  ;;  %v684_v3 = vrot.slane %v3809_v33, 1  ;;  %v419_v19 = vld [vmem:[%s3416_s0 + $0xa8] sm:$0xff]  ;;  %v490_v33 = vrot.slane %v418_v29, 7 }
 0x1e6   : > { %v491_v28 = vrot.slane %v419_v19, 7  ;;  %v686_v23 = vrot.slane %v419_v19, 1 }
 0x1e7   : > { %v694_v41 = vsel %vm689_vm0, %v683_v37, %v684_v3  ;;  %v500_v37 = vsel %vm496_vm1, %v489_v20, %v490_v33 }
 0x1e8   : > { %v3838_v4 = vpop.permute.xlu1 %906  ;;  %v3847_v25 = vpop.permute.xlu0 %904  ;;  %v852_v48 = vmul.f32 %v3751_v16, %v694_v41 }
 0x1e9   : > { %999 = vrot.lane.b32.xlu1 %v866_v63, %s3017_s20  ;;  %976 = vrot.lane.b32.xlu0 %v3749_v49, %s3020_s23 }
 0x1ec   : > { %v3845_v32 = vpop.permute.xlu1 %987  ;;  %v3863_v5 = vpop.permute.xlu0 %985 }
 0x1ed   : > { %1020 = vrot.lane.b32.xlu1 %v890_v2, %s3021_s17  ;;  %997 = vrot.lane.b32.xlu0 %v865_v61, %s3017_s20  ;;  %v685_v61 = vrot.slane %v418_v29, 1 }
 0x1ef   : > { %v693_v26 = vsel %vm689_vm0, %v684_v3, %v685_v61  ;;  %v499_v3 = vsel %vm496_vm1, %v490_v33, %v491_v28  ;;  %v520_v33 = vsel %vm496_vm1, %v493_v36, %v470_v22 }
 0x1f0   : > { %v3854_v56 = vpop.permute.xlu1 %1050  ;;  %v853_v47 = vmul.f32 %v3753_v59, %v693_v26  ;;  %v4737_v26 = vrot.slane %v3428_v52, 7  ;;  %v661_v59 = vmul.f32 %v3765_v45, %v500_v37  ;;  %v662_v16 = vmul.f32 %v3767_v44, %v499_v3 }
 0x1f1   : > { %1041 = vrot.lane.b32.xlu1 %v3851_v55, %s3022_s24  ;;  %1018 = vrot.lane.b32.xlu0 %v889_v13, %s3021_s17  ;;  %v3873_v13 = vpop.permute.xlu0 %1048  ;;  %v641_v57 = vmul.f32 %v3832_v50, %v520_v33  ;;  %v492_v45 = vrot.slane %v3893_v35, 7  ;;  %v868_v37 = vpack.c.bf16 %v419_v19, %v418_v29  ;;  %v688_v19 = vrot.slane %v3880_v38, 1 }
 0x1f2   : > { %v519_v20 = vsel %vm496_vm1, %v470_v22, %v4737_v26  ;;  %v891_v41 = vpack.c.bf16 %v853_v47, %v852_v48  ;;  %v880_v26 = vpack.c.bf16 %v662_v16, %v661_v59  ;;  %v692_v47 = vsel %vm689_vm0, %v685_v61, %v686_v23 }
 0x1f3   : > { %v642_v11 = vmul.f32 %v3823_v34, %v519_v20  ;;  %v691_v48 = vsel %vm689_vm0, %v686_v23, %v687_v12  ;;  %v854_v3 = vmul.f32 %v3781_v58, %v692_v47  ;;  %v498_v61 = vsel %vm496_vm1, %v491_v28, %v492_v45 }
 0x1f4   : > { %v3871_v60 = vpop.permute.xlu1 %908  ;;  %v855_v59 = vmul.f32 %v3783_v0, %v691_v48  ;;  %v497_v23 = vsel %vm496_vm1, %v492_v45, %v493_v36  ;;  %v663_v0 = vmul.f32 %v3793_v40, %v498_v61 }
 0x1f5   : > { %1062 = vrot.lane.b32.xlu1 %v3861_v62, %s3018_s21  ;;  %1039 = vrot.lane.b32.xlu0 %v3815_v14, %s3022_s24  ;;  %v870_v44 = vpack.c.bf16 %v642_v11, %v641_v57  ;;  %v664_v28 = vmul.f32 %v3795_v27, %v497_v23 }
 0x1f6   : > { %v892_v11 = vpack.c.bf16 %v855_v59, %v854_v3 }
 0x1f7   : > { %v1092_v57 = vsel %vm1089_vm3, %v870_v44, %v3847_v25  ;;  %v1095_v25 = vsel %vm1089_vm3, %v3531_v39, %v3838_v4  ;;  %v881_v33 = vpack.c.bf16 %v664_v28, %v663_v0  ;;  %v690_v39 = vsel %vm689_vm0, %v687_v12, %v688_v19 }
 0x1f8   : > { %v3895_v24 = vpop.permute.xlu1 %910  ;;  %v4738_v4 = vrot.slane %v3425_v51, 1  ;;  %v856_v51 = vmul.f32 %v3811_v15, %v690_v39 }
 0x1f9   : > { %920 = vrot.lane.b32.xlu1 %v866_v63, %s3016_s22  ;;  %1060 = vrot.lane.b32.xlu0 %v866_v63, %s3018_s21  ;;  %v3900_v63 = vpop.permute.xlu0 %989 }
 0x1fc   : > { %v3915_v52 = vpop.permute.xlu1 %991 }
 0x1fd   : > { %922 = vrot.lane.b32.xlu1 %v3861_v62, %s3016_s22  ;;  %1081 = vrot.lane.b32.xlu0 %v890_v2, %s3023_s27 }
 0x201   : > { %952 = vrot.lane.b32.xlu1 %v891_v41, %s3019_s3  ;;  %1083 = vrot.lane.b32.xlu0 %v891_v41, %s3023_s27 }
 0x203   : > { %v935_v22 = vpop.permute.xlu0 %934 }
 0x204   : > { %v1122_v58 = vsel %vm1120_vm4, %v1092_v57, %v935_v22 }
 0x205   : > { %982 = vrot.lane.b32.xlu1 %v880_v26, %s3020_s23  ;;  %950 = vrot.lane.b32.xlu0 %v890_v2, %s3019_s3 }
 0x207   : > { %v937_v16 = vpop.permute.xlu1 %936  ;;  %v965_v20 = vpop.permute.xlu0 %964 }
 0x208   : > { %v1143_v2 = vsel %vm1141_vm5, %v1122_v58, %v965_v20  ;;  %v1124_v40 = vsel %vm1120_vm4, %v1095_v25, %v937_v16 }
 0x209   : > { %1003 = vrot.lane.b32.xlu1 %v868_v37, %s3017_s20  ;;  %980 = vrot.lane.b32.xlu0 %v3851_v55, %s3020_s23  ;;  %v1164_v27 = vsel %vm1162_vm6, %v1143_v2, %v3863_v5  ;;  %v869_v5 = vpack.c.bf16 %v3880_v38, %v3893_v35 }
 0x20b   : > { %v967_v36 = vpop.permute.xlu1 %966  ;;  %v1007_v29 = vpop.permute.xlu0 %1006 }
 0x20c   : > { %v1145_v22 = vsel %vm1141_vm5, %v1124_v40, %v967_v36  ;;  %v1185_v47 = vsel %vm1183_vm7, %v1164_v27, %v1007_v29 }
 0x20d   : > { %1024 = vrot.lane.b32.xlu1 %v892_v11, %s3021_s17  ;;  %1001 = vrot.lane.b32.xlu0 %v3861_v62, %s3017_s20  ;;  %v713_v62 = vsel %vm689_vm0, %v688_v19, %v4738_v4  ;;  %v1166_v3 = vsel %vm1162_vm6, %v1145_v22, %v3845_v32  ;;  %v1101_v19 = vsel %vm1089_vm3, %v3582_v21, %v3895_v24 }
 0x20e   : > { %v857_v12 = vmul.f32 %v3806_v6, %v713_v62 }
 0x20f   : > { %v1009_v48 = vpop.permute.xlu1 %1008  ;;  %v1028_v45 = vpop.permute.xlu0 %1027 }
 0x210   : > { %v1206_v44 = vsel %vm1204_vm8, %v1185_v47, %v1028_v45  ;;  %v1187_v59 = vsel %vm1183_vm7, %v1166_v3, %v1009_v48  ;;  %v893_v15 = vpack.c.bf16 %v857_v12, %v856_v51 }
 0x211   : > { %1045 = vrot.lane.b32.xlu1 %v881_v33, %s3022_s24  ;;  %1022 = vrot.lane.b32.xlu0 %v891_v41, %s3021_s17  ;;  %v1227_v61 = vsel %vm1225_vm9, %v1206_v44, %v3873_v13 }
 0x213   : > { %v1030_v16 = vpop.permute.xlu1 %1029  ;;  %v1070_v20 = vpop.permute.xlu0 %1069 }
 0x214   : > { %v1208_v41 = vsel %vm1204_vm8, %v1187_v59, %v1030_v16  ;;  %v1248_v35 = vsel %vm1246_vm10, %v1227_v61, %v1070_v20 }
 0x215   : > { %1066 = vrot.lane.b32.xlu1 %v869_v5, %s3018_s21  ;;  %1043 = vrot.lane.b32.xlu0 %v880_v26, %s3022_s24  ;;  %v1229_v32 = vsel %vm1225_vm9, %v1208_v41, %v3854_v56  ;;  %v1098_v56 = vsel %vm1089_vm3, %v3550_v53, %v3871_v60 }
 0x216   : > { %2428 = vmatprep.mubr.msk.bf16.mxu0 %vm1310_vm11, %v1248_v35 }
 0x217   : > { %v941_v38 = vpop.permute.xlu1 %940  ;;  %v1072_v6 = vpop.permute.xlu0 %1071 }
 0x218   : > { %v1250_v23 = vsel %vm1246_vm10, %v1229_v32, %v1072_v6  ;;  %v1128_v40 = vsel %vm1120_vm4, %v1101_v19, %v941_v38 }
 0x219   : > { %1087 = vrot.lane.b32.xlu1 %v893_v15, %s3023_s27  ;;  %1064 = vrot.lane.b32.xlu0 %v868_v37, %s3018_s21 }
 0x21a   : > { %2429 = vmatmul.mubr.msk.bf16.vlgmr.msra.gmra.mrb[0].mxu0 %vm1310_vm11, %v1250_v23 }
 0x21b   : > { %v971_v13 = vpop.permute.xlu1 %970  ;;  %v939_v57 = vpop.permute.xlu0 %938 }
 0x21c   : > { %v1126_v29 = vsel %vm1120_vm4, %v1098_v56, %v939_v57  ;;  %v1149_v33 = vsel %vm1141_vm5, %v1128_v40, %v971_v13 }
 0x21d   : > { %1085 = vrot.lane.b32.xlu0 %v892_v11, %s3023_s27  ;;  %v1170_v21 = vsel %vm1162_vm6, %v1149_v33, %v3915_v52 }
 0x21f   : > { %v1013_v26 = vpop.permute.xlu1 %1012  ;;  %v969_v58 = vpop.permute.xlu0 %968 }
 0x220   : > { %v1147_v37 = vsel %vm1141_vm5, %v1126_v29, %v969_v58  ;;  %v1191_v45 = vsel %vm1183_vm7, %v1170_v21, %v1013_v26 }
 0x221   : > { %v1168_v27 = vsel %vm1162_vm6, %v1147_v37, %v3900_v63 }
 0x223   : > { %v1034_v0 = vpop.permute.xlu1 %1033  ;;  %v1011_v28 = vpop.permute.xlu0 %1010 }
 0x224   : > { %v1189_v53 = vsel %vm1183_vm7, %v1168_v27, %v1011_v28  ;;  %v1212_v63 = vsel %vm1204_vm8, %v1191_v45, %v1034_v0 }
 0x227   : > { %v1055_v2 = vpop.permute.xlu1 %1054  ;;  %v1032_v36 = vpop.permute.xlu0 %1031 }
 0x228   : > { %v1210_v60 = vsel %vm1204_vm8, %v1189_v53, %v1032_v36  ;;  %v1233_v39 = vsel %vm1225_vm9, %v1212_v63, %v1055_v2 }
 0x22b   : > { %v913_v25 = vpop.permute.xlu1 %912  ;;  %v1053_v11 = vpop.permute.xlu0 %1052 }
 0x22c   : > { %v1231_v22 = vsel %vm1225_vm9, %v1210_v60, %v1053_v11  ;;  %v1104_v35 = vsel %vm1089_vm3, %v3619_v46, %v913_v25 }
 0x22f   : > { %v915_v47 = vpop.permute.xlu1 %914  ;;  %v1074_v48 = vpop.permute.xlu0 %1073 }
 0x230   : > { %v1252_v24 = vsel %vm1246_vm10, %v1231_v22, %v1074_v48  ;;  %v1107_v13 = vsel %vm1089_vm3, %v3643_v9, %v915_v47 }
 0x231   : > { %2432 = vmatprep.mubr.msk.bf16.mxu0 %vm1310_vm11, %v1252_v24 }
 0x233   : > { %v945_v4 = vpop.permute.xlu1 %944  ;;  %v1076_v62 = vpop.permute.xlu0 %1075 }
 0x234   : > { %v1254_v44 = vsel %vm1246_vm10, %v1233_v39, %v1076_v62  ;;  %v1132_v26 = vsel %vm1120_vm4, %v1107_v13, %v945_v4 }
 0x235   : > { %2433 = vmatmul.mubr.msk.bf16.gmra.mrb[4].mxu0 %vm1310_vm11, %v1254_v44 }
 0x237   : > { %v975_v5 = vpop.permute.xlu1 %974  ;;  %v943_v3 = vpop.permute.xlu0 %942 }
 0x238   : > { %v1130_v15 = vsel %vm1120_vm4, %v1104_v35, %v943_v3  ;;  %v1153_v0 = vsel %vm1141_vm5, %v1132_v26, %v975_v5 }
 0x23b   : > { %v996_v51 = vpop.permute.xlu1 %995  ;;  %v973_v52 = vpop.permute.xlu0 %972 }
 0x23c   : > { %v1151_v38 = vsel %vm1141_vm5, %v1130_v15, %v973_v52  ;;  %v1174_v2 = vsel %vm1162_vm6, %v1153_v0, %v996_v51 }
 0x23f   : > { %v1017_v12 = vpop.permute.xlu1 %1016  ;;  %v994_v59 = vpop.permute.xlu0 %993 }
 0x240   : > { %v1172_v23 = vsel %vm1162_vm6, %v1151_v38, %v994_v59  ;;  %v1195_v29 = vsel %vm1183_vm7, %v1174_v2, %v1017_v12 }
 0x243   : > { %v1038_v16 = vpop.permute.xlu1 %1037  ;;  %v1015_v20 = vpop.permute.xlu0 %1014 }
 0x244   : > { %v1193_v57 = vsel %vm1183_vm7, %v1172_v23, %v1015_v20  ;;  %v1216_v9 = vsel %vm1204_vm8, %v1195_v29, %v1038_v16 }
 0x247   : > { %v1059_v61 = vpop.permute.xlu1 %1058  ;;  %v1036_v41 = vpop.permute.xlu0 %1035 }
 0x248   : > { %v1214_v58 = vsel %vm1204_vm8, %v1193_v57, %v1036_v41  ;;  %v1237_v37 = vsel %vm1225_vm9, %v1216_v9, %v1059_v61 }
 0x24b   : > { %v917_v32 = vpop.permute.xlu1 %916  ;;  %v1057_v6 = vpop.permute.xlu0 %1056 }
 0x24c   : > { %v1235_v46 = vsel %vm1225_vm9, %v1214_v58, %v1057_v6  ;;  %v1110_v45 = vsel %vm1089_vm3, %v3711_v10, %v917_v32 }
 0x24f   : > { %v919_v28 = vpop.permute.xlu1 %918  ;;  %v1078_v56 = vpop.permute.xlu0 %1077 }
 0x250   : > { %v1256_v36 = vsel %vm1246_vm10, %v1235_v46, %v1078_v56  ;;  %v1113_v5 = vsel %vm1089_vm3, %v3749_v49, %v919_v28 }
 0x251   : > { %2436 = vmatprep.mubr.msk.bf16.mxu0 %vm1310_vm11, %v1256_v36 }
 0x253   : > { %v949_v19 = vpop.permute.xlu1 %948  ;;  %v1080_v25 = vpop.permute.xlu0 %1079 }
 0x254   : > { %v1258_v11 = vsel %vm1246_vm10, %v1237_v37, %v1080_v25  ;;  %v1136_v51 = vsel %vm1120_vm4, %v1113_v5, %v949_v19 }
 0x255   : > { %2437 = vmatmul.mubr.msk.bf16.gmra.mrb[8].mxu0 %vm1310_vm11, %v1258_v11 }
 0x257   : > { %v979_v40 = vpop.permute.xlu1 %978  ;;  %v947_v27 = vpop.permute.xlu0 %946 }
 0x258   : > { %v1134_v63 = vsel %vm1120_vm4, %v1110_v45, %v947_v27  ;;  %v1157_v12 = vsel %vm1141_vm5, %v1136_v51, %v979_v40 }
 0x25b   : > { %v1000_v33 = vpop.permute.xlu1 %999  ;;  %v977_v53 = vpop.permute.xlu0 %976 }
 0x25c   : > { %v1155_v39 = vsel %vm1141_vm5, %v1134_v63, %v977_v53  ;;  %v1178_v20 = vsel %vm1162_vm6, %v1157_v12, %v1000_v33 }
 0x25f   : > { %v1021_v60 = vpop.permute.xlu1 %1020  ;;  %v998_v22 = vpop.permute.xlu0 %997 }
 0x260   : > { %v1176_v44 = vsel %vm1162_vm6, %v1155_v39, %v998_v22  ;;  %v1199_v41 = vsel %vm1183_vm7, %v1178_v20, %v1021_v60 }
 0x263   : > { %v1042_v47 = vpop.permute.xlu1 %1041  ;;  %v1019_v48 = vpop.permute.xlu0 %1018 }
 0x264   : > { %v1197_v3 = vsel %vm1183_vm7, %v1176_v44, %v1019_v48  ;;  %v1220_v49 = vsel %vm1204_vm8, %v1199_v41, %v1042_v47 }
 0x267   : > { %v1063_v21 = vpop.permute.xlu1 %1062  ;;  %v1040_v24 = vpop.permute.xlu0 %1039 }
 0x268   : > { %v1218_v52 = vsel %vm1204_vm8, %v1197_v3, %v1040_v24  ;;  %v1241_v35 = vsel %vm1225_vm9, %v1220_v49, %v1063_v21  ;;  %v4065_v24 = vld [vmem:[#allocation8] ss:$0 sm:$0xff] }
 0x26b   : > { %v921_v4 = vpop.permute.xlu1 %920  ;;  %v1061_v62 = vpop.permute.xlu0 %1060 }
 0x26c   : > { %v1239_v10 = vsel %vm1225_vm9, %v1218_v52, %v1061_v62  ;;  %v1116_v2 = vsel %vm1089_vm3, %v3815_v14, %v921_v4 }
 0x26f   : > { %v923_v59 = vpop.permute.xlu1 %922  ;;  %v1082_v16 = vpop.permute.xlu0 %1081 }
 0x270   : > { %v1260_v61 = vsel %vm1246_vm10, %v1239_v10, %v1082_v16  ;;  %v1119_v36 = vsel %vm1089_vm3, %v3851_v55, %v923_v59 }
 0x271   : > { %2440 = vmatprep.mubr.msk.bf16.mxu0 %vm1310_vm11, %v1260_v61 }
 0x273   : > { %v953_v15 = vpop.permute.xlu1 %952  ;;  %v1084_v38 = vpop.permute.xlu0 %1083 }
 0x274   : > { %v1262_v32 = vsel %vm1246_vm10, %v1241_v35, %v1084_v38  ;;  %v1140_v9 = vsel %vm1120_vm4, %v1119_v36, %v953_v15 }
 0x275   : > { %2441 = vmatmul.mubr.msk.bf16.gmra.mrb[12].mxu0 %vm1310_vm11, %v1262_v32 }
 0x277   : > { %v983_v6 = vpop.permute.xlu1 %982  ;;  %v951_v23 = vpop.permute.xlu0 %950 }
 0x278   : > { %v1138_v29 = vsel %vm1120_vm4, %v1116_v2, %v951_v23  ;;  %v1161_v25 = vsel %vm1141_vm5, %v1140_v9, %v983_v6 }
 0x27b   : > { %v1004_v13 = vpop.permute.xlu1 %1003  ;;  %v981_v57 = vpop.permute.xlu0 %980 }
 0x27c   : > { %v1159_v37 = vsel %vm1141_vm5, %v1138_v29, %v981_v57  ;;  %v1182_v40 = vsel %vm1162_vm6, %v1161_v25, %v1004_v13 }
 0x27f   : > { %v1025_v26 = vpop.permute.xlu1 %1024  ;;  %v1002_v58 = vpop.permute.xlu0 %1001 }
 0x280   : > { %v1180_v11 = vsel %vm1162_vm6, %v1159_v37, %v1002_v58  ;;  %v1203_v14 = vsel %vm1183_vm7, %v1182_v40, %v1025_v26 }
 0x283   : > { %v1046_v0 = vpop.permute.xlu1 %1045  ;;  %v1023_v46 = vpop.permute.xlu0 %1022 }
 0x284   : > { %v1201_v27 = vsel %vm1183_vm7, %v1180_v11, %v1023_v46  ;;  %v1224_v53 = vsel %vm1204_vm8, %v1203_v14, %v1046_v0 }
 0x287   : > { %v1044_v28 = vpop.permute.xlu0 %1043  ;;  %v1067_v56 = vpop.permute.xlu1 %1066 }
 0x288   : > { %v1222_v33 = vsel %vm1204_vm8, %v1201_v27, %v1044_v28  ;;  %v1245_v47 = vsel %vm1225_vm9, %v1224_v53, %v1067_v56 }
 0x28b   : > { %v1065_v19 = vpop.permute.xlu0 %1064  ;;  %v1088_v55 = vpop.permute.xlu1 %1087 }
 0x28c   : > { %v1243_v60 = vsel %vm1225_vm9, %v1222_v33, %v1065_v19  ;;  %v1266_v21 = vsel %vm1246_vm10, %v1245_v47, %v1088_v55 }
 0x28f   : > { %v1086_v22 = vpop.permute.xlu0 %1085 }
 0x290   : > { %v1264_v48 = vsel %vm1246_vm10, %v1243_v60, %v1086_v22 }
 0x291   : > { %2444 = vmatprep.mubr.msk.bf16.mxu0 %vm1310_vm11, %v1264_v48 }
 0x292   : > { %2445 = vmatmul.mubr.msk.bf16.gmra.mrb[16].mxu0 %vm1310_vm11, %v1266_v21 }
 0x2ed   : > { %v2430_v45 = vpop.f32.mrb[0].mxu0 }
 0x2ee   : > { %v1378_v63 = vadd.f32 %v2430_v45, %v4065_v24  ;;  %v1369_v39 = vpop.f32.mrb[1].mxu0 }
 0x2ef   : > { %v1370_v4 = vadd.f32 %v4065_v24, %v1369_v39  ;;  %v2431_v62 = vpop.f32.mrb[2].mxu0 }
 0x2f0   : > { %v1450_v44 = vmax.f32 %v1378_v63, 0.0  ;;  %v1381_v5 = vadd.f32 %v2431_v62, %v4065_v24  ;;  %v1372_v3 = vpop.f32.mrb[3].mxu0 }
 0x2f1   : > { %v1448_v51 = vmax.f32 %v1370_v4, 0.0  ;;  %v1373_v52 = vadd.f32 %v4065_v24, %v1372_v3 }
 0x2f2   : > { %1470 = vst.msk [vmem:[#allocation2 + $0x10] sm:$0xff] %vm1089_vm3, %v1450_v44  ;;  %v1451_v12 = vmax.f32 %v1381_v5, 0.0 }
 0x2f3   : > { %1468 = vst.msk [vmem:[#allocation2] sm:$0xff] %vm1089_vm3, %v1448_v51  ;;  %v1449_v10 = vmax.f32 %v1373_v52, 0.0  ;;  %v3024_v52 = vmov (!%p2368_p5), 0.0  }
 0x2f4   : > { %1471 = vst.msk [vmem:[#allocation2 + $0x18] sm:$0xff] %vm1089_vm3, %v1451_v12  ;;  %1492 = vst.msk [vmem:[#allocation2] sm:$0xff] (!%p2368_p5), %vm1089_vm3, %v3024_v52 }
 0x2f5   : > { %1469 = vst.msk [vmem:[#allocation2 + $0x8] sm:$0xff] %vm1089_vm3, %v1449_v10 }
 0x2f6   : > { %1493 = vst.msk [vmem:[#allocation2 + $0x8] sm:$0xff] (!%p2368_p5), %vm1089_vm3, %v3024_v52 }
 0x308   : > { %v2434_v59 = vpop.f32.mrb[4].mxu0 }
 0x309   : > { %v1394_v16 = vadd.f32 %v2434_v59, %v4065_v24  ;;  %v1385_v20 = vpop.f32.mrb[5].mxu0 }
 0x30a   : > { %v1386_v61 = vadd.f32 %v4065_v24, %v1385_v20  ;;  %v2435_v41 = vpop.f32.mrb[6].mxu0 }
 0x30b   : > { %v1454_v49 = vmax.f32 %v1394_v16, 0.0  ;;  %v1397_v35 = vadd.f32 %v2435_v41, %v4065_v24  ;;  %v1388_v15 = vpop.f32.mrb[7].mxu0 }
 0x30c   : > { %v1452_v38 = vmax.f32 %v1386_v61, 0.0  ;;  %v1389_v32 = vadd.f32 %v4065_v24, %v1388_v15 }
 0x30d   : > { %1474 = vst.msk [vmem:[#allocation2 + $0x30] sm:$0xff] %vm1089_vm3, %v1454_v49  ;;  %v1455_v6 = vmax.f32 %v1397_v35, 0.0 }
 0x30e   : > { %1472 = vst.msk [vmem:[#allocation2 + $0x20] sm:$0xff] %vm1089_vm3, %v1452_v38  ;;  %v1453_v23 = vmax.f32 %v1389_v32, 0.0 }
 0x30f   : > { %1475 = vst.msk [vmem:[#allocation2 + $0x38] sm:$0xff] %vm1089_vm3, %v1455_v6 }
 0x310   : > { %1473 = vst.msk [vmem:[#allocation2 + $0x28] sm:$0xff] %vm1089_vm3, %v1453_v23 }
 0x328   : > { %v2438_v13 = vpop.f32.mrb[8].mxu0 }
 0x329   : > { %v1410_v57 = vadd.f32 %v2438_v13, %v4065_v24  ;;  %v1401_v26 = vpop.f32.mrb[9].mxu0 }
 0x32a   : > { %v1402_v58 = vadd.f32 %v4065_v24, %v1401_v26  ;;  %v2439_v0 = vpop.f32.mrb[10].mxu0 }
 0x32b   : > { %v1458_v46 = vmax.f32 %v1410_v57, 0.0  ;;  %v1413_v28 = vadd.f32 %v2439_v0, %v4065_v24  ;;  %v1404_v56 = vpop.f32.mrb[11].mxu0 }
 0x32c   : > { %v1456_v2 = vmax.f32 %v1402_v58, 0.0  ;;  %v1405_v36 = vadd.f32 %v4065_v24, %v1404_v56 }
 0x32d   : > { %1478 = vst.msk [vmem:[#allocation2 + $0x50] sm:$0xff] %vm1089_vm3, %v1458_v46  ;;  %v1459_v29 = vmax.f32 %v1413_v28, 0.0 }
 0x32e   : > { %1476 = vst.msk [vmem:[#allocation2 + $0x40] sm:$0xff] %vm1089_vm3, %v1456_v2  ;;  %v1457_v9 = vmax.f32 %v1405_v36, 0.0 }
 0x32f   : > { %1479 = vst.msk [vmem:[#allocation2 + $0x58] sm:$0xff] %vm1089_vm3, %v1459_v29 }
 0x330   : > { %1477 = vst.msk [vmem:[#allocation2 + $0x48] sm:$0xff] %vm1089_vm3, %v1457_v9 }
 0x348   : > { %v2442_v37 = vpop.f32.mrb[12].mxu0 }
 0x349   : > { %v1426_v19 = vadd.f32 %v2442_v37, %v4065_v24  ;;  %v1417_v25 = vpop.f32.mrb[13].mxu0 }
 0x34a   : > { %v1418_v11 = vadd.f32 %v4065_v24, %v1417_v25  ;;  %v2443_v40 = vpop.f32.mrb[14].mxu0 }
 0x34b   : > { %v1462_v27 = vmax.f32 %v1426_v19, 0.0  ;;  %v1429_v14 = vadd.f32 %v2443_v40, %v4065_v24  ;;  %v1420_v33 = vpop.f32.mrb[15].mxu0 }
 0x34c   : > { %v1460_v55 = vmax.f32 %v1418_v11, 0.0  ;;  %v1421_v53 = vadd.f32 %v4065_v24, %v1420_v33 }
 0x34d   : > { %1482 = vst.msk [vmem:[#allocation2 + $0x70] sm:$0xff] %vm1089_vm3, %v1462_v27  ;;  %v1463_v60 = vmax.f32 %v1429_v14, 0.0 }
 0x34e   : > { %1480 = vst.msk [vmem:[#allocation2 + $0x60] sm:$0xff] %vm1089_vm3, %v1460_v55  ;;  %v1461_v22 = vmax.f32 %v1421_v53, 0.0 }
 0x34f   : > { %1483 = vst.msk [vmem:[#allocation2 + $0x78] sm:$0xff] %vm1089_vm3, %v1463_v60 }
 0x350   : > { %1481 = vst.msk [vmem:[#allocation2 + $0x68] sm:$0xff] %vm1089_vm3, %v1461_v22 }
 0x365   : > { %v2446_v47 = vpop.f32.mrb[16].mxu0 }
 0x366   : > { %v1442_v48 = vadd.f32 %v2446_v47, %v4065_v24  ;;  %v1433_v21 = vpop.f32.mrb[17].mxu0 }
 0x367   : > { %v1434_v45 = vadd.f32 %v4065_v24, %v1433_v21  ;;  %v2447_v63 = vpop.f32.mrb[18].mxu0  ;;  %1491 = sbr.rel (%p2368_p5) target bundleno = 878 (0x36e), region = 80 }
 0x368   : > { %v1466_v39 = vmax.f32 %v1442_v48, 0.0  ;;  %v1445_v4 = vadd.f32 %v2447_v63, %v4065_v24  ;;  %v1436_v62 = vpop.f32.mrb[19].mxu0 }
 0x369   : > { %v1464_v44 = vmax.f32 %v1434_v45, 0.0  ;;  %v1437_v5 = vadd.f32 %v4065_v24, %v1436_v62 }
 0x36a   : > { %1486 = vst.msk [vmem:[#allocation2 + $0x90] sm:$0xff] %vm1089_vm3, %v1466_v39  ;;  %v1467_v3 = vmax.f32 %v1445_v4, 0.0 }
 0x36b   : > { %1484 = vst.msk [vmem:[#allocation2 + $0x80] sm:$0xff] %vm1089_vm3, %v1464_v44  ;;  %v1465_v51 = vmax.f32 %v1437_v5, 0.0 }
 0x36c   : > { %1487 = vst.msk [vmem:[#allocation2 + $0x98] sm:$0xff] %vm1089_vm3, %v1467_v3 }
 0x36d   : > { %1485 = vst.msk [vmem:[#allocation2 + $0x88] sm:$0xff] %vm1089_vm3, %v1465_v51 }
 0x36e PF: > { %s4739_s30 = sld [smem:[#allocation22_spill]] }
 0x374   : > { %p2369_p13 = scmp.ne.s32.totalorder %s4739_s30, 1 }
 0x375   : > { %v3025_v24 = vmov (!%p2369_p13), 0.0  }
 0x376   : > { %1497 = sbr.rel (%p2369_p13) target bundleno = 893 (0x37d), region = 84  ;;  %1498 = vst.msk [vmem:[#allocation2 + $0x90] sm:$0xff] (!%p2369_p13), %vm1089_vm3, %v3025_v24  ;;  %1499 = vst.msk [vmem:[#allocation2 + $0x98] sm:$0xff] (!%p2369_p13), %vm1089_vm3, %v3025_v24 }
 0x37d PF: > { %v4116_v12 = vld [vmem:[#allocation2] sm:$0xff]  ;;  %v4118_v10 = vld [vmem:[#allocation2 + $0x8] sm:$0xff]  ;;  %v1502_v59 = vld [vmem:[#allocation2 + $0x10] sm:$0xff]  ;;  %s4777_s2 = sld [smem:[#allocation22_spill]]  ;;  %s4778_s13 = sld [smem:[#allocation23_spill]] }
 0x37e   : > { %v1521_v16 = vrot.slane %v4118_v10, 7  ;;  %v1640_v20 = vpack.c.bf16 %v4118_v10, %v4116_v12  ;;  %v1503_v61 = vld [vmem:[#allocation2 + $0x18] sm:$0xff]  ;;  %v1580_v41 = vrot.slane %v4116_v12, 1  ;;  %v1504_v49 = vld [vmem:[#allocation2 + $0x20] sm:$0xff]  ;;  %v1505_v35 = vld [vmem:[#allocation2 + $0x28] sm:$0xff]  ;;  %v1581_v38 = vrot.slane %v4118_v10, 1 }
 0x37f   : > { %v1641_v15 = vpack.c.bf16 %v1503_v61, %v1502_v59  ;;  %v1582_v32 = vrot.slane %v1502_v59, 1  ;;  %v1522_v6 = vrot.slane %v1502_v59, 7  ;;  %v1523_v23 = vrot.slane %v1503_v61, 7  ;;  %v1506_v11 = vld [vmem:[#allocation2 + $0x30] sm:$0xff]  ;;  %v2668_v45 = vld [vmem:[#allocation9 + $0x18] sm:$0xff]   ;;  %s4527_s30 = scalar_lea.sflag [#allocation5], %s391_s14 }
 0x380   : > { %1678 = vrot.lane.b32.xlu0 %v1640_v20, %s3016_s22  ;;  %v1583_v13 = vrot.slane %v1503_v61, 1  ;;  %v1584_v57 = vrot.slane %v1504_v49, 1  ;;  %v1524_v26 = vrot.slane %v1504_v49, 7  ;;  %v1618_v0 = vsel %vm689_vm0, %v1580_v41, %v1581_v38  ;;  %v2666_v14 = vld [vmem:[#allocation9 + $0x8] sm:$0xff]   ;;  %v4740_v4 = vld [vmem:[#allocation32_spill] sm:$0xff]  ;;  %v4741_v59 = vld [vmem:[#allocation33_spill] sm:$0xff] }
 0x381   : > { %v1617_v58 = vsel %vm689_vm0, %v1581_v38, %v1582_v32  ;;  %v1557_v46 = vsel %vm496_vm1, %v1521_v16, %v1522_v6  ;;  %v1525_v28 = vrot.slane %v1505_v35, 7  ;;  %v1620_v56 = vmul.f32 %v1618_v0, %v3482_v7  ;;  %v1508_v44 = vld [vmem:[#allocation2 + $0x40] sm:$0xff]  ;;  %v4742_v61 = vld [vmem:[#allocation34_spill] sm:$0xff]  ;;  %p4789_p7 = scmp.ne.s32.totalorder %s4681_s12, 0 }
 0x382   : > { %v1621_v2 = vmul.f32 %v1617_v58, %v3498_v17  ;;  %v1556_v36 = vsel %vm496_vm1, %v1522_v6, %v1523_v23  ;;  %v1562_v29 = vmul.f32 %v1557_v46, %v3484_v8  ;;  %v1615_v37 = vsel %vm689_vm0, %v1583_v13, %v1584_v57  ;;  %v2669_v51 = vld [vmem:[#allocation9 + $0x20] ss:$0 sps:$4 sm:$0xff]  }
 0x383   : > { %v1563_v9 = vmul.f32 %v1556_v36, %v3500_v18  ;;  %v1616_v19 = vsel %vm689_vm0, %v1582_v32, %v1583_v13  ;;  %v1554_v25 = vsel %vm496_vm1, %v1524_v26, %v1525_v28  ;;  %v1623_v40 = vmul.f32 %v1615_v37, %v3519_v31  ;;  %v2665_v18 = vld [vmem:[#allocation9] sm:$0xff]   ;;  %v2667_v31 = vld [vmem:[#allocation9 + $0x10] sm:$0xff]   ;;  %s2385_s0 = sshll.u32 %s4777_s2, 4 }
 0x384   : > { %1680 = vrot.lane.b32.xlu0 %v1641_v15, %s3016_s22  ;;  %v1660_v7 = vpack.c.bf16 %v1621_v2, %v1620_v56  ;;  %v1622_v17 = vmul.f32 %v1616_v19, %v3517_v30  ;;  %v1555_v8 = vsel %vm496_vm1, %v1523_v23, %v1524_v26  ;;  %v1565_v53 = vmul.f32 %v1554_v25, %v3535_v43  ;;  %v4158_v30 = vld [vmem:[#allocation2 + $0x38] sm:$0xff]  ;;  %v1510_v19 = vld [vmem:[#allocation2 + $0x50] sm:$0xff] }
 0x385   : > { %v4153_v27 = vpack.c.bf16 %v1563_v9, %v1562_v29  ;;  %v1564_v55 = vmul.f32 %v1555_v8, %v3533_v42  ;;  %2448 = vmatprep.subr.bf16.mxu1 %v2665_v18  ;;  %v1585_v60 = vrot.slane %v1505_v35, 1  ;;  %v1586_v22 = vrot.slane %v1506_v11, 1  ;;  %v4194_v32 = vld [vmem:[#allocation2 + $0x98] sm:$0xff] }
 0x386   : > { %1702 = vrot.lane.b32.xlu1 %v1660_v7, %s3019_s3  ;;  %v1661_v33 = vpack.c.bf16 %v1623_v40, %v1622_v17  ;;  %2449 = vmatpush3.bf16.msra.mxu1 %v2665_v18  ;;  %v1526_v48 = vrot.slane %v1506_v11, 7  ;;  %v1527_v21 = vrot.slane %v4158_v30, 7  ;;  %v1642_v63 = vpack.c.bf16 %v1505_v35, %v1504_v49  ;;  %v4743_v23 = vld [vmem:[#allocation36_spill] sm:$0xff]  ;;  %v4745_v25 = vld [vmem:[#allocation39_spill] sm:$0xff] }
 0x387   : > { %2450 = vmatprep.subr.bf16.mxu1 %v2666_v14  ;;  %v4163_v47 = vpack.c.bf16 %v1565_v53, %v1564_v55  ;;  %v1613_v42 = vsel %vm689_vm0, %v1585_v60, %v1586_v22  ;;  %v1614_v43 = vsel %vm689_vm0, %v1584_v57, %v1585_v60  ;;  %v1587_v52 = vrot.slane %v4158_v30, 1  ;;  %v4744_v57 = vld [vmem:[#allocation37_spill] sm:$0xff]  ;;  %v4746_v7 = vld [vmem:[#allocation40_spill] sm:$0xff] }
 0x388   : > { %1726 = vrot.lane.b32.xlu0 %v4153_v27, %s3020_s23  ;;  %v1624_v39 = vmul.f32 %v1614_v43, %v3552_v54  ;;  %v1625_v62 = vmul.f32 %v1613_v42, %v4740_v4  ;;  %v1552_v5 = vsel %vm496_vm1, %v1526_v48, %v1527_v21  ;;  %v1553_v3 = vsel %vm496_vm1, %v1525_v28, %v1526_v48  ;;  %v1509_v28 = vld [vmem:[#allocation2 + $0x48] sm:$0xff]  ;;  %v1511_v18 = vld [vmem:[#allocation2 + $0x58] sm:$0xff]  ;;  %v1512_v48 = vld [vmem:[#allocation2 + $0x60] sm:$0xff] }
 0x389   : > { %v1588_v24 = vrot.slane %v1508_v44, 1  ;;  %v1566_v20 = vmul.f32 %v1553_v3, %v4741_v59  ;;  %v1567_v49 = vmul.f32 %v1552_v5, %v4742_v61  ;;  %v1520_v6 = vrot.slane %v4116_v12, 7  ;;  %v4748_v42 = vld [vmem:[#allocation42_spill] sm:$0xff]  ;;  %v4750_v5 = vld [vmem:[#allocation44_spill] sm:$0xff] }
 0x38a   : > { %1704 = vrot.lane.b32.xlu1 %v1661_v33, %s3019_s3  ;;  %2451 = vmatpush3.bf16.msra.mxu1 %v2666_v14  ;;  %v1662_v54 = vpack.c.bf16 %v1625_v62, %v1624_v39  ;;  %v1643_v58 = vpack.c.bf16 %v4158_v30, %v1506_v11  ;;  %v1539_v0 = vrot.slane %v4194_v32, 7  ;;  %v1528_v9 = vrot.slane %v1508_v44, 7  ;;  %v4747_v30 = vld [vmem:[#allocation41_spill] sm:$0xff]  ;;  %v4749_v62 = vld [vmem:[#allocation43_spill] sm:$0xff] }
 0x38b   : > { %2452 = vmatprep.subr.bf16.mxu1 %v2667_v31  ;;  %v1611_v35 = vsel %vm689_vm0, %v1587_v52, %v1588_v24  ;;  %v4192_v38 = vpack.c.bf16 %v1567_v49, %v1566_v20  ;;  %v1558_v56 = vsel %vm496_vm1, %v1520_v6, %v1521_v16  ;;  %v1529_v37 = vrot.slane %v1509_v28, 7  ;;  %v4752_v20 = vld [vmem:[#allocation46_spill] sm:$0xff] }
 0x38c   : > { %1743 = vrot.lane.b32.xlu0 %v1641_v15, %s3017_s20  ;;  %v1612_v15 = vsel %vm689_vm0, %v1586_v22, %v1587_v52  ;;  %v1627_v26 = vmul.f32 %v1611_v35, %v4744_v57  ;;  %v1559_v2 = vsel %vm496_vm1, %v1539_v0, %v1520_v6  ;;  %v4217_v29 = vmul.f32 %v1558_v56, %v3823_v34 }
 0x38d   : > { %v1626_v13 = vmul.f32 %v1612_v15, %v4743_v23  ;;  %v4214_v36 = vmul.f32 %v1559_v2, %v3832_v50  ;;  %v2023_v16 = vsel %vm1331_vm2, %v2669_v51, 0  ;;  %v1550_v50 = vsel %vm496_vm1, %v1528_v9, %v1529_v37  ;;  %v1513_v15 = vld [vmem:[#allocation2 + $0x68] sm:$0xff] }
 0x38e   : > { %1728 = vrot.lane.b32.xlu1 %v4163_v47, %s3020_s23  ;;  %2453 = vmatpush3.bf16.msra.mxu1 %v2667_v31  ;;  %v1551_v34 = vsel %vm496_vm1, %v1527_v21, %v1528_v9  ;;  %v1569_v17 = vmul.f32 %v1550_v50, %v4746_v7  ;;  %v1589_v40 = vrot.slane %v1509_v28, 1  ;;  %v1590_v8 = vrot.slane %v1510_v19, 1  ;;  %v4755_v7 = vld [vmem:[#allocation51_spill] sm:$0xff] }
 0x38f   : > { %2454 = vmatprep.subr.bf16.mxu1 %v2668_v45  ;;  %v1663_v46 = vpack.c.bf16 %v1627_v26, %v1626_v13  ;;  %v1650_v10 = vpack.c.bf16 %v4217_v29, %v4214_v36  ;;  %v1568_v11 = vmul.f32 %v1551_v34, %v4745_v25  ;;  %v1530_v53 = vrot.slane %v1510_v19, 7  ;;  %v1514_v26 = vld [vmem:[#allocation2 + $0x70] sm:$0xff] }
 0x390   : > { %1760 = vrot.lane.b32.xlu0 %v1661_v33, %s3021_s17  ;;  %v1609_v33 = vsel %vm689_vm0, %v1589_v40, %v1590_v8  ;;  %v1610_v55 = vsel %vm689_vm0, %v1588_v24, %v1589_v40  ;;  %v1531_v60 = vrot.slane %v1511_v18, 7  ;;  %v1644_v22 = vpack.c.bf16 %v1509_v28, %v1508_v44  ;;  %v4754_v28 = vld [vmem:[#allocation49_spill] sm:$0xff]  ;;  %v4756_v40 = vld [vmem:[#allocation52_spill] sm:$0xff] }
 0x391   : > { %v4236_v14 = vpack.c.bf16 %v1569_v17, %v1568_v11  ;;  %v1628_v31 = vmul.f32 %v1610_v55, %v4747_v30  ;;  %v1629_v43 = vmul.f32 %v1609_v33, %v4748_v42  ;;  %v1592_v39 = vrot.slane %v1512_v48, 1  ;;  %v4757_v30 = vld [vmem:[#allocation53_spill] sm:$0xff]  ;;  %v4758_v42 = vld [vmem:[#allocation54_spill] sm:$0xff] }
 0x392   : > { %1745 = vrot.lane.b32.xlu1 %v1642_v63, %s3017_s20  ;;  %2455 = vmatpush3.bf16.msra.mxu1 %v2668_v45  ;;  %v1548_v21 = vsel %vm496_vm1, %v1530_v53, %v1531_v60  ;;  %v1549_v45 = vsel %vm496_vm1, %v1529_v37, %v1530_v53  ;;  %v1645_v49 = vpack.c.bf16 %v1511_v18, %v1510_v19  ;;  %v1532_v6 = vrot.slane %v1512_v48, 7  ;;  %v1515_v37 = vld [vmem:[#allocation2 + $0x78] sm:$0xff] }
 0x393   : > { %2475 = vmatprep.subr.msk.bf16.mxu1 %vm1331_vm2, %v2669_v51  ;;  %v1664_v4 = vpack.c.bf16 %v1629_v43, %v1628_v31  ;;  %v1570_v44 = vmul.f32 %v1549_v45, %v4749_v62  ;;  %v1571_v3 = vmul.f32 %v1548_v21, %v4750_v5  ;;  %v1533_v23 = vrot.slane %v1513_v15, 7 }
 0x394   : > { %1777 = vrot.lane.b32.xlu0 %v4163_v47, %s3022_s24  ;;  %v1547_v57 = vsel %vm496_vm1, %v1531_v60, %v1532_v6  ;;  %v1593_v2 = vrot.slane %v1513_v15, 1  ;;  %v1594_v9 = vrot.slane %v1514_v26, 1  ;;  %v1534_v19 = vrot.slane %v1514_v26, 7 }
 0x395   : > { %v4262_v24 = vpack.c.bf16 %v1571_v3, %v1570_v44  ;;  %v1546_v13 = vsel %vm496_vm1, %v1532_v6, %v1533_v23  ;;  %v1535_v25 = vrot.slane %v1515_v37, 7  ;;  %v1646_v11 = vpack.c.bf16 %v1513_v15, %v1512_v48  ;;  %v1517_v3 = vld [vmem:[#allocation2 + $0x88] sm:$0xff] }
 0x396   : > { %1762 = vrot.lane.b32.xlu1 %v1662_v54, %s3021_s17  ;;  %2457 = vmatpush3.bf16.msra.mxu1 %v2023_v16  ;;  %v1573_v56 = vmul.f32 %v1546_v13, %v4754_v28  ;;  %v1605_v50 = vsel %vm689_vm0, %v1593_v2, %v1594_v9  ;;  %v1606_v34 = vsel %vm689_vm0, %v1592_v39, %v1593_v2  ;;  %v1595_v53 = vrot.slane %v1515_v37, 1  ;;  %v4763_v28 = vld [vmem:[#allocation61_spill] sm:$0xff]  ;;  %v4764_v2 = vld [vmem:[#allocation62_spill] sm:$0xff] }
 0x397   : > { %v1632_v17 = vmul.f32 %v1606_v34, %v4755_v7  ;;  %v1544_v33 = vsel %vm496_vm1, %v1534_v19, %v1535_v25  ;;  %v1545_v55 = vsel %vm496_vm1, %v1533_v23, %v1534_v19  ;;  %v1647_v44 = vpack.c.bf16 %v1515_v37, %v1514_v26  ;;  %v4766_v7 = vld [vmem:[#allocation64_spill] sm:$0xff] }
 0x398   : > { %1794 = vrot.lane.b32.xlu0 %v1642_v63, %s3018_s21  ;;  %v1574_v31 = vmul.f32 %v1545_v55, %v4757_v30  ;;  %v1575_v43 = vmul.f32 %v1544_v33, %v4758_v42  ;;  %v1604_v21 = vsel %vm689_vm0, %v1594_v9, %v1595_v53  ;;  %v1597_v6 = vrot.slane %v1517_v3, 1 }
 0x39a   : > { %1779 = vrot.lane.b32.xlu1 %v4192_v38, %s3022_s24  ;;  %v4310_v45 = vpack.c.bf16 %v1575_v43, %v1574_v31  ;;  %v4768_v31 = vld [vmem:[#allocation66_spill] sm:$0xff] }
 0x39c   : > { %1811 = vrot.lane.b32.xlu0 %v1662_v54, %s3023_s27 }
 0x39e   : > { %1796 = vrot.lane.b32.xlu1 %v1643_v58, %s3018_s21 }
 0x3a0   : > { %1813 = vrot.lane.b32.xlu0 %v1663_v46, %s3023_s27 }
 0x3a2   : > { %1682 = vrot.lane.b32.xlu1 %v1642_v63, %s3016_s22  ;;  %v1591_v63 = vrot.slane %v1511_v18, 1  ;;  %v1516_v18 = vld [vmem:[#allocation2 + $0x80] sm:$0xff] }
 0x3a3   : > { %v1596_v60 = vrot.slane %v1516_v18, 1 }
 0x3a4   : > { %1706 = vrot.lane.b32.xlu0 %v1662_v54, %s3019_s3  ;;  %v1607_v51 = vsel %vm689_vm0, %v1591_v63, %v1592_v39  ;;  %v1608_v52 = vsel %vm689_vm0, %v1590_v8, %v1591_v63  ;;  %v4751_v54 = vld [vmem:[#allocation45_spill] sm:$0xff]  ;;  %v1633_v8 = vmul.f32 %v1605_v50, %v4756_v40  ;;  %v4759_v63 = vld [vmem:[#allocation56_spill] sm:$0xff]  ;;  %v1599_v40 = vrot.slane %v4194_v32, 1 }
 0x3a5   : > { %v1630_v59 = vmul.f32 %v1608_v52, %v4751_v54  ;;  %v1631_v61 = vmul.f32 %v1607_v51, %v4752_v20  ;;  %v1603_v48 = vsel %vm689_vm0, %v1595_v53, %v1596_v60  ;;  %v1634_v39 = vmul.f32 %v1604_v21, %v4759_v63  ;;  %v1518_v20 = vld [vmem:[#allocation2 + $0x90] sm:$0xff] }
 0x3a6   : > { %1684 = vrot.lane.b32.xlu1 %v1643_v58, %s3016_s22  ;;  %v1536_v51 = vrot.slane %v1516_v18, 7  ;;  %v1537_v52 = vrot.slane %v1517_v3, 7  ;;  %v1598_v23 = vrot.slane %v1518_v20, 1  ;;  %v1602_v26 = vsel %vm689_vm0, %v1596_v60, %v1597_v6 }
 0x3a7   : > { %v1665_v35 = vpack.c.bf16 %v1631_v61, %v1630_v59  ;;  %v4761_v61 = vld [vmem:[#allocation59_spill] sm:$0xff]  ;;  %v1619_v33 = vsel %vm689_vm0, %v1599_v40, %v1580_v41  ;;  %v1649_v60 = vpack.c.bf16 %v4194_v32, %v1518_v20 }
 0x3a8   : > { %1730 = vrot.lane.b32.xlu0 %v4192_v38, %s3020_s23  ;;  %v1542_v54 = vsel %vm496_vm1, %v1536_v51, %v1537_v52  ;;  %v1543_v59 = vsel %vm496_vm1, %v1535_v25, %v1536_v51  ;;  %v4765_v25 = vld [vmem:[#allocation63_spill] sm:$0xff]  ;;  %v1639_v42 = vmul.f32 %v1619_v33, %v4768_v31 }
 0x3aa   : > { %1708 = vrot.lane.b32.xlu1 %v1663_v46, %s3019_s3 }
 0x3ac   : > { %1747 = vrot.lane.b32.xlu0 %v1643_v58, %s3017_s20  ;;  %v4753_v58 = vld [vmem:[#allocation48_spill] sm:$0xff] }
 0x3ae   : > { %1732 = vrot.lane.b32.xlu1 %v4236_v14, %s3020_s23 }
 0x3b0   : > { %1764 = vrot.lane.b32.xlu0 %v1663_v46, %s3021_s17  ;;  %v1572_v46 = vmul.f32 %v1547_v57, %v4753_v58  ;;  %v1601_v57 = vsel %vm689_vm0, %v1597_v6, %v1598_v23  ;;  %v1538_v58 = vrot.slane %v1518_v20, 7 }
 0x3b1   : > { %v1637_v9 = vmul.f32 %v1601_v57, %v4764_v2 }
 0x3b2   : > { %1749 = vrot.lane.b32.xlu1 %v1644_v22, %s3017_s20  ;;  %v4284_v16 = vpack.c.bf16 %v1573_v56, %v1572_v46  ;;  %v1648_v46 = vpack.c.bf16 %v1517_v3, %v1516_v18  ;;  %v1636_v56 = vmul.f32 %v1602_v26, %v4763_v28  ;;  %v1540_v37 = vsel %vm496_vm1, %v1538_v58, %v1539_v0 }
 0x3b3   : > { %v1541_v50 = vsel %vm496_vm1, %v1537_v52, %v1538_v58  ;;  %v1600_v18 = vsel %vm689_vm0, %v1598_v23, %v1599_v40 }
 0x3b4   : > { %1781 = vrot.lane.b32.xlu0 %v4236_v14, %s3022_s24  ;;  %v1668_v19 = vpack.c.bf16 %v1637_v9, %v1636_v56 }
 0x3b6   : > { %1766 = vrot.lane.b32.xlu1 %v1664_v4, %s3021_s17 }
 0x3b8   : > { %1798 = vrot.lane.b32.xlu0 %v1644_v22, %s3018_s21 }
 0x3ba   : > { %1783 = vrot.lane.b32.xlu1 %v4262_v24, %s3022_s24 }
 0x3bc   : > { %1815 = vrot.lane.b32.xlu0 %v1664_v4, %s3023_s27 }
 0x3be   : > { %1800 = vrot.lane.b32.xlu1 %v1645_v49, %s3018_s21 }
 0x3c0   : > { %1817 = vrot.lane.b32.xlu0 %v1665_v35, %s3023_s27 }
 0x3c2   : > { %1686 = vrot.lane.b32.xlu1 %v1644_v22, %s3016_s22  ;;  %v1666_v22 = vpack.c.bf16 %v1633_v8, %v1632_v17  ;;  %v1579_v17 = vmul.f32 %v1540_v37, %v4766_v7 }
 0x3c4   : > { %1710 = vrot.lane.b32.xlu0 %v1664_v4, %s3019_s3  ;;  %v4760_v4 = vld [vmem:[#allocation57_spill] sm:$0xff] }
 0x3c5   : > { %v1635_v62 = vmul.f32 %v1603_v48, %v4760_v4 }
 0x3c6   : > { %1688 = vrot.lane.b32.xlu1 %v1645_v49, %s3016_s22 }
 0x3c7   : > { %v1667_v5 = vpack.c.bf16 %v1635_v62, %v1634_v39 }
 0x3c8   : > { %1734 = vrot.lane.b32.xlu0 %v4262_v24, %s3020_s23 }
 0x3ca   : > { %1712 = vrot.lane.b32.xlu1 %v1665_v35, %s3019_s3 }
 0x3cc   : > { %1751 = vrot.lane.b32.xlu0 %v1645_v49, %s3017_s20  ;;  %v1576_v49 = vmul.f32 %v1543_v59, %v4761_v61 }
 0x3ce   : > { %1736 = vrot.lane.b32.xlu1 %v4284_v16, %s3020_s23 }
 0x3d0   : > { %1768 = vrot.lane.b32.xlu0 %v1665_v35, %s3021_s17  ;;  %v4762_v35 = vld [vmem:[#allocation60_spill] sm:$0xff] }
 0x3d1   : > { %v1577_v15 = vmul.f32 %v1542_v54, %v4762_v35 }
 0x3d2   : > { %1753 = vrot.lane.b32.xlu1 %v1646_v11, %s3017_s20 }
 0x3d3   : > { %v1658_v13 = vpack.c.bf16 %v1577_v15, %v1576_v49 }
 0x3d4   : > { %1785 = vrot.lane.b32.xlu0 %v4284_v16, %s3022_s24 }
 0x3d6   : > { %1770 = vrot.lane.b32.xlu1 %v1666_v22, %s3021_s17 }
 0x3d8   : > { %1802 = vrot.lane.b32.xlu0 %v1646_v11, %s3018_s21 }
 0x3da   : > { %1787 = vrot.lane.b32.xlu1 %v4310_v45, %s3022_s24 }
 0x3dc   : > { %1819 = vrot.lane.b32.xlu0 %v1666_v22, %s3023_s27 }
 0x3de   : > { %1804 = vrot.lane.b32.xlu1 %v1647_v44, %s3018_s21 }
 0x3e0   : > { %1821 = vrot.lane.b32.xlu0 %v1667_v5, %s3023_s27 }
 0x3e2   : > { %1690 = vrot.lane.b32.xlu1 %v1646_v11, %s3016_s22  ;;  %v1578_v11 = vmul.f32 %v1541_v50, %v4765_v25 }
 0x3e4   : > { %1714 = vrot.lane.b32.xlu0 %v1666_v22, %s3019_s3  ;;  %v1659_v8 = vpack.c.bf16 %v1579_v17, %v1578_v11  ;;  %v4767_v22 = vld [vmem:[#allocation65_spill] sm:$0xff] }
 0x3e5   : > { %v1638_v30 = vmul.f32 %v1600_v18, %v4767_v22 }
 0x3e6   : > { %1692 = vrot.lane.b32.xlu1 %v1647_v44, %s3016_s22 }
 0x3e7   : > { %v1669_v1 = vpack.c.bf16 %v1639_v42, %v1638_v30 }
 0x3e8   : > { %1738 = vrot.lane.b32.xlu0 %v4310_v45, %s3020_s23 }
 0x3ea   : > { %1716 = vrot.lane.b32.xlu1 %v1667_v5, %s3019_s3  ;;  %s2186_s3 = sshll.u32 %s4108_s19, 4  ;;  %s4519_s3 = int_to_ptr.vmem [resolvable:$true] %s2186_s3 }
 0x3ec   : > { %1755 = vrot.lane.b32.xlu0 %v1647_v44, %s3017_s20 }
 0x3ee   : > { %1740 = vrot.lane.b32.xlu1 %v1658_v13, %s3020_s23 }
 0x3f0   : > { %1772 = vrot.lane.b32.xlu0 %v1667_v5, %s3021_s17 }
 0x3f2   : > { %1757 = vrot.lane.b32.xlu1 %v1648_v46, %s3017_s20  ;;  %v1679_v34 = vpop.permute.xlu0 %1678  ;;  %s2386_s20 = sshll.u32 %s4778_s13, 5  ;;  %s2868_s13 = scalar_lea.vmem %s4519_s3, 2048 }
 0x3f3   : > { %v1829_v32 = vsel %vm1089_vm3, %v1650_v10, %v1679_v34  ;;  %p2869_p6 = scmp.ne.s32.totalorder %s4519_s3, %s2868_s13 }
 0x3f4   : > { %1789 = vrot.lane.b32.xlu0 %v1658_v13, %s3022_s24 }
 0x3f5   : > { %p2870_p11 = pnand %p2869_p6, %p4789_p7 }
 0x3f6   : > { %1774 = vrot.lane.b32.xlu1 %v1668_v19, %s3021_s17  ;;  %v1681_v0 = vpop.permute.xlu0 %1680 }
 0x3f7   : > { %v1832_v62 = vsel %vm1089_vm3, %v4153_v27, %v1681_v0  ;;  %p2871_p12 = pneg %p2870_p11 }
 0x3f8   : > { %v1703_v55 = vpop.permute.xlu1 %1702  ;;  %1806 = vrot.lane.b32.xlu0 %v1648_v46, %s3018_s21 }
 0x3f9   : > { %v1852_v4 = vsel %vm1120_vm4, %v1829_v32, %v1703_v55 }
 0x3fa   : > { %1791 = vrot.lane.b32.xlu1 %v1659_v8, %s3022_s24  ;;  %v1727_v53 = vpop.permute.xlu0 %1726  ;;  %s4786_s24 = sld [smem:[#allocation76_spill]] }
 0x3fb   : > { %v1868_v44 = vsel %vm1141_vm5, %v1852_v4, %v1727_v53 }
 0x3fc   : > { %v1705_v43 = vpop.permute.xlu1 %1704  ;;  %1823 = vrot.lane.b32.xlu0 %v1668_v19, %s3023_s27 }
 0x3fd   : > { %v1854_v54 = vsel %vm1120_vm4, %v1832_v62, %v1705_v43 }
 0x3fe   : > { %1808 = vrot.lane.b32.xlu1 %v1649_v60, %s3018_s21  ;;  %v1744_v12 = vpop.permute.xlu0 %1743  ;;  %s2183_s21 = sadd.s32 %s2386_s20, %s2385_s0  ;;  %s3026_s0 = smov [#allocation15]  }
 0x3ff   : > { %v1884_v3 = vsel %vm1162_vm6, %v1868_v44, %v1744_v12  ;;  %s2387_s4 = sshll.u32 %s2183_s21, 7  ;;  %s2872_s20 = sshll.u32 %s3026_s0, 4  ;;  %s2873_s20 = int_to_ptr.vmem [resolvable:$false] %s2872_s20 }
 0x400   : > { %v1729_v41 = vpop.permute.xlu1 %1728  ;;  %s4787_s2 = smov %s4786_s24  ;;  %s2874_s21 = scalar_lea.vmem %s2873_s20, 4096 }
 0x401   : > { %v1870_v29 = vsel %vm1141_vm5, %v1854_v54, %v1729_v41  ;;  %p2875_p0 = scmp.lt.s32.totalorder %s4519_s3, %s2873_s20  ;;  %p2876_p3 = scmp.lt.s32.totalorder %s2874_s21, %s2868_s13 }
 0x402   : > { %1825 = vrot.lane.b32.xlu1 %v1669_v1, %s3023_s27  ;;  %v1761_v48 = vpop.permute.xlu0 %1760  ;;  %s4514_s27 = scalar_lea.hbm %s4786_s24, %s2387_s4 }
 0x403   : > { %v1900_v51 = vsel %vm1183_vm7, %v1884_v3, %v1761_v48  ;;  %p2877_p2 = por %p2876_p3, %p2875_p0 }
 0x404   : > { %v1746_v21 = vpop.permute.xlu1 %1745 }
 0x405   : > { %v1886_v20 = vsel %vm1162_vm6, %v1870_v29, %v1746_v21  ;;  %p2878_p9 = pnand %p2877_p2, %p2871_p12 }
 0x406   : > { %v1778_v63 = vpop.permute.xlu0 %1777 }
 0x407   : > { %v1916_v36 = vsel %vm1204_vm8, %v1900_v51, %v1778_v63 }
 0x408   : > { %v1763_v39 = vpop.permute.xlu1 %1762 }
 0x409   : > { %v1902_v61 = vsel %vm1183_vm7, %v1886_v20, %v1763_v39 }
 0x40a   : > { %v1795_v5 = vpop.permute.xlu0 %1794 }
 0x40b   : > { %v1932_v10 = vsel %vm1225_vm9, %v1916_v36, %v1795_v5 }
 0x40c   : > { %v1780_v52 = vpop.permute.xlu1 %1779 }
 0x40d   : > { %v1918_v35 = vsel %vm1204_vm8, %v1902_v61, %v1780_v52 }
 0x40e   : > { %v1812_v59 = vpop.permute.xlu0 %1811 }
 0x40f   : > { %v1948_v27 = vsel %vm1246_vm10, %v1932_v10, %v1812_v59 }
 0x410   : > { %v1797_v49 = vpop.permute.xlu1 %1796  ;;  %2458 = vmatprep.mubr.msk.bf16.mxu1 %vm1310_vm11, %v1948_v27 }
 0x411   : > { %v1934_v15 = vsel %vm1225_vm9, %v1918_v35, %v1797_v49 }
 0x412   : > { %v1814_v6 = vpop.permute.xlu0 %1813 }
 0x413   : > { %v1950_v23 = vsel %vm1246_vm10, %v1934_v15, %v1814_v6 }
 0x414   : > { %v1683_v13 = vpop.permute.xlu1 %1682  ;;  %2459 = vmatmul.mubr.msk.bf16.vlgmr.msra.gmra.mrb[0].mxu1 %vm1310_vm11, %v1950_v23 }
 0x415   : > { %v1835_v50 = vsel %vm1089_vm3, %v4163_v47, %v1683_v13 }
 0x416   : > { %v1707_v57 = vpop.permute.xlu0 %1706 }
 0x417   : > { %v1856_v19 = vsel %vm1120_vm4, %v1835_v50, %v1707_v57 }
 0x418   : > { %v1685_v26 = vpop.permute.xlu1 %1684 }
 0x419   : > { %v1838_v17 = vsel %vm1089_vm3, %v4192_v38, %v1685_v26 }
 0x41a   : > { %v1731_v58 = vpop.permute.xlu0 %1730 }
 0x41b   : > { %v1872_v25 = vsel %vm1141_vm5, %v1856_v19, %v1731_v58 }
 0x41c   : > { %v1709_v46 = vpop.permute.xlu1 %1708 }
 0x41d   : > { %v1858_v8 = vsel %vm1120_vm4, %v1838_v17, %v1709_v46 }
 0x41e   : > { %v1748_v28 = vpop.permute.xlu0 %1747 }
 0x41f   : > { %v1888_v7 = vsel %vm1162_vm6, %v1872_v25, %v1748_v28 }
 0x420   : > { %v1733_v56 = vpop.permute.xlu1 %1732 }
 0x421   : > { %v1874_v47 = vsel %vm1141_vm5, %v1858_v8, %v1733_v56 }
 0x422   : > { %v1765_v2 = vpop.permute.xlu0 %1764 }
 0x423   : > { %v1904_v40 = vsel %vm1183_vm7, %v1888_v7, %v1765_v2 }
 0x424   : > { %v1750_v9 = vpop.permute.xlu1 %1749 }
 0x425   : > { %v1890_v53 = vsel %vm1162_vm6, %v1874_v47, %v1750_v9 }
 0x426   : > { %v1782_v37 = vpop.permute.xlu0 %1781 }
 0x427   : > { %v1920_v18 = vsel %vm1204_vm8, %v1904_v40, %v1782_v37 }
 0x428   : > { %v1767_v34 = vpop.permute.xlu1 %1766 }
 0x429   : > { %v1906_v22 = vsel %vm1183_vm7, %v1890_v53, %v1767_v34 }
 0x42a   : > { %v1799_v11 = vpop.permute.xlu0 %1798 }
 0x42b   : > { %v1936_v33 = vsel %vm1225_vm9, %v1920_v18, %v1799_v11 }
 0x42c   : > { %v1784_v0 = vpop.permute.xlu1 %1783 }
 0x42d   : > { %v1922_v38 = vsel %vm1204_vm8, %v1906_v22, %v1784_v0 }
 0x42e   : > { %v1816_v55 = vpop.permute.xlu0 %1815 }
 0x42f   : > { %v1952_v60 = vsel %vm1246_vm10, %v1936_v33, %v1816_v55 }
 0x430   : > { %v1801_v30 = vpop.permute.xlu1 %1800  ;;  %2462 = vmatprep.mubr.msk.bf16.mxu1 %vm1310_vm11, %v1952_v60 }
 0x431   : > { %v1938_v31 = vsel %vm1225_vm9, %v1922_v38, %v1801_v30 }
 0x432   : > { %v1818_v42 = vpop.permute.xlu0 %1817 }
 0x433   : > { %v1954_v43 = vsel %vm1246_vm10, %v1938_v31, %v1818_v42 }
 0x434   : > { %v1687_v12 = vpop.permute.xlu1 %1686  ;;  %2463 = vmatmul.mubr.msk.bf16.gmra.mrb[4].mxu1 %vm1310_vm11, %v1954_v43 }
 0x435   : > { %v1841_v44 = vsel %vm1089_vm3, %v4236_v14, %v1687_v12  ;;  %v4449_v12 = vld [vmem:[#allocation11] ss:$0 sm:$0xff] }
 0x436   : > { %v1711_v1 = vpop.permute.xlu0 %1710 }
 0x437   : > { %v1860_v3 = vsel %vm1120_vm4, %v1841_v44, %v1711_v1 }
 0x438   : > { %v1689_v41 = vpop.permute.xlu1 %1688 }
 0x439   : > { %v1844_v36 = vsel %vm1089_vm3, %v4262_v24, %v1689_v41 }
 0x43a   : > { %v1735_v48 = vpop.permute.xlu0 %1734 }
 0x43b   : > { %v1876_v51 = vsel %vm1141_vm5, %v1860_v3, %v1735_v48 }
 0x43c   : > { %v1713_v21 = vpop.permute.xlu1 %1712 }
 0x43d   : > { %v1862_v59 = vsel %vm1120_vm4, %v1844_v36, %v1713_v21 }
 0x43e   : > { %v1752_v32 = vpop.permute.xlu0 %1751 }
 0x43f   : > { %v1892_v54 = vsel %vm1162_vm6, %v1876_v51, %v1752_v32 }
 0x440   : > { %v1737_v63 = vpop.permute.xlu1 %1736 }
 0x441   : > { %v1878_v14 = vsel %vm1141_vm5, %v1862_v59, %v1737_v63  ;;  %v4772_v59 = vld [vmem:[#allocation27_spill] sm:$0xff] }
 0x442   : > { %v1769_v39 = vpop.permute.xlu0 %1768 }
 0x443   : > { %v1908_v29 = vsel %vm1183_vm7, %v1892_v54, %v1769_v39 }
 0x444   : > { %v1754_v4 = vpop.permute.xlu1 %1753 }
 0x445   : > { %v1894_v49 = vsel %vm1162_vm6, %v1878_v14, %v1754_v4 }
 0x446   : > { %v1786_v62 = vpop.permute.xlu0 %1785 }
 0x447   : > { %v1924_v20 = vsel %vm1204_vm8, %v1908_v29, %v1786_v62  ;;  %v4771_v29 = vld [vmem:[#allocation29_spill] sm:$0xff] }
 0x448   : > { %v1771_v5 = vpop.permute.xlu1 %1770 }
 0x449   : > { %v1910_v15 = vsel %vm1183_vm7, %v1894_v49, %v1771_v5  ;;  %v4769_v5 = vld [vmem:[#allocation28_spill] sm:$0xff] }
 0x44a   : > { %v1803_v52 = vpop.permute.xlu0 %1802 }
 0x44b   : > { %v1940_v27 = vsel %vm1225_vm9, %v1924_v20, %v1803_v52  ;;  %v4770_v52 = vld [vmem:[#allocation26_spill] sm:$0xff] }
 0x44c   : > { %v1788_v10 = vpop.permute.xlu1 %1787 }
 0x44d   : > { %v1926_v24 = vsel %vm1204_vm8, %v1910_v15, %v1788_v10 }
 0x44e   : > { %v1820_v61 = vpop.permute.xlu0 %1819 }
 0x44f   : > { %v1956_v35 = vsel %vm1246_vm10, %v1940_v27, %v1820_v61 }
 0x450   : > { %v1805_v6 = vpop.permute.xlu1 %1804  ;;  %2466 = vmatprep.mubr.msk.bf16.mxu1 %vm1310_vm11, %v1956_v35 }
 0x451   : > { %v1942_v23 = vsel %vm1225_vm9, %v1926_v24, %v1805_v6 }
 0x452   : > { %v1822_v13 = vpop.permute.xlu0 %1821 }
 0x453   : > { %v1958_v57 = vsel %vm1246_vm10, %v1942_v23, %v1822_v13 }
 0x454   : > { %v1691_v26 = vpop.permute.xlu1 %1690  ;;  %2467 = vmatmul.mubr.msk.bf16.gmra.mrb[8].mxu1 %vm1310_vm11, %v1958_v57  ;;  %v4773_v57 = vld [vmem:[#allocation35_spill] sm:$0xff] }
 0x455   : > { %v1847_v19 = vsel %vm1089_vm3, %v4284_v16, %v1691_v26 }
 0x456   : > { %v1715_v58 = vpop.permute.xlu0 %1714 }
 0x457   : > { %v1864_v11 = vsel %vm1120_vm4, %v1847_v19, %v1715_v58 }
 0x458   : > { %v1693_v46 = vpop.permute.xlu1 %1692 }
 0x459   : > { %v1850_v47 = vsel %vm1089_vm3, %v4310_v45, %v1693_v46  ;;  %v4774_v46 = vld [vmem:[#allocation30_spill] sm:$0xff] }
 0x45a   : > { %v1739_v28 = vpop.permute.xlu0 %1738 }
 0x45b   : > { %v1880_v7 = vsel %vm1141_vm5, %v1864_v11, %v1739_v28 }
 0x45c   : > { %v1717_v56 = vpop.permute.xlu1 %1716 }
 0x45d   : > { %v1866_v16 = vsel %vm1120_vm4, %v1850_v47, %v1717_v56  ;;  %v4779_v47 = vld [vmem:[#allocation55_spill] sm:$0xff] }
 0x45e   : > { %v1756_v2 = vpop.permute.xlu0 %1755 }
 0x45f   : > { %v1896_v40 = vsel %vm1162_vm6, %v1880_v7, %v1756_v2  ;;  %v4775_v2 = vld [vmem:[#allocation38_spill] sm:$0xff] }
 0x460   : > { %v1741_v9 = vpop.permute.xlu1 %1740 }
 0x461   : > { %v1882_v60 = vsel %vm1141_vm5, %v1866_v16, %v1741_v9  ;;  %v4780_v16 = vld [vmem:[#allocation47_spill] sm:$0xff] }
 0x462   : > { %v1773_v37 = vpop.permute.xlu0 %1772 }
 0x463   : > { %v1912_v0 = vsel %vm1183_vm7, %v1896_v40, %v1773_v37  ;;  %v4776_v37 = vld [vmem:[#allocation31_spill] sm:$0xff] }
 0x464   : > { %v1758_v50 = vpop.permute.xlu1 %1757 }
 0x465   : > { %v1898_v30 = vsel %vm1162_vm6, %v1882_v60, %v1758_v50 }
 0x466   : > { %v1790_v34 = vpop.permute.xlu0 %1789 }
 0x467   : > { %v1928_v18 = vsel %vm1204_vm8, %v1912_v0, %v1790_v34 }
 0x468   : > { %v1775_v25 = vpop.permute.xlu1 %1774 }
 0x469   : > { %v1914_v38 = vsel %vm1183_vm7, %v1898_v30, %v1775_v25 }
 0x46a   : > { %v1807_v17 = vpop.permute.xlu0 %1806 }
 0x46b   : > { %v1944_v33 = vsel %vm1225_vm9, %v1928_v18, %v1807_v17 }
 0x46c   : > { %v1792_v8 = vpop.permute.xlu1 %1791 }
 0x46d   : > { %v1930_v31 = vsel %vm1204_vm8, %v1914_v38, %v1792_v8  ;;  %v4782_v38 = vld [vmem:[#allocation50_spill] sm:$0xff] }
 0x46e   : > { %v1824_v55 = vpop.permute.xlu0 %1823 }
 0x46f   : > { %v1960_v53 = vsel %vm1246_vm10, %v1944_v33, %v1824_v55 }
 0x470   : > { %v1809_v22 = vpop.permute.xlu1 %1808  ;;  %2470 = vmatprep.mubr.msk.bf16.mxu1 %vm1310_vm11, %v1960_v53 }
 0x471   : > { %v1946_v45 = vsel %vm1225_vm9, %v1930_v31, %v1809_v22  ;;  %v4781_v22 = vld [vmem:[#allocation58_spill] sm:$0xff] }
 0x474   : > { %v1826_v42 = vpop.permute.xlu1 %1825 }
 0x475   : > { %v1962_v43 = vsel %vm1246_vm10, %v1946_v45, %v1826_v42 }
 0x476   : > { %2471 = vmatmul.mubr.msk.bf16.gmra.mrb[12].mxu1 %vm1310_vm11, %v1962_v43 }
 0x4e7   : > { %v2460_v1 = vpop.f32.mrb[0].mxu1 }
 0x4e8   : > { %v2068_v41 = vadd.f32 %v2460_v1, %v4449_v12  ;;  %v2059_v48 = vpop.f32.mrb[1].mxu1 }
 0x4e9   : > { %v2060_v21 = vadd.f32 %v4449_v12, %v2059_v48  ;;  %v2461_v32 = vpop.f32.mrb[2].mxu1 }
 0x4ea   : > { %v2124_v63 = vmax.f32 %v2068_v41, 0.0  ;;  %v2071_v39 = vadd.f32 %v2461_v32, %v4449_v12  ;;  %v2062_v4 = vpop.f32.mrb[3].mxu1 }
 0x4eb   : > { %v2122_v62 = vmax.f32 %v2060_v21, 0.0  ;;  %v2063_v44 = vadd.f32 %v4449_v12, %v2062_v4  ;;  %v4783_v4 = vld [vmem:[#allocation69_spill] sm:$0xff] }
 0x4ec   : > { %v2140_v3 = vadd.f32 %v2124_v63, %v4769_v5  ;;  %v2125_v51 = vmax.f32 %v2071_v39, 0.0  ;;  %v4784_v5 = vld [vmem:[#allocation67_spill] sm:$0xff] }
 0x4ed   : > { %v2138_v54 = vadd.f32 %v2122_v62, %v4770_v52  ;;  %v2123_v36 = vmax.f32 %v2063_v44, 0.0  ;;  %v4785_v52 = vld [vmem:[#allocation70_spill] sm:$0xff] }
 0x4ee   : > { %2156 = vst.msk [vmem:[%s4108_s19 + $0x10] sm:$0xff] %vm1089_vm3, %v2140_v3  ;;  %v2141_v10 = vadd.f32 %v2125_v51, %v4771_v29 }
 0x4ef   : > { %2154 = vst.msk [vmem:[%s4108_s19] sm:$0xff] %vm1089_vm3, %v2138_v54  ;;  %v2139_v20 = vadd.f32 %v2123_v36, %v4772_v59 }
 0x4f0   : > { %2157 = vst.msk [vmem:[%s4108_s19 + $0x18] sm:$0xff] %vm1089_vm3, %v2141_v10 }
 0x4f1   : > { %2155 = vst.msk [vmem:[%s4108_s19 + $0x8] sm:$0xff] %vm1089_vm3, %v2139_v20 }
 0x507   : > { %v2464_v14 = vpop.f32.mrb[4].mxu1 }
 0x508   : > { %v2084_v27 = vadd.f32 %v2464_v14, %v4449_v12  ;;  %v2075_v61 = vpop.f32.mrb[5].mxu1 }
 0x509   : > { %v2076_v49 = vadd.f32 %v4449_v12, %v2075_v61  ;;  %v2465_v35 = vpop.f32.mrb[6].mxu1 }
 0x50a   : > { %v2128_v15 = vmax.f32 %v2084_v27, 0.0  ;;  %v2087_v6 = vadd.f32 %v2465_v35, %v4449_v12  ;;  %v2078_v24 = vpop.f32.mrb[7].mxu1 }
 0x50b   : > { %v2126_v23 = vmax.f32 %v2076_v49, 0.0  ;;  %v2079_v13 = vadd.f32 %v4449_v12, %v2078_v24 }
 0x50c   : > { %v2144_v26 = vadd.f32 %v2128_v15, %v4773_v57  ;;  %v2129_v58 = vmax.f32 %v2087_v6, 0.0 }
 0x50d   : > { %v2142_v28 = vadd.f32 %v2126_v23, %v4774_v46  ;;  %v2127_v56 = vmax.f32 %v2079_v13, 0.0 }
 0x50e   : > { %2160 = vst.msk [vmem:[%s4108_s19 + $0x30] sm:$0xff] %vm1089_vm3, %v2144_v26  ;;  %v2145_v9 = vadd.f32 %v2129_v58, %v4775_v2 }
 0x50f   : > { %2158 = vst.msk [vmem:[%s4108_s19 + $0x20] sm:$0xff] %vm1089_vm3, %v2142_v28  ;;  %v2143_v50 = vadd.f32 %v2127_v56, %v4776_v37 }
 0x510   : > { %2161 = vst.msk [vmem:[%s4108_s19 + $0x38] sm:$0xff] %vm1089_vm3, %v2145_v9 }
 0x511   : > { %2159 = vst.msk [vmem:[%s4108_s19 + $0x28] sm:$0xff] %vm1089_vm3, %v2143_v50 }
 0x527   : > { %v2468_v34 = vpop.f32.mrb[8].mxu1 }
 0x528   : > { %v2100_v19 = vadd.f32 %v2468_v34, %v4449_v12  ;;  %v2091_v25 = vpop.f32.mrb[9].mxu1 }
 0x529   : > { %v2092_v11 = vadd.f32 %v4449_v12, %v2091_v25  ;;  %v2469_v7 = vpop.f32.mrb[10].mxu1 }
 0x52a   : > { %v2132_v17 = vmax.f32 %v2100_v19, 0.0  ;;  %v2103_v40 = vadd.f32 %v2469_v7, %v4449_v12  ;;  %v2094_v0 = vpop.f32.mrb[11].mxu1 }
 0x52b   : > { %v2130_v8 = vmax.f32 %v2092_v11, 0.0  ;;  %v2095_v18 = vadd.f32 %v4449_v12, %v2094_v0 }
 0x52c   : > { %v2148_v33 = vadd.f32 %v2132_v17, %v4779_v47  ;;  %v2133_v55 = vmax.f32 %v2103_v40, 0.0 }
 0x52d   : > { %v2146_v53 = vadd.f32 %v2130_v8, %v4780_v16  ;;  %v2131_v60 = vmax.f32 %v2095_v18, 0.0 }
 0x52e   : > { %2164 = vst.msk [vmem:[%s4108_s19 + $0x50] sm:$0xff] %vm1089_vm3, %v2148_v33  ;;  %v2149_v30 = vadd.f32 %v2133_v55, %v4781_v22 }
 0x52f   : > { %2162 = vst.msk [vmem:[%s4108_s19 + $0x40] sm:$0xff] %vm1089_vm3, %v2146_v53  ;;  %v2147_v31 = vadd.f32 %v2131_v60, %v4782_v38 }
 0x530   : > { %2165 = vst.msk [vmem:[%s4108_s19 + $0x58] sm:$0xff] %vm1089_vm3, %v2149_v30 }
 0x531   : > { %2163 = vst.msk [vmem:[%s4108_s19 + $0x48] sm:$0xff] %vm1089_vm3, %v2147_v31 }
 0x549   : > { %v2472_v45 = vpop.f32.mrb[12].mxu1 }
 0x54a   : > { %v2116_v42 = vadd.f32 %v2472_v45, %v4449_v12  ;;  %v2107_v43 = vpop.f32.mrb[13].mxu1 }
 0x54b   : > { %v2108_v1 = vadd.f32 %v4449_v12, %v2107_v43  ;;  %v2473_v41 = vpop.f32.mrb[14].mxu1 }
 0x54c   : > { %v2136_v48 = vmax.f32 %v2116_v42, 0.0  ;;  %v2119_v21 = vadd.f32 %v2473_v41, %v4449_v12  ;;  %v2110_v32 = vpop.f32.mrb[15].mxu1 }
 0x54d   : > { %v2134_v63 = vmax.f32 %v2108_v1, 0.0  ;;  %v2111_v39 = vadd.f32 %v4449_v12, %v2110_v32  ;;  %v4788_v12 = vld [vmem:[#allocation68_spill] sm:$0xff] }
 0x54e   : > { %v2152_v62 = vadd.f32 %v2136_v48, %v4783_v4  ;;  %v2137_v44 = vmax.f32 %v2119_v21, 0.0 }
 0x54f   : > { %v2150_v3 = vadd.f32 %v2134_v63, %v4784_v5  ;;  %v2135_v51 = vmax.f32 %v2111_v39, 0.0 }
 0x550   : > { %2168 = vst.msk [vmem:[%s4108_s19 + $0x70] sm:$0xff] %vm1089_vm3, %v2152_v62  ;;  %v2153_v54 = vadd.f32 %v2137_v44, %v4785_v52 }
 0x551   : > { %2166 = vst.msk [vmem:[%s4108_s19 + $0x60] sm:$0xff] %vm1089_vm3, %v2150_v3  ;;  %v2151_v36 = vadd.f32 %v2135_v51, %v4788_v12 }
 0x552   : > { %2169 = vst.msk [vmem:[%s4108_s19 + $0x78] sm:$0xff] %vm1089_vm3, %v2153_v54 }
 0x553   : > { %2167 = vst.msk [vmem:[%s4108_s19 + $0x68] sm:$0xff] %vm1089_vm3, %v2151_v36 }
 0x554   : > { %2881 = shalt.err (!%p2878_p9)
}
 0x555   : > { %s2882_s14 = scalar_lea.hbm %s4514_s27, 2048  ;;  %s2886_s23 = scalar_lea.hbm %s4787_s2, 8192 }
 0x556   : > { %p2883_p4 = scmp.ne.s32.totalorder %s4514_s27, %s2882_s14  ;;  %p2887_p8 = scmp.lt.u32.totalorder %s4514_s27, %s4787_s2 }
 0x557   : > { %p2888_p5 = scmp.lt.u32.totalorder %s2886_s23, %s2882_s14  ;;  %p2890_p6 = scmp.lt.u32.totalorder %s2882_s14, %s4514_s27 }
 0x558   : > { %p2884_p10 = pnand %p2883_p4, %p4789_p7 }
 0x559   : > { %p2889_p13 = por %p2888_p5, %p2887_p8 }
 0x55a   : > { %p2885_p1 = pneg %p2884_p10 }
 0x55b   : > { %p2891_p11 = por %p2890_p6, %p2889_p13 }
 0x55d   : > { %p2892_p12 = pnand %p2891_p11, %p2885_p1 }
 0x55f   : > { %2895 = shalt.err (!%p2892_p12)
}
 0x560   : > { %s3027_s13 = smov 128  }
 0x561   : > { %2505 = dma.vmem_to_hbm [thread:$0]  (%p4789_p7), %s4519_s3, 2048, %s4514_s27, %s4527_s30, %s3027_s13, %s3027_s13, %s3016_s22  }
 0x562 PF: > { %s4790_s0 = sld [smem:[#allocation21_spill]]  ;;  %p2547_p0 = scmp.ge.s32.totalorder %s3002_s11, 2 }
 0x563   : > { %p4791_p3 = scmp.ne.s32.totalorder %s4682_s8, 0 }
 0x565   : > { %p2531_p2 = pnand %p2547_p0, %p4791_p3 }
 0x568   : > { %s2201_s20 = sand.u32 1, %s4790_s0  }
 0x569   : > { %s2202_s21 = scalar_lea.sflag [#allocation5], %s2201_s20 }
 0x56a   : > { %2957 = dma.done.wait (!%p2531_p2), %s2202_s21, 2048  }
 0x56b   : > { %2959 = vsyncadd (!%p2531_p2), %s2202_s21, 4294965248  ;;  %s26_s11 = sadd.s32 1, %s3002_s11   ;;  %s4792_s24 = smov %s2966_s25 }
 0x56c   : > { %p23_p9 = scmp.ge.s32.totalorder %s26_s11, 6   ;;  %s4793_s25 = smov %s2970_s26 }
 0x56d   : > { %s4794_s26 = smov %s3338_s16  ;;  %s4795_s27 = smov %s2978_s28 }
 0x56e   : > { %s4796_s28 = smov %s2982_s29  ;;  %s4797_s29 = smov %s3335_s15 }
 0x56f   : > { %s4798_s30 = smov %s2994_s9  ;;  %s4799_s8 = smov %s2998_s10 }
 0x570   : > { %s4800_s9 = smov %s4803_s18  ;;  %s4801_s10 = smov %s4807_s7 }
 0x571   :  { %25 = sbr.rel (!%p23_p9) target bundleno = 19 (0x13), region = 126 }
 0x578   :  { %2207 = vsyncpa [#allocation4], 1 }
 0x579   :  { %2209 = vsyncpa [#allocation4 + $0x1], 1 }
 0x57a   :  { %2210 = vsyncpa [#allocation7], 1 }
 0x57b   :  { %2211 = vsyncpa [#allocation10], 1 }
 0x57c   :  { %2212 = vsyncpa [#allocation13], 1 }
 0x57d   :  { %2213 = vsyncpa [#allocation5], 1 }
 0x57e   :  { %2215 = vsyncpa [#allocation5 + $0x1], 1 }

</bundles_post_ra>
